<compile_context>
chip_gen: v7x
topology: tpu7x:2x2x1
jax: 0.10.0
libtpu: 0.0.40
codegen_flags: <defaults>
</compile_context>

<pallas_src>
import functools

import jax
import jax.numpy as jnp
from jax import lax
from jax.experimental import pallas as pl
from jax.experimental.pallas import tpu as pltpu


# --------------------------------------------------------------------------
# Pallas kernel
# --------------------------------------------------------------------------
def _bam_kernel(Bb, HW, shifts,
                x_ref, mask_ref,
                w1_ref, b1_ref, w2_ref, b2_ref,        # channel gate (BN folded)
                wr_ref, br_ref,                        # spatial 1x1 reduce (BN folded)
                wd1_ref, bd1_ref, wd2_ref, bd2_ref,    # dilated 3x3 convs (per-tap weights)
                wf_ref, bf_ref,                        # spatial final 1x1
                o_ref):
    inv_hw = jnp.float32(1.0 / HW)

    # Hoist the small constants once (masks: (9, HW); weights are tiny).
    masks = mask_ref[...]                              # (9, HW) f32
    w1 = w1_ref[...]; b1 = b1_ref[...]                 # (Cg8, C) f32, (Cg8, 1)
    w2 = w2_ref[...]; b2 = b2_ref[...]                 # (C, Cg8) f32, (C, 1)
    wr = wr_ref[...]; br = br_ref[...]                 # (Crp, C) bf16, (Crp, 1) f32
    wd1 = wd1_ref[...]; bd1 = bd1_ref[...]             # (9, Crp, Crp) bf16, (Crp, 1) f32
    wd2 = wd2_ref[...]; bd2 = bd2_ref[...]
    wf = wf_ref[...]; bf = bf_ref[...]                 # (1, Crp) bf16, (1, 1) f32

    def dilated(y, wd, bd):
        # One dilated 3x3 conv = 9 accumulated small matmuls.  Each tap is a
        # static lane rotation (XLU) of the f32 activation, masked by a single
        # (1, HW) boundary row (sublane broadcast), cast to bf16 and fed to
        # the MXU with f32 accumulation.  Nothing wide is ever materialized.
        acc = bd                                       # (Crp, 1) -> broadcasts on 1st add
        for k, s in enumerate(shifts):
            tap = y if s == 0 else pltpu.roll(y, shift=(-s) % HW, axis=1)
            tap = (tap * masks[k:k + 1, :]).astype(jnp.bfloat16)
            acc = acc + jnp.dot(wd[k], tap, preferred_element_type=jnp.float32)
        return acc                                     # (Crp, HW) f32

    for b in range(Bb):
        xb = x_ref[b]                                  # (C, HW) bf16 slab of the block

        # ---- channel gate: GAP -> FC -> ReLU -> FC (BN folded, f32) ----
        xm = jnp.sum(xb, axis=-1, keepdims=True, dtype=jnp.float32) * inv_hw   # (C, 1)
        h1 = jnp.maximum(jnp.dot(w1, xm, preferred_element_type=jnp.float32) + b1, 0.0)
        cg = jnp.dot(w2, h1, preferred_element_type=jnp.float32) + b2          # (C, 1)

        # ---- spatial gate: 1x1 reduce -> 2x dilated 3x3 -> 1x1 (BN folded) ----
        y = jnp.dot(wr, xb, preferred_element_type=jnp.float32) + br           # (Crp, HW)
        y = jnp.maximum(y, 0.0)
        y = jnp.maximum(dilated(y, wd1, bd1), 0.0)
        y = jnp.maximum(dilated(y, wd2, bd2), 0.0)
        sg = jnp.dot(wf, y.astype(jnp.bfloat16),
                     preferred_element_type=jnp.float32) + bf                  # (1, HW)

        # ---- combine: out = (1 + sigmoid(channel * spatial)) * x ----
        att = 1.0 + jax.nn.sigmoid(cg * sg)                                    # (C, HW) f32
        # Re-read x_ref[b] (block is resident in the pipelined VMEM buffer)
        # instead of keeping a copy live across the spatial branch.
        o_ref[b] = (att * x_ref[b]).astype(o_ref.dtype)


# --------------------------------------------------------------------------
# Wrapper helpers
# --------------------------------------------------------------------------
def _device_kind():
    try:
        return jax.devices()[0].device_kind
    except Exception:
        return ""


def _is_multi_tensorcore(kind):
    """Single-TC-per-device chips: v2/v3 (one core per JAX device), v5e, v6e.
    Multi-TC per device: v4 / v5p megacore, v7x dual TC.  Unknown -> assume
    multi (the >= 2-step constraint is harmless on single-TC)."""
    k = kind.lower()
    single = ("v2", "v3", "v5e", "v5 lite", "v5lite", "v6e", "v6 lite", "v6lite")
    return not any(t in k for t in single)


def _vmem_limit_bytes(kind):
    k = kind.lower()
    if "7" in k:                    # v7x: 64 MiB physical VMEM per TensorCore
        return 48 * 1024 * 1024
    return 64 * 1024 * 1024         # v5e/v6e: 128 MiB physical -> lots of headroom


def _pick_block_batch(B, C, HW, itemsize, target_bytes, *, multi_tc, max_bb=32):
    """Largest Bb dividing B whose in-block fits target_bytes.  The >= 2-step
    grid constraint is only applied on multi-TensorCore hardware.  target_bytes
    is derived from the VMEM limit counting the double-buffered in+out blocks
    (4 block-sized buffers); max_bb only bounds kernel unrolling."""
    best = 1
    for bb in range(1, min(B, max_bb) + 1):
        if B % bb:
            continue
        if bb * C * HW * itemsize > target_bytes:
            continue
        if multi_tc and B >= 2 and B // bb < 2:
            continue
        best = bb
    return best


def _make_shifts_and_masks(H, W, dilation=4):
    """Static flattened-lane shifts and the (9, HW) boundary masks (one row per
    tap, no Crp/Bb replication -- applied by sublane broadcast in the kernel).
    The mask also kills any lane wrap-around from the rolls."""
    HW = H * W
    idx = jnp.arange(HW, dtype=jnp.int32)
    hh = idx // W
    ww = idx % W
    shifts, rows = [], []
    for kh in range(3):
        for kw in range(3):
            dh = (kh - 1) * dilation
            dw = (kw - 1) * dilation
            shifts.append(dh * W + dw)
            m = ((hh + dh >= 0) & (hh + dh < H) &
                 (ww + dw >= 0) & (ww + dw < W))
            rows.append(m.astype(jnp.float32))
    return tuple(shifts), jnp.stack(rows, axis=0)       # (9, HW) f32


# --------------------------------------------------------------------------
# Wrapper
# --------------------------------------------------------------------------
def bam_pallas(x, params, *, block_batch=None, io_dtype=jnp.bfloat16):
    B, C, H, W = x.shape
    assert H == W, "avg_pool2d(kernel=H, stride=H) in BAM assumes square input"
    HW = H * W
    assert C % 8 == 0 and HW % 128 == 0, \
        "BAM Pallas kernel assumes C % 8 == 0 and H*W % 128 == 0 for (8,128) tiling"

    kind = _device_kind()
    multi_tc = _is_multi_tensorcore(kind)
    vmem_limit = _vmem_limit_bytes(kind)
    itemsize = jnp.dtype(io_dtype).itemsize
    # 2x double-buffered input block + 2x output block <= half the VMEM limit.
    target_bytes = vmem_limit // 8

    Bb = block_batch or _pick_block_batch(B, C, HW, itemsize, target_bytes,
                                          multi_tc=multi_tc)
    assert B % Bb == 0
    shifts, masks = _make_shifts_and_masks(H, W)

    x_flat = x.reshape(B, C, HW).astype(io_dtype)       # bf16 at the HBM boundary
    weights = [params[k] for k in ("w1", "b1", "w2", "b2",
                                   "wr", "br",
                                   "wd1", "bd1", "wd2", "bd2",
                                   "wf", "bf")]

    def const_spec(a):
        nd = a.ndim
        return pl.BlockSpec(a.shape, lambda i, _nd=nd: (0,) * _nd)

    kernel = functools.partial(_bam_kernel, Bb, HW, shifts)
    out = pl.pallas_call(
        kernel,
        out_shape=jax.ShapeDtypeStruct((B, C, HW), io_dtype),
        grid_spec=pltpu.PrefetchScalarGridSpec(
            num_scalar_prefetch=0,
            grid=(B // Bb,),
            in_specs=[pl.BlockSpec((Bb, C, HW), lambda i: (i, 0, 0)),
                      const_spec(masks)]
                     + [const_spec(w) for w in weights],
            out_specs=pl.BlockSpec((Bb, C, HW), lambda i: (i, 0, 0)),
        ),
        compiler_params=pltpu.CompilerParams(
            dimension_semantics=("parallel",),
            vmem_limit_bytes=vmem_limit),
    )(x_flat, masks, *weights)
    return out.reshape(B, C, H, W)


# --------------------------------------------------------------------------
# Deterministic parameter construction (torch layouts) + eval-mode BN folding
# --------------------------------------------------------------------------
def make_raw_params(key, C, reduction=16):
    Cr = C // reduction
    ks = iter(jax.random.split(key, 40))

    def nrm(shape, s=0.2):
        return s * jax.random.normal(next(ks), shape, jnp.float32)

    def bn(c):
        return dict(g=1.0 + nrm((c,), 0.05), b=nrm((c,), 0.05),
                    m=nrm((c,), 0.05), v=1.0 + jnp.abs(nrm((c,), 0.05)))

    raw = {
        # channel gate: Linear(C->Cr), BN1d(Cr), ReLU, Linear(Cr->C)
        "fc0_w": nrm((Cr, C)), "fc0_b": nrm((Cr,)),
        "fc1_w": nrm((C, Cr)), "fc1_b": nrm((C,)),
        # spatial gate convs (torch OIHW layout)
        "cr_w": nrm((Cr, C, 1, 1)), "cr_b": nrm((Cr,)),
        "d0_w": nrm((Cr, Cr, 3, 3)), "d0_b": nrm((Cr,)),
        "d1_w": nrm((Cr, Cr, 3, 3)), "d1_b": nrm((Cr,)),
        "cf_w": nrm((1, Cr, 1, 1)), "cf_b": nrm((1,)),
    }
    for name, c in (("cbn", Cr), ("rbn", Cr), ("dbn0", Cr), ("dbn1", Cr)):
        for k, v in bn(c).items():
            raw[f"{name}_{k}"] = v
    return raw


def fold_params(raw, eps=1e-5):
    """Fold eval-mode BN into the preceding layer, zero-pad both bottlenecks
    (channel-gate Cr and spatial Cr) up to a multiple of 8, repack the dilated
    conv weights OIHW -> (9, Crp_out, Crp_in) per-tap, and cast the
    spatial-branch weights to bf16 (f32 accumulation happens in-kernel)."""
    def bn_fold(prefix):
        s = raw[f"{prefix}_g"] / jnp.sqrt(raw[f"{prefix}_v"] + eps)
        t = raw[f"{prefix}_b"] - raw[f"{prefix}_m"] * s
        return s, t

    Cr = raw["cr_w"].shape[0]
    Crp = max(8, ((Cr + 7) // 8) * 8)           # spatial bottleneck, padded
    Cg = raw["fc0_w"].shape[0]
    Cgp = max(8, ((Cg + 7) // 8) * 8)           # channel-gate bottleneck, padded

    def pad_rows(a, rows):
        return jnp.pad(a, ((0, rows - a.shape[0]),) + ((0, 0),) * (a.ndim - 1))

    p = {}
    # channel gate (stays f32; tiny)
    s, t = bn_fold("cbn")
    p["w1"] = pad_rows(raw["fc0_w"] * s[:, None], Cgp)              # (Cgp, C)
    p["b1"] = pad_rows((raw["fc0_b"] * s + t)[:, None], Cgp)        # (Cgp, 1)
    p["w2"] = jnp.pad(raw["fc1_w"], ((0, 0), (0, Cgp - Cg)))        # (C, Cgp)
    p["b2"] = raw["fc1_b"][:, None]                                 # (C, 1)

    # spatial reduce 1x1 (BN folded, padded to Crp output channels)
    s, t = bn_fold("rbn")
    p["wr"] = pad_rows(raw["cr_w"][:, :, 0, 0] * s[:, None], Crp).astype(jnp.bfloat16)
    p["br"] = pad_rows((raw["cr_b"] * s + t)[:, None], Crp)         # (Crp, 1) f32

    # dilated convs: fold BN, pad Cr -> Crp, repack OIHW -> (9, Crp, Crp)
    # with tap index k = kh*3 + kw matching _make_shifts_and_masks.
    def dil(wkey, bkey, bnp):
        s, t = bn_fold(bnp)
        we = raw[wkey] * s[:, None, None, None]                     # (Cr, Cr, 3, 3)
        we = jnp.pad(we, ((0, Crp - Cr), (0, Crp - Cr), (0, 0), (0, 0)))
        w = jnp.transpose(we, (2, 3, 0, 1)).reshape(9, Crp, Crp)    # (k, O, I)
        b = pad_rows((raw[bkey] * s + t)[:, None], Crp)             # (Crp, 1) f32
        return w.astype(jnp.bfloat16), b
    p["wd1"], p["bd1"] = dil("d0_w", "d0_b", "dbn0")
    p["wd2"], p["bd2"] = dil("d1_w", "d1_b", "dbn1")

    # final 1x1 (no BN), pad input channels
    p["wf"] = jnp.pad(raw["cf_w"][:, :, 0, 0],
                      ((0, 0), (0, Crp - Cr))).astype(jnp.bfloat16)  # (1, Crp)
    p["bf"] = raw["cf_b"][:, None]                                   # (1, 1) f32
    return p


# --------------------------------------------------------------------------
# Pure-JAX reference (eval-mode BN, same math as the torch module intends)
# --------------------------------------------------------------------------
def bam_reference(x, raw, eps=1e-5):
    def bn(z, prefix):
        shape = (1, -1) + (1,) * (z.ndim - 2)
        g = raw[f"{prefix}_g"].reshape(shape)
        b = raw[f"{prefix}_b"].reshape(shape)
        m = raw[f"{prefix}_m"].reshape(shape)
        v = raw[f"{prefix}_v"].reshape(shape)
        return (z - m) / jnp.sqrt(v + eps) * g + b

    # channel attention
    xm = jnp.mean(x, axis=(2, 3))                                   # (B, C)
    z = xm @ raw["fc0_w"].T + raw["fc0_b"]
    z = jax.nn.relu(bn(z, "cbn"))
    cg = (z @ raw["fc1_w"].T + raw["fc1_b"])[:, :, None, None]      # (B, C, 1, 1)

    def conv(z, w, b, dil=1, pad=0):
        y = lax.conv_general_dilated(
            z, w, window_strides=(1, 1),
            padding=[(pad, pad), (pad, pad)],
            rhs_dilation=(dil, dil),
            dimension_numbers=("NCHW", "OIHW", "NCHW"))
        return y + b.reshape(1, -1, 1, 1)

    y = jax.nn.relu(bn(conv(x, raw["cr_w"], raw["cr_b"]), "rbn"))
    y = jax.nn.relu(bn(conv(y, raw["d0_w"], raw["d0_b"], dil=4, pad=4), "dbn0"))
    y = jax.nn.relu(bn(conv(y, raw["d1_w"], raw["d1_b"], dil=4, pad=4), "dbn1"))
    sg = conv(y, raw["cf_w"], raw["cf_b"])                          # (B, 1, H, W)

    att = 1.0 + jax.nn.sigmoid(cg * sg)
    return att * x


# --------------------------------------------------------------------------
if __name__ == "__main__":
    key = jax.random.PRNGKey(0)
    kx, kp = jax.random.split(key)

    # B=4: Bb=2 images per block + a 2-step parallel grid on multi-TC chips,
    # or Bb=4 single-step on single-TC chips.
    B, C, H, W = 4, 32, 16, 16          # reduction_ratio=16 -> Cr=2 (padded to 8)
    x = jax.random.normal(kx, (B, C, H, W), jnp.float32)

    raw = make_raw_params(kp, C, reduction=16)
    params = fold_params(raw)

    out = jax.block_until_ready(jax.jit(bam_pallas)(x, params))

    # bf16 HBM boundary + bf16 spatial-branch matmuls -> relative tolerance
    # (per review), instead of the previous 1e-3 absolute check.
    ref = bam_reference(x, raw)
    err = float(jnp.max(jnp.abs(out.astype(jnp.float32) - ref) / (jnp.abs(ref) + 0.5)))
    if not err < 3e-2:
        raise AssertionError(f"Pallas output mismatch vs reference, rel err = {err}")

    print("KERNEL_OK")
</pallas_src>

<mosaic_0001>
module attributes {stable_mosaic.version = 11 : i64} {
  func.func @_bam_kernel(%arg0: i32, %arg1: memref<2x32x256xbf16, #tpu.memory_space<vmem>>, %arg2: memref<9x256xf32, #tpu.memory_space<vmem>>, %arg3: memref<8x32xf32, #tpu.memory_space<vmem>>, %arg4: memref<8x1xf32, #tpu.memory_space<vmem>>, %arg5: memref<32x8xf32, #tpu.memory_space<vmem>>, %arg6: memref<32x1xf32, #tpu.memory_space<vmem>>, %arg7: memref<8x32xbf16, #tpu.memory_space<vmem>>, %arg8: memref<8x1xf32, #tpu.memory_space<vmem>>, %arg9: memref<9x8x8xbf16, #tpu.memory_space<vmem>>, %arg10: memref<8x1xf32, #tpu.memory_space<vmem>>, %arg11: memref<9x8x8xbf16, #tpu.memory_space<vmem>>, %arg12: memref<8x1xf32, #tpu.memory_space<vmem>>, %arg13: memref<1x8xbf16, #tpu.memory_space<vmem>>, %arg14: memref<1x1xf32, #tpu.memory_space<vmem>>, %arg15: memref<2x32x256xbf16, #tpu.memory_space<vmem>>) attributes {dimension_semantics = [#tpu.dimension_semantics<parallel>], iteration_bounds = array<i64: 2>, scalar_prefetch = 0 : i64, scratch_operands = 0 : i64, tpu.core_type = #tpu.core_type<tc>, window_params = [{transform_indices = @transform_0, window_bounds = array<i64: 2, 32, 256>}, {pipeline_mode = #tpu.pipeline_mode<synchronous>, transform_indices = @transform_1, window_bounds = array<i64: 9, 256>}, {pipeline_mode = #tpu.pipeline_mode<synchronous>, transform_indices = @transform_2, window_bounds = array<i64: 8, 32>}, {pipeline_mode = #tpu.pipeline_mode<synchronous>, transform_indices = @transform_3, window_bounds = array<i64: 8, 1>}, {pipeline_mode = #tpu.pipeline_mode<synchronous>, transform_indices = @transform_4, window_bounds = array<i64: 32, 8>}, {pipeline_mode = #tpu.pipeline_mode<synchronous>, transform_indices = @transform_5, window_bounds = array<i64: 32, 1>}, {pipeline_mode = #tpu.pipeline_mode<synchronous>, transform_indices = @transform_6, window_bounds = array<i64: 8, 32>}, {pipeline_mode = #tpu.pipeline_mode<synchronous>, transform_indices = @transform_7, window_bounds = array<i64: 8, 1>}, {pipeline_mode = #tpu.pipeline_mode<synchronous>, transform_indices = @transform_8, window_bounds = array<i64: 9, 8, 8>}, {pipeline_mode = #tpu.pipeline_mode<synchronous>, transform_indices = @transform_9, window_bounds = array<i64: 8, 1>}, {pipeline_mode = #tpu.pipeline_mode<synchronous>, transform_indices = @transform_10, window_bounds = array<i64: 9, 8, 8>}, {pipeline_mode = #tpu.pipeline_mode<synchronous>, transform_indices = @transform_11, window_bounds = array<i64: 8, 1>}, {pipeline_mode = #tpu.pipeline_mode<synchronous>, transform_indices = @transform_12, window_bounds = array<i64: 1, 8>}, {pipeline_mode = #tpu.pipeline_mode<synchronous>, transform_indices = @transform_13, window_bounds = array<i64: 1, 1>}, {transform_indices = @transform_14, window_bounds = array<i64: 2, 32, 256>}]} {
    %c0 = arith.constant 0 : index
    %c0_0 = arith.constant 0 : index
    %0 = vector.load %arg2[%c0, %c0_0] : memref<9x256xf32, #tpu.memory_space<vmem>>, vector<9x256xf32>
    %c0_1 = arith.constant 0 : index
    %c0_2 = arith.constant 0 : index
    %1 = vector.load %arg3[%c0_1, %c0_2] : memref<8x32xf32, #tpu.memory_space<vmem>>, vector<8x32xf32>
    %c0_3 = arith.constant 0 : index
    %c0_4 = arith.constant 0 : index
    %2 = vector.load %arg4[%c0_3, %c0_4] : memref<8x1xf32, #tpu.memory_space<vmem>>, vector<8x1xf32>
    %c0_5 = arith.constant 0 : index
    %c0_6 = arith.constant 0 : index
    %3 = vector.load %arg5[%c0_5, %c0_6] : memref<32x8xf32, #tpu.memory_space<vmem>>, vector<32x8xf32>
    %c0_7 = arith.constant 0 : index
    %c0_8 = arith.constant 0 : index
    %4 = vector.load %arg6[%c0_7, %c0_8] : memref<32x1xf32, #tpu.memory_space<vmem>>, vector<32x1xf32>
    %c0_9 = arith.constant 0 : index
    %c0_10 = arith.constant 0 : index
    %5 = vector.load %arg7[%c0_9, %c0_10] : memref<8x32xbf16, #tpu.memory_space<vmem>>, vector<8x32xbf16>
    %c0_11 = arith.constant 0 : index
    %c0_12 = arith.constant 0 : index
    %6 = vector.load %arg8[%c0_11, %c0_12] : memref<8x1xf32, #tpu.memory_space<vmem>>, vector<8x1xf32>
    %c0_13 = arith.constant 0 : index
    %c0_14 = arith.constant 0 : index
    %c0_15 = arith.constant 0 : index
    %7 = vector.load %arg9[%c0_13, %c0_14, %c0_15] : memref<9x8x8xbf16, #tpu.memory_space<vmem>>, vector<9x8x8xbf16>
    %c0_16 = arith.constant 0 : index
    %c0_17 = arith.constant 0 : index
    %8 = vector.load %arg10[%c0_16, %c0_17] : memref<8x1xf32, #tpu.memory_space<vmem>>, vector<8x1xf32>
    %c0_18 = arith.constant 0 : index
    %c0_19 = arith.constant 0 : index
    %c0_20 = arith.constant 0 : index
    %9 = vector.load %arg11[%c0_18, %c0_19, %c0_20] : memref<9x8x8xbf16, #tpu.memory_space<vmem>>, vector<9x8x8xbf16>
    %c0_21 = arith.constant 0 : index
    %c0_22 = arith.constant 0 : index
    %10 = vector.load %arg12[%c0_21, %c0_22] : memref<8x1xf32, #tpu.memory_space<vmem>>, vector<8x1xf32>
    %c0_23 = arith.constant 0 : index
    %c0_24 = arith.constant 0 : index
    %11 = vector.load %arg13[%c0_23, %c0_24] : memref<1x8xbf16, #tpu.memory_space<vmem>>, vector<1x8xbf16>
    %c0_25 = arith.constant 0 : index
    %c0_26 = arith.constant 0 : index
    %12 = vector.load %arg14[%c0_25, %c0_26] : memref<1x1xf32, #tpu.memory_space<vmem>>, vector<1x1xf32>
    %c0_27 = arith.constant 0 : index
    %c0_28 = arith.constant 0 : index
    %c0_29 = arith.constant 0 : index
    %13 = vector.load %arg1[%c0_27, %c0_28, %c0_29] : memref<2x32x256xbf16, #tpu.memory_space<vmem>>, vector<1x32x256xbf16>
    %14 = vector.shape_cast %13 : vector<1x32x256xbf16> to vector<32x256xbf16>
    %15 = arith.extf %14 : vector<32x256xbf16> to vector<32x256xf32>
    %cst = arith.constant dense<0.000000e+00> : vector<32xf32>
    %16 = vector.multi_reduction <add>, %15, %cst [1] : vector<32x256xf32> to vector<32xf32>
    %17 = vector.shape_cast %16 : vector<32xf32> to vector<32x1xf32>
    %cst_30 = arith.constant 3.906250e-03 : f32
    %18 = vector.broadcast %cst_30 : f32 to vector<32x1xf32>
    %19 = arith.mulf %17, %18 : vector<32x1xf32>
    %cst_31 = arith.constant dense<0.000000e+00> : vector<8x1xf32>
    %20 = tpu.matmul %1, %19, %cst_31 {dimension_numbers = #tpu.dot_dimension_numbers<[1], [0], [0], [1], [0, 0, 1, 1], [], []>} : vector<8x32xf32>, vector<32x1xf32>, vector<8x1xf32> -> vector<8x1xf32>
    %21 = arith.addf %20, %2 : vector<8x1xf32>
    %cst_32 = arith.constant 0.000000e+00 : f32
    %22 = vector.broadcast %cst_32 : f32 to vector<8x1xf32>
    %23 = arith.maximumf %21, %22 : vector<8x1xf32>
    %cst_33 = arith.constant dense<0.000000e+00> : vector<32x1xf32>
    %24 = tpu.matmul %3, %23, %cst_33 {dimension_numbers = #tpu.dot_dimension_numbers<[1], [0], [0], [1], [0, 0, 1, 1], [], []>} : vector<32x8xf32>, vector<8x1xf32>, vector<32x1xf32> -> vector<32x1xf32>
    %25 = arith.addf %24, %4 : vector<32x1xf32>
    %cst_34 = arith.constant dense<0.000000e+00> : vector<8x256xf32>
    %26 = tpu.matmul %5, %14, %cst_34 {dimension_numbers = #tpu.dot_dimension_numbers<[1], [0], [0], [1], [0, 0, 1, 1], [], []>} : vector<8x32xbf16>, vector<32x256xbf16>, vector<8x256xf32> -> vector<8x256xf32>
    %27 = vector.broadcast %6 : vector<8x1xf32> to vector<8x256xf32>
    %28 = arith.addf %26, %27 : vector<8x256xf32>
    %cst_35 = arith.constant 0.000000e+00 : f32
    %29 = vector.broadcast %cst_35 : f32 to vector<8x256xf32>
    %30 = arith.maximumf %28, %29 : vector<8x256xf32>
    %c68_i32 = arith.constant 68 : i32
    %31 = tpu.dynamic_rotate %30 by %c68_i32 dim 1 : vector<8x256xf32>, i32 -> vector<8x256xf32>
    %32 = vector.extract_strided_slice %0 {offsets = [0, 0], sizes = [1, 256], strides = [1, 1]} : vector<9x256xf32> to vector<1x256xf32>
    %33 = vector.broadcast %32 : vector<1x256xf32> to vector<8x256xf32>
    %34 = arith.mulf %31, %33 : vector<8x256xf32>
    %35 = arith.truncf %34 : vector<8x256xf32> to vector<8x256xbf16>
    %36 = vector.extract_strided_slice %7 {offsets = [0, 0, 0], sizes = [1, 8, 8], strides = [1, 1, 1]} : vector<9x8x8xbf16> to vector<1x8x8xbf16>
    %37 = vector.shape_cast %36 : vector<1x8x8xbf16> to vector<8x8xbf16>
    %cst_36 = arith.constant dense<0.000000e+00> : vector<8x256xf32>
    %38 = tpu.matmul %37, %35, %cst_36 {dimension_numbers = #tpu.dot_dimension_numbers<[1], [0], [0], [1], [0, 0, 1, 1], [], []>} : vector<8x8xbf16>, vector<8x256xbf16>, vector<8x256xf32> -> vector<8x256xf32>
    %39 = vector.broadcast %8 : vector<8x1xf32> to vector<8x256xf32>
    %40 = arith.addf %39, %38 : vector<8x256xf32>
    %c64_i32 = arith.constant 64 : i32
    %41 = tpu.dynamic_rotate %30 by %c64_i32 dim 1 : vector<8x256xf32>, i32 -> vector<8x256xf32>
    %42 = vector.extract_strided_slice %0 {offsets = [1, 0], sizes = [1, 256], strides = [1, 1]} : vector<9x256xf32> to vector<1x256xf32>
    %43 = vector.broadcast %42 : vector<1x256xf32> to vector<8x256xf32>
    %44 = arith.mulf %41, %43 : vector<8x256xf32>
    %45 = arith.truncf %44 : vector<8x256xf32> to vector<8x256xbf16>
    %46 = vector.extract_strided_slice %7 {offsets = [1, 0, 0], sizes = [1, 8, 8], strides = [1, 1, 1]} : vector<9x8x8xbf16> to vector<1x8x8xbf16>
    %47 = vector.shape_cast %46 : vector<1x8x8xbf16> to vector<8x8xbf16>
    %cst_37 = arith.constant dense<0.000000e+00> : vector<8x256xf32>
    %48 = tpu.matmul %47, %45, %cst_37 {dimension_numbers = #tpu.dot_dimension_numbers<[1], [0], [0], [1], [0, 0, 1, 1], [], []>} : vector<8x8xbf16>, vector<8x256xbf16>, vector<8x256xf32> -> vector<8x256xf32>
    %49 = arith.addf %40, %48 : vector<8x256xf32>
    %c60_i32 = arith.constant 60 : i32
    %50 = tpu.dynamic_rotate %30 by %c60_i32 dim 1 : vector<8x256xf32>, i32 -> vector<8x256xf32>
    %51 = vector.extract_strided_slice %0 {offsets = [2, 0], sizes = [1, 256], strides = [1, 1]} : vector<9x256xf32> to vector<1x256xf32>
    %52 = vector.broadcast %51 : vector<1x256xf32> to vector<8x256xf32>
    %53 = arith.mulf %50, %52 : vector<8x256xf32>
    %54 = arith.truncf %53 : vector<8x256xf32> to vector<8x256xbf16>
    %55 = vector.extract_strided_slice %7 {offsets = [2, 0, 0], sizes = [1, 8, 8], strides = [1, 1, 1]} : vector<9x8x8xbf16> to vector<1x8x8xbf16>
    %56 = vector.shape_cast %55 : vector<1x8x8xbf16> to vector<8x8xbf16>
    %cst_38 = arith.constant dense<0.000000e+00> : vector<8x256xf32>
    %57 = tpu.matmul %56, %54, %cst_38 {dimension_numbers = #tpu.dot_dimension_numbers<[1], [0], [0], [1], [0, 0, 1, 1], [], []>} : vector<8x8xbf16>, vector<8x256xbf16>, vector<8x256xf32> -> vector<8x256xf32>
    %58 = arith.addf %49, %57 : vector<8x256xf32>
    %c4_i32 = arith.constant 4 : i32
    %59 = tpu.dynamic_rotate %30 by %c4_i32 dim 1 : vector<8x256xf32>, i32 -> vector<8x256xf32>
    %60 = vector.extract_strided_slice %0 {offsets = [3, 0], sizes = [1, 256], strides = [1, 1]} : vector<9x256xf32> to vector<1x256xf32>
    %61 = vector.broadcast %60 : vector<1x256xf32> to vector<8x256xf32>
    %62 = arith.mulf %59, %61 : vector<8x256xf32>
    %63 = arith.truncf %62 : vector<8x256xf32> to vector<8x256xbf16>
    %64 = vector.extract_strided_slice %7 {offsets = [3, 0, 0], sizes = [1, 8, 8], strides = [1, 1, 1]} : vector<9x8x8xbf16> to vector<1x8x8xbf16>
    %65 = vector.shape_cast %64 : vector<1x8x8xbf16> to vector<8x8xbf16>
    %cst_39 = arith.constant dense<0.000000e+00> : vector<8x256xf32>
    %66 = tpu.matmul %65, %63, %cst_39 {dimension_numbers = #tpu.dot_dimension_numbers<[1], [0], [0], [1], [0, 0, 1, 1], [], []>} : vector<8x8xbf16>, vector<8x256xbf16>, vector<8x256xf32> -> vector<8x256xf32>
    %67 = arith.addf %58, %66 : vector<8x256xf32>
    %68 = vector.extract_strided_slice %0 {offsets = [4, 0], sizes = [1, 256], strides = [1, 1]} : vector<9x256xf32> to vector<1x256xf32>
    %69 = vector.broadcast %68 : vector<1x256xf32> to vector<8x256xf32>
    %70 = arith.mulf %30, %69 : vector<8x256xf32>
    %71 = arith.truncf %70 : vector<8x256xf32> to vector<8x256xbf16>
    %72 = vector.extract_strided_slice %7 {offsets = [4, 0, 0], sizes = [1, 8, 8], strides = [1, 1, 1]} : vector<9x8x8xbf16> to vector<1x8x8xbf16>
    %73 = vector.shape_cast %72 : vector<1x8x8xbf16> to vector<8x8xbf16>
    %cst_40 = arith.constant dense<0.000000e+00> : vector<8x256xf32>
    %74 = tpu.matmul %73, %71, %cst_40 {dimension_numbers = #tpu.dot_dimension_numbers<[1], [0], [0], [1], [0, 0, 1, 1], [], []>} : vector<8x8xbf16>, vector<8x256xbf16>, vector<8x256xf32> -> vector<8x256xf32>
    %75 = arith.addf %67, %74 : vector<8x256xf32>
    %c252_i32 = arith.constant 252 : i32
    %76 = tpu.dynamic_rotate %30 by %c252_i32 dim 1 : vector<8x256xf32>, i32 -> vector<8x256xf32>
    %77 = vector.extract_strided_slice %0 {offsets = [5, 0], sizes = [1, 256], strides = [1, 1]} : vector<9x256xf32> to vector<1x256xf32>
    %78 = vector.broadcast %77 : vector<1x256xf32> to vector<8x256xf32>
    %79 = arith.mulf %76, %78 : vector<8x256xf32>
    %80 = arith.truncf %79 : vector<8x256xf32> to vector<8x256xbf16>
    %81 = vector.extract_strided_slice %7 {offsets = [5, 0, 0], sizes = [1, 8, 8], strides = [1, 1, 1]} : vector<9x8x8xbf16> to vector<1x8x8xbf16>
    %82 = vector.shape_cast %81 : vector<1x8x8xbf16> to vector<8x8xbf16>
    %cst_41 = arith.constant dense<0.000000e+00> : vector<8x256xf32>
    %83 = tpu.matmul %82, %80, %cst_41 {dimension_numbers = #tpu.dot_dimension_numbers<[1], [0], [0], [1], [0, 0, 1, 1], [], []>} : vector<8x8xbf16>, vector<8x256xbf16>, vector<8x256xf32> -> vector<8x256xf32>
    %84 = arith.addf %75, %83 : vector<8x256xf32>
    %c196_i32 = arith.constant 196 : i32
    %85 = tpu.dynamic_rotate %30 by %c196_i32 dim 1 : vector<8x256xf32>, i32 -> vector<8x256xf32>
    %86 = vector.extract_strided_slice %0 {offsets = [6, 0], sizes = [1, 256], strides = [1, 1]} : vector<9x256xf32> to vector<1x256xf32>
    %87 = vector.broadcast %86 : vector<1x256xf32> to vector<8x256xf32>
    %88 = arith.mulf %85, %87 : vector<8x256xf32>
    %89 = arith.truncf %88 : vector<8x256xf32> to vector<8x256xbf16>
    %90 = vector.extract_strided_slice %7 {offsets = [6, 0, 0], sizes = [1, 8, 8], strides = [1, 1, 1]} : vector<9x8x8xbf16> to vector<1x8x8xbf16>
    %91 = vector.shape_cast %90 : vector<1x8x8xbf16> to vector<8x8xbf16>
    %cst_42 = arith.constant dense<0.000000e+00> : vector<8x256xf32>
    %92 = tpu.matmul %91, %89, %cst_42 {dimension_numbers = #tpu.dot_dimension_numbers<[1], [0], [0], [1], [0, 0, 1, 1], [], []>} : vector<8x8xbf16>, vector<8x256xbf16>, vector<8x256xf32> -> vector<8x256xf32>
    %93 = arith.addf %84, %92 : vector<8x256xf32>
    %c192_i32 = arith.constant 192 : i32
    %94 = tpu.dynamic_rotate %30 by %c192_i32 dim 1 : vector<8x256xf32>, i32 -> vector<8x256xf32>
    %95 = vector.extract_strided_slice %0 {offsets = [7, 0], sizes = [1, 256], strides = [1, 1]} : vector<9x256xf32> to vector<1x256xf32>
    %96 = vector.broadcast %95 : vector<1x256xf32> to vector<8x256xf32>
    %97 = arith.mulf %94, %96 : vector<8x256xf32>
    %98 = arith.truncf %97 : vector<8x256xf32> to vector<8x256xbf16>
    %99 = vector.extract_strided_slice %7 {offsets = [7, 0, 0], sizes = [1, 8, 8], strides = [1, 1, 1]} : vector<9x8x8xbf16> to vector<1x8x8xbf16>
    %100 = vector.shape_cast %99 : vector<1x8x8xbf16> to vector<8x8xbf16>
    %cst_43 = arith.constant dense<0.000000e+00> : vector<8x256xf32>
    %101 = tpu.matmul %100, %98, %cst_43 {dimension_numbers = #tpu.dot_dimension_numbers<[1], [0], [0], [1], [0, 0, 1, 1], [], []>} : vector<8x8xbf16>, vector<8x256xbf16>, vector<8x256xf32> -> vector<8x256xf32>
    %102 = arith.addf %93, %101 : vector<8x256xf32>
    %c188_i32 = arith.constant 188 : i32
    %103 = tpu.dynamic_rotate %30 by %c188_i32 dim 1 : vector<8x256xf32>, i32 -> vector<8x256xf32>
    %104 = vector.extract_strided_slice %0 {offsets = [8, 0], sizes = [1, 256], strides = [1, 1]} : vector<9x256xf32> to vector<1x256xf32>
    %105 = vector.broadcast %104 : vector<1x256xf32> to vector<8x256xf32>
    %106 = arith.mulf %103, %105 : vector<8x256xf32>
    %107 = arith.truncf %106 : vector<8x256xf32> to vector<8x256xbf16>
    %108 = vector.extract_strided_slice %7 {offsets = [8, 0, 0], sizes = [1, 8, 8], strides = [1, 1, 1]} : vector<9x8x8xbf16> to vector<1x8x8xbf16>
    %109 = vector.shape_cast %108 : vector<1x8x8xbf16> to vector<8x8xbf16>
    %cst_44 = arith.constant dense<0.000000e+00> : vector<8x256xf32>
    %110 = tpu.matmul %109, %107, %cst_44 {dimension_numbers = #tpu.dot_dimension_numbers<[1], [0], [0], [1], [0, 0, 1, 1], [], []>} : vector<8x8xbf16>, vector<8x256xbf16>, vector<8x256xf32> -> vector<8x256xf32>
    %111 = arith.addf %102, %110 : vector<8x256xf32>
    %cst_45 = arith.constant 0.000000e+00 : f32
    %112 = vector.broadcast %cst_45 : f32 to vector<8x256xf32>
    %113 = arith.maximumf %111, %112 : vector<8x256xf32>
    %c68_i32_46 = arith.constant 68 : i32
    %114 = tpu.dynamic_rotate %113 by %c68_i32_46 dim 1 : vector<8x256xf32>, i32 -> vector<8x256xf32>
    %115 = vector.extract_strided_slice %0 {offsets = [0, 0], sizes = [1, 256], strides = [1, 1]} : vector<9x256xf32> to vector<1x256xf32>
    %116 = vector.broadcast %115 : vector<1x256xf32> to vector<8x256xf32>
    %117 = arith.mulf %114, %116 : vector<8x256xf32>
    %118 = arith.truncf %117 : vector<8x256xf32> to vector<8x256xbf16>
    %119 = vector.extract_strided_slice %9 {offsets = [0, 0, 0], sizes = [1, 8, 8], strides = [1, 1, 1]} : vector<9x8x8xbf16> to vector<1x8x8xbf16>
    %120 = vector.shape_cast %119 : vector<1x8x8xbf16> to vector<8x8xbf16>
    %cst_47 = arith.constant dense<0.000000e+00> : vector<8x256xf32>
    %121 = tpu.matmul %120, %118, %cst_47 {dimension_numbers = #tpu.dot_dimension_numbers<[1], [0], [0], [1], [0, 0, 1, 1], [], []>} : vector<8x8xbf16>, vector<8x256xbf16>, vector<8x256xf32> -> vector<8x256xf32>
    %122 = vector.broadcast %10 : vector<8x1xf32> to vector<8x256xf32>
    %123 = arith.addf %122, %121 : vector<8x256xf32>
    %c64_i32_48 = arith.constant 64 : i32
    %124 = tpu.dynamic_rotate %113 by %c64_i32_48 dim 1 : vector<8x256xf32>, i32 -> vector<8x256xf32>
    %125 = vector.extract_strided_slice %0 {offsets = [1, 0], sizes = [1, 256], strides = [1, 1]} : vector<9x256xf32> to vector<1x256xf32>
    %126 = vector.broadcast %125 : vector<1x256xf32> to vector<8x256xf32>
    %127 = arith.mulf %124, %126 : vector<8x256xf32>
    %128 = arith.truncf %127 : vector<8x256xf32> to vector<8x256xbf16>
    %129 = vector.extract_strided_slice %9 {offsets = [1, 0, 0], sizes = [1, 8, 8], strides = [1, 1, 1]} : vector<9x8x8xbf16> to vector<1x8x8xbf16>
    %130 = vector.shape_cast %129 : vector<1x8x8xbf16> to vector<8x8xbf16>
    %cst_49 = arith.constant dense<0.000000e+00> : vector<8x256xf32>
    %131 = tpu.matmul %130, %128, %cst_49 {dimension_numbers = #tpu.dot_dimension_numbers<[1], [0], [0], [1], [0, 0, 1, 1], [], []>} : vector<8x8xbf16>, vector<8x256xbf16>, vector<8x256xf32> -> vector<8x256xf32>
    %132 = arith.addf %123, %131 : vector<8x256xf32>
    %c60_i32_50 = arith.constant 60 : i32
    %133 = tpu.dynamic_rotate %113 by %c60_i32_50 dim 1 : vector<8x256xf32>, i32 -> vector<8x256xf32>
    %134 = vector.extract_strided_slice %0 {offsets = [2, 0], sizes = [1, 256], strides = [1, 1]} : vector<9x256xf32> to vector<1x256xf32>
    %135 = vector.broadcast %134 : vector<1x256xf32> to vector<8x256xf32>
    %136 = arith.mulf %133, %135 : vector<8x256xf32>
    %137 = arith.truncf %136 : vector<8x256xf32> to vector<8x256xbf16>
    %138 = vector.extract_strided_slice %9 {offsets = [2, 0, 0], sizes = [1, 8, 8], strides = [1, 1, 1]} : vector<9x8x8xbf16> to vector<1x8x8xbf16>
    %139 = vector.shape_cast %138 : vector<1x8x8xbf16> to vector<8x8xbf16>
    %cst_51 = arith.constant dense<0.000000e+00> : vector<8x256xf32>
    %140 = tpu.matmul %139, %137, %cst_51 {dimension_numbers = #tpu.dot_dimension_numbers<[1], [0], [0], [1], [0, 0, 1, 1], [], []>} : vector<8x8xbf16>, vector<8x256xbf16>, vector<8x256xf32> -> vector<8x256xf32>
    %141 = arith.addf %132, %140 : vector<8x256xf32>
    %c4_i32_52 = arith.constant 4 : i32
    %142 = tpu.dynamic_rotate %113 by %c4_i32_52 dim 1 : vector<8x256xf32>, i32 -> vector<8x256xf32>
    %143 = vector.extract_strided_slice %0 {offsets = [3, 0], sizes = [1, 256], strides = [1, 1]} : vector<9x256xf32> to vector<1x256xf32>
    %144 = vector.broadcast %143 : vector<1x256xf32> to vector<8x256xf32>
    %145 = arith.mulf %142, %144 : vector<8x256xf32>
    %146 = arith.truncf %145 : vector<8x256xf32> to vector<8x256xbf16>
    %147 = vector.extract_strided_slice %9 {offsets = [3, 0, 0], sizes = [1, 8, 8], strides = [1, 1, 1]} : vector<9x8x8xbf16> to vector<1x8x8xbf16>
    %148 = vector.shape_cast %147 : vector<1x8x8xbf16> to vector<8x8xbf16>
    %cst_53 = arith.constant dense<0.000000e+00> : vector<8x256xf32>
    %149 = tpu.matmul %148, %146, %cst_53 {dimension_numbers = #tpu.dot_dimension_numbers<[1], [0], [0], [1], [0, 0, 1, 1], [], []>} : vector<8x8xbf16>, vector<8x256xbf16>, vector<8x256xf32> -> vector<8x256xf32>
    %150 = arith.addf %141, %149 : vector<8x256xf32>
    %151 = vector.extract_strided_slice %0 {offsets = [4, 0], sizes = [1, 256], strides = [1, 1]} : vector<9x256xf32> to vector<1x256xf32>
    %152 = vector.broadcast %151 : vector<1x256xf32> to vector<8x256xf32>
    %153 = arith.mulf %113, %152 : vector<8x256xf32>
    %154 = arith.truncf %153 : vector<8x256xf32> to vector<8x256xbf16>
    %155 = vector.extract_strided_slice %9 {offsets = [4, 0, 0], sizes = [1, 8, 8], strides = [1, 1, 1]} : vector<9x8x8xbf16> to vector<1x8x8xbf16>
    %156 = vector.shape_cast %155 : vector<1x8x8xbf16> to vector<8x8xbf16>
    %cst_54 = arith.constant dense<0.000000e+00> : vector<8x256xf32>
    %157 = tpu.matmul %156, %154, %cst_54 {dimension_numbers = #tpu.dot_dimension_numbers<[1], [0], [0], [1], [0, 0, 1, 1], [], []>} : vector<8x8xbf16>, vector<8x256xbf16>, vector<8x256xf32> -> vector<8x256xf32>
    %158 = arith.addf %150, %157 : vector<8x256xf32>
    %c252_i32_55 = arith.constant 252 : i32
    %159 = tpu.dynamic_rotate %113 by %c252_i32_55 dim 1 : vector<8x256xf32>, i32 -> vector<8x256xf32>
    %160 = vector.extract_strided_slice %0 {offsets = [5, 0], sizes = [1, 256], strides = [1, 1]} : vector<9x256xf32> to vector<1x256xf32>
    %161 = vector.broadcast %160 : vector<1x256xf32> to vector<8x256xf32>
    %162 = arith.mulf %159, %161 : vector<8x256xf32>
    %163 = arith.truncf %162 : vector<8x256xf32> to vector<8x256xbf16>
    %164 = vector.extract_strided_slice %9 {offsets = [5, 0, 0], sizes = [1, 8, 8], strides = [1, 1, 1]} : vector<9x8x8xbf16> to vector<1x8x8xbf16>
    %165 = vector.shape_cast %164 : vector<1x8x8xbf16> to vector<8x8xbf16>
    %cst_56 = arith.constant dense<0.000000e+00> : vector<8x256xf32>
    %166 = tpu.matmul %165, %163, %cst_56 {dimension_numbers = #tpu.dot_dimension_numbers<[1], [0], [0], [1], [0, 0, 1, 1], [], []>} : vector<8x8xbf16>, vector<8x256xbf16>, vector<8x256xf32> -> vector<8x256xf32>
    %167 = arith.addf %158, %166 : vector<8x256xf32>
    %c196_i32_57 = arith.constant 196 : i32
    %168 = tpu.dynamic_rotate %113 by %c196_i32_57 dim 1 : vector<8x256xf32>, i32 -> vector<8x256xf32>
    %169 = vector.extract_strided_slice %0 {offsets = [6, 0], sizes = [1, 256], strides = [1, 1]} : vector<9x256xf32> to vector<1x256xf32>
    %170 = vector.broadcast %169 : vector<1x256xf32> to vector<8x256xf32>
    %171 = arith.mulf %168, %170 : vector<8x256xf32>
    %172 = arith.truncf %171 : vector<8x256xf32> to vector<8x256xbf16>
    %173 = vector.extract_strided_slice %9 {offsets = [6, 0, 0], sizes = [1, 8, 8], strides = [1, 1, 1]} : vector<9x8x8xbf16> to vector<1x8x8xbf16>
    %174 = vector.shape_cast %173 : vector<1x8x8xbf16> to vector<8x8xbf16>
    %cst_58 = arith.constant dense<0.000000e+00> : vector<8x256xf32>
    %175 = tpu.matmul %174, %172, %cst_58 {dimension_numbers = #tpu.dot_dimension_numbers<[1], [0], [0], [1], [0, 0, 1, 1], [], []>} : vector<8x8xbf16>, vector<8x256xbf16>, vector<8x256xf32> -> vector<8x256xf32>
    %176 = arith.addf %167, %175 : vector<8x256xf32>
    %c192_i32_59 = arith.constant 192 : i32
    %177 = tpu.dynamic_rotate %113 by %c192_i32_59 dim 1 : vector<8x256xf32>, i32 -> vector<8x256xf32>
    %178 = vector.extract_strided_slice %0 {offsets = [7, 0], sizes = [1, 256], strides = [1, 1]} : vector<9x256xf32> to vector<1x256xf32>
    %179 = vector.broadcast %178 : vector<1x256xf32> to vector<8x256xf32>
    %180 = arith.mulf %177, %179 : vector<8x256xf32>
    %181 = arith.truncf %180 : vector<8x256xf32> to vector<8x256xbf16>
    %182 = vector.extract_strided_slice %9 {offsets = [7, 0, 0], sizes = [1, 8, 8], strides = [1, 1, 1]} : vector<9x8x8xbf16> to vector<1x8x8xbf16>
    %183 = vector.shape_cast %182 : vector<1x8x8xbf16> to vector<8x8xbf16>
    %cst_60 = arith.constant dense<0.000000e+00> : vector<8x256xf32>
    %184 = tpu.matmul %183, %181, %cst_60 {dimension_numbers = #tpu.dot_dimension_numbers<[1], [0], [0], [1], [0, 0, 1, 1], [], []>} : vector<8x8xbf16>, vector<8x256xbf16>, vector<8x256xf32> -> vector<8x256xf32>
    %185 = arith.addf %176, %184 : vector<8x256xf32>
    %c188_i32_61 = arith.constant 188 : i32
    %186 = tpu.dynamic_rotate %113 by %c188_i32_61 dim 1 : vector<8x256xf32>, i32 -> vector<8x256xf32>
    %187 = vector.extract_strided_slice %0 {offsets = [8, 0], sizes = [1, 256], strides = [1, 1]} : vector<9x256xf32> to vector<1x256xf32>
    %188 = vector.broadcast %187 : vector<1x256xf32> to vector<8x256xf32>
    %189 = arith.mulf %186, %188 : vector<8x256xf32>
    %190 = arith.truncf %189 : vector<8x256xf32> to vector<8x256xbf16>
    %191 = vector.extract_strided_slice %9 {offsets = [8, 0, 0], sizes = [1, 8, 8], strides = [1, 1, 1]} : vector<9x8x8xbf16> to vector<1x8x8xbf16>
    %192 = vector.shape_cast %191 : vector<1x8x8xbf16> to vector<8x8xbf16>
    %cst_62 = arith.constant dense<0.000000e+00> : vector<8x256xf32>
    %193 = tpu.matmul %192, %190, %cst_62 {dimension_numbers = #tpu.dot_dimension_numbers<[1], [0], [0], [1], [0, 0, 1, 1], [], []>} : vector<8x8xbf16>, vector<8x256xbf16>, vector<8x256xf32> -> vector<8x256xf32>
    %194 = arith.addf %185, %193 : vector<8x256xf32>
    %cst_63 = arith.constant 0.000000e+00 : f32
    %195 = vector.broadcast %cst_63 : f32 to vector<8x256xf32>
    %196 = arith.maximumf %194, %195 : vector<8x256xf32>
    %197 = arith.truncf %196 : vector<8x256xf32> to vector<8x256xbf16>
    %cst_64 = arith.constant dense<0.000000e+00> : vector<1x256xf32>
    %198 = tpu.matmul %11, %197, %cst_64 {dimension_numbers = #tpu.dot_dimension_numbers<[1], [0], [0], [1], [0, 0, 1, 1], [], []>} : vector<1x8xbf16>, vector<8x256xbf16>, vector<1x256xf32> -> vector<1x256xf32>
    %199 = vector.broadcast %12 : vector<1x1xf32> to vector<1x256xf32>
    %200 = arith.addf %198, %199 : vector<1x256xf32>
    %201 = vector.broadcast %25 : vector<32x1xf32> to vector<32x256xf32>
    %202 = vector.broadcast %200 : vector<1x256xf32> to vector<32x256xf32>
    %203 = arith.mulf %201, %202 : vector<32x256xf32>
    %204 = arith.negf %203 : vector<32x256xf32>
    %205 = math.exp %204 : vector<32x256xf32>
    %cst_65 = arith.constant 1.000000e+00 : f32
    %206 = vector.broadcast %cst_65 : f32 to vector<32x256xf32>
    %207 = arith.addf %206, %205 : vector<32x256xf32>
    %208 = arith.divf %206, %207 : vector<32x256xf32>
    %cst_66 = arith.constant 1.000000e+00 : f32
    %209 = vector.broadcast %cst_66 : f32 to vector<32x256xf32>
    %210 = arith.addf %209, %208 : vector<32x256xf32>
    %c0_67 = arith.constant 0 : index
    %c0_68 = arith.constant 0 : index
    %c0_69 = arith.constant 0 : index
    %211 = vector.load %arg1[%c0_67, %c0_68, %c0_69] : memref<2x32x256xbf16, #tpu.memory_space<vmem>>, vector<1x32x256xbf16>
    %212 = vector.shape_cast %211 : vector<1x32x256xbf16> to vector<32x256xbf16>
    %213 = arith.extf %212 : vector<32x256xbf16> to vector<32x256xf32>
    %214 = arith.mulf %210, %213 : vector<32x256xf32>
    %215 = arith.truncf %214 : vector<32x256xf32> to vector<32x256xbf16>
    %c0_70 = arith.constant 0 : index
    %c0_71 = arith.constant 0 : index
    %c0_72 = arith.constant 0 : index
    %216 = vector.load %arg15[%c0_70, %c0_71, %c0_72] : memref<2x32x256xbf16, #tpu.memory_space<vmem>>, vector<1x32x256xbf16>
    %217 = vector.shape_cast %216 : vector<1x32x256xbf16> to vector<32x256xbf16>
    %218 = vector.shape_cast %215 : vector<32x256xbf16> to vector<1x32x256xbf16>
    tpu.vector_store %arg15[%c0_70, %c0_71, %c0_72], %218 {strides = array<i32>} : memref<2x32x256xbf16, #tpu.memory_space<vmem>>, vector<1x32x256xbf16>,
    %c1 = arith.constant 1 : index
    %c0_73 = arith.constant 0 : index
    %c0_74 = arith.constant 0 : index
    %219 = vector.load %arg1[%c1, %c0_73, %c0_74] : memref<2x32x256xbf16, #tpu.memory_space<vmem>>, vector<1x32x256xbf16>
    %220 = vector.shape_cast %219 : vector<1x32x256xbf16> to vector<32x256xbf16>
    %221 = arith.extf %220 : vector<32x256xbf16> to vector<32x256xf32>
    %cst_75 = arith.constant dense<0.000000e+00> : vector<32xf32>
    %222 = vector.multi_reduction <add>, %221, %cst_75 [1] : vector<32x256xf32> to vector<32xf32>
    %223 = vector.shape_cast %222 : vector<32xf32> to vector<32x1xf32>
    %cst_76 = arith.constant 3.906250e-03 : f32
    %224 = vector.broadcast %cst_76 : f32 to vector<32x1xf32>
    %225 = arith.mulf %223, %224 : vector<32x1xf32>
    %cst_77 = arith.constant dense<0.000000e+00> : vector<8x1xf32>
    %226 = tpu.matmul %1, %225, %cst_77 {dimension_numbers = #tpu.dot_dimension_numbers<[1], [0], [0], [1], [0, 0, 1, 1], [], []>} : vector<8x32xf32>, vector<32x1xf32>, vector<8x1xf32> -> vector<8x1xf32>
    %227 = arith.addf %226, %2 : vector<8x1xf32>
    %cst_78 = arith.constant 0.000000e+00 : f32
    %228 = vector.broadcast %cst_78 : f32 to vector<8x1xf32>
    %229 = arith.maximumf %227, %228 : vector<8x1xf32>
    %cst_79 = arith.constant dense<0.000000e+00> : vector<32x1xf32>
    %230 = tpu.matmul %3, %229, %cst_79 {dimension_numbers = #tpu.dot_dimension_numbers<[1], [0], [0], [1], [0, 0, 1, 1], [], []>} : vector<32x8xf32>, vector<8x1xf32>, vector<32x1xf32> -> vector<32x1xf32>
    %231 = arith.addf %230, %4 : vector<32x1xf32>
    %cst_80 = arith.constant dense<0.000000e+00> : vector<8x256xf32>
    %232 = tpu.matmul %5, %220, %cst_80 {dimension_numbers = #tpu.dot_dimension_numbers<[1], [0], [0], [1], [0, 0, 1, 1], [], []>} : vector<8x32xbf16>, vector<32x256xbf16>, vector<8x256xf32> -> vector<8x256xf32>
    %233 = vector.broadcast %6 : vector<8x1xf32> to vector<8x256xf32>
    %234 = arith.addf %232, %233 : vector<8x256xf32>
    %cst_81 = arith.constant 0.000000e+00 : f32
    %235 = vector.broadcast %cst_81 : f32 to vector<8x256xf32>
    %236 = arith.maximumf %234, %235 : vector<8x256xf32>
    %c68_i32_82 = arith.constant 68 : i32
    %237 = tpu.dynamic_rotate %236 by %c68_i32_82 dim 1 : vector<8x256xf32>, i32 -> vector<8x256xf32>
    %238 = vector.extract_strided_slice %0 {offsets = [0, 0], sizes = [1, 256], strides = [1, 1]} : vector<9x256xf32> to vector<1x256xf32>
    %239 = vector.broadcast %238 : vector<1x256xf32> to vector<8x256xf32>
    %240 = arith.mulf %237, %239 : vector<8x256xf32>
    %241 = arith.truncf %240 : vector<8x256xf32> to vector<8x256xbf16>
    %242 = vector.extract_strided_slice %7 {offsets = [0, 0, 0], sizes = [1, 8, 8], strides = [1, 1, 1]} : vector<9x8x8xbf16> to vector<1x8x8xbf16>
    %243 = vector.shape_cast %242 : vector<1x8x8xbf16> to vector<8x8xbf16>
    %cst_83 = arith.constant dense<0.000000e+00> : vector<8x256xf32>
    %244 = tpu.matmul %243, %241, %cst_83 {dimension_numbers = #tpu.dot_dimension_numbers<[1], [0], [0], [1], [0, 0, 1, 1], [], []>} : vector<8x8xbf16>, vector<8x256xbf16>, vector<8x256xf32> -> vector<8x256xf32>
    %245 = vector.broadcast %8 : vector<8x1xf32> to vector<8x256xf32>
    %246 = arith.addf %245, %244 : vector<8x256xf32>
    %c64_i32_84 = arith.constant 64 : i32
    %247 = tpu.dynamic_rotate %236 by %c64_i32_84 dim 1 : vector<8x256xf32>, i32 -> vector<8x256xf32>
    %248 = vector.extract_strided_slice %0 {offsets = [1, 0], sizes = [1, 256], strides = [1, 1]} : vector<9x256xf32> to vector<1x256xf32>
    %249 = vector.broadcast %248 : vector<1x256xf32> to vector<8x256xf32>
    %250 = arith.mulf %247, %249 : vector<8x256xf32>
    %251 = arith.truncf %250 : vector<8x256xf32> to vector<8x256xbf16>
    %252 = vector.extract_strided_slice %7 {offsets = [1, 0, 0], sizes = [1, 8, 8], strides = [1, 1, 1]} : vector<9x8x8xbf16> to vector<1x8x8xbf16>
    %253 = vector.shape_cast %252 : vector<1x8x8xbf16> to vector<8x8xbf16>
    %cst_85 = arith.constant dense<0.000000e+00> : vector<8x256xf32>
    %254 = tpu.matmul %253, %251, %cst_85 {dimension_numbers = #tpu.dot_dimension_numbers<[1], [0], [0], [1], [0, 0, 1, 1], [], []>} : vector<8x8xbf16>, vector<8x256xbf16>, vector<8x256xf32> -> vector<8x256xf32>
    %255 = arith.addf %246, %254 : vector<8x256xf32>
    %c60_i32_86 = arith.constant 60 : i32
    %256 = tpu.dynamic_rotate %236 by %c60_i32_86 dim 1 : vector<8x256xf32>, i32 -> vector<8x256xf32>
    %257 = vector.extract_strided_slice %0 {offsets = [2, 0], sizes = [1, 256], strides = [1, 1]} : vector<9x256xf32> to vector<1x256xf32>
    %258 = vector.broadcast %257 : vector<1x256xf32> to vector<8x256xf32>
    %259 = arith.mulf %256, %258 : vector<8x256xf32>
    %260 = arith.truncf %259 : vector<8x256xf32> to vector<8x256xbf16>
    %261 = vector.extract_strided_slice %7 {offsets = [2, 0, 0], sizes = [1, 8, 8], strides = [1, 1, 1]} : vector<9x8x8xbf16> to vector<1x8x8xbf16>
    %262 = vector.shape_cast %261 : vector<1x8x8xbf16> to vector<8x8xbf16>
    %cst_87 = arith.constant dense<0.000000e+00> : vector<8x256xf32>
    %263 = tpu.matmul %262, %260, %cst_87 {dimension_numbers = #tpu.dot_dimension_numbers<[1], [0], [0], [1], [0, 0, 1, 1], [], []>} : vector<8x8xbf16>, vector<8x256xbf16>, vector<8x256xf32> -> vector<8x256xf32>
    %264 = arith.addf %255, %263 : vector<8x256xf32>
    %c4_i32_88 = arith.constant 4 : i32
    %265 = tpu.dynamic_rotate %236 by %c4_i32_88 dim 1 : vector<8x256xf32>, i32 -> vector<8x256xf32>
    %266 = vector.extract_strided_slice %0 {offsets = [3, 0], sizes = [1, 256], strides = [1, 1]} : vector<9x256xf32> to vector<1x256xf32>
    %267 = vector.broadcast %266 : vector<1x256xf32> to vector<8x256xf32>
    %268 = arith.mulf %265, %267 : vector<8x256xf32>
    %269 = arith.truncf %268 : vector<8x256xf32> to vector<8x256xbf16>
    %270 = vector.extract_strided_slice %7 {offsets = [3, 0, 0], sizes = [1, 8, 8], strides = [1, 1, 1]} : vector<9x8x8xbf16> to vector<1x8x8xbf16>
    %271 = vector.shape_cast %270 : vector<1x8x8xbf16> to vector<8x8xbf16>
    %cst_89 = arith.constant dense<0.000000e+00> : vector<8x256xf32>
    %272 = tpu.matmul %271, %269, %cst_89 {dimension_numbers = #tpu.dot_dimension_numbers<[1], [0], [0], [1], [0, 0, 1, 1], [], []>} : vector<8x8xbf16>, vector<8x256xbf16>, vector<8x256xf32> -> vector<8x256xf32>
    %273 = arith.addf %264, %272 : vector<8x256xf32>
    %274 = vector.extract_strided_slice %0 {offsets = [4, 0], sizes = [1, 256], strides = [1, 1]} : vector<9x256xf32> to vector<1x256xf32>
    %275 = vector.broadcast %274 : vector<1x256xf32> to vector<8x256xf32>
    %276 = arith.mulf %236, %275 : vector<8x256xf32>
    %277 = arith.truncf %276 : vector<8x256xf32> to vector<8x256xbf16>
    %278 = vector.extract_strided_slice %7 {offsets = [4, 0, 0], sizes = [1, 8, 8], strides = [1, 1, 1]} : vector<9x8x8xbf16> to vector<1x8x8xbf16>
    %279 = vector.shape_cast %278 : vector<1x8x8xbf16> to vector<8x8xbf16>
    %cst_90 = arith.constant dense<0.000000e+00> : vector<8x256xf32>
    %280 = tpu.matmul %279, %277, %cst_90 {dimension_numbers = #tpu.dot_dimension_numbers<[1], [0], [0], [1], [0, 0, 1, 1], [], []>} : vector<8x8xbf16>, vector<8x256xbf16>, vector<8x256xf32> -> vector<8x256xf32>
    %281 = arith.addf %273, %280 : vector<8x256xf32>
    %c252_i32_91 = arith.constant 252 : i32
    %282 = tpu.dynamic_rotate %236 by %c252_i32_91 dim 1 : vector<8x256xf32>, i32 -> vector<8x256xf32>
    %283 = vector.extract_strided_slice %0 {offsets = [5, 0], sizes = [1, 256], strides = [1, 1]} : vector<9x256xf32> to vector<1x256xf32>
    %284 = vector.broadcast %283 : vector<1x256xf32> to vector<8x256xf32>
    %285 = arith.mulf %282, %284 : vector<8x256xf32>
    %286 = arith.truncf %285 : vector<8x256xf32> to vector<8x256xbf16>
    %287 = vector.extract_strided_slice %7 {offsets = [5, 0, 0], sizes = [1, 8, 8], strides = [1, 1, 1]} : vector<9x8x8xbf16> to vector<1x8x8xbf16>
    %288 = vector.shape_cast %287 : vector<1x8x8xbf16> to vector<8x8xbf16>
    %cst_92 = arith.constant dense<0.000000e+00> : vector<8x256xf32>
    %289 = tpu.matmul %288, %286, %cst_92 {dimension_numbers = #tpu.dot_dimension_numbers<[1], [0], [0], [1], [0, 0, 1, 1], [], []>} : vector<8x8xbf16>, vector<8x256xbf16>, vector<8x256xf32> -> vector<8x256xf32>
    %290 = arith.addf %281, %289 : vector<8x256xf32>
    %c196_i32_93 = arith.constant 196 : i32
    %291 = tpu.dynamic_rotate %236 by %c196_i32_93 dim 1 : vector<8x256xf32>, i32 -> vector<8x256xf32>
    %292 = vector.extract_strided_slice %0 {offsets = [6, 0], sizes = [1, 256], strides = [1, 1]} : vector<9x256xf32> to vector<1x256xf32>
    %293 = vector.broadcast %292 : vector<1x256xf32> to vector<8x256xf32>
    %294 = arith.mulf %291, %293 : vector<8x256xf32>
    %295 = arith.truncf %294 : vector<8x256xf32> to vector<8x256xbf16>
    %296 = vector.extract_strided_slice %7 {offsets = [6, 0, 0], sizes = [1, 8, 8], strides = [1, 1, 1]} : vector<9x8x8xbf16> to vector<1x8x8xbf16>
    %297 = vector.shape_cast %296 : vector<1x8x8xbf16> to vector<8x8xbf16>
    %cst_94 = arith.constant dense<0.000000e+00> : vector<8x256xf32>
    %298 = tpu.matmul %297, %295, %cst_94 {dimension_numbers = #tpu.dot_dimension_numbers<[1], [0], [0], [1], [0, 0, 1, 1], [], []>} : vector<8x8xbf16>, vector<8x256xbf16>, vector<8x256xf32> -> vector<8x256xf32>
    %299 = arith.addf %290, %298 : vector<8x256xf32>
    %c192_i32_95 = arith.constant 192 : i32
    %300 = tpu.dynamic_rotate %236 by %c192_i32_95 dim 1 : vector<8x256xf32>, i32 -> vector<8x256xf32>
    %301 = vector.extract_strided_slice %0 {offsets = [7, 0], sizes = [1, 256], strides = [1, 1]} : vector<9x256xf32> to vector<1x256xf32>
    %302 = vector.broadcast %301 : vector<1x256xf32> to vector<8x256xf32>
    %303 = arith.mulf %300, %302 : vector<8x256xf32>
    %304 = arith.truncf %303 : vector<8x256xf32> to vector<8x256xbf16>
    %305 = vector.extract_strided_slice %7 {offsets = [7, 0, 0], sizes = [1, 8, 8], strides = [1, 1, 1]} : vector<9x8x8xbf16> to vector<1x8x8xbf16>
    %306 = vector.shape_cast %305 : vector<1x8x8xbf16> to vector<8x8xbf16>
    %cst_96 = arith.constant dense<0.000000e+00> : vector<8x256xf32>
    %307 = tpu.matmul %306, %304, %cst_96 {dimension_numbers = #tpu.dot_dimension_numbers<[1], [0], [0], [1], [0, 0, 1, 1], [], []>} : vector<8x8xbf16>, vector<8x256xbf16>, vector<8x256xf32> -> vector<8x256xf32>
    %308 = arith.addf %299, %307 : vector<8x256xf32>
    %c188_i32_97 = arith.constant 188 : i32
    %309 = tpu.dynamic_rotate %236 by %c188_i32_97 dim 1 : vector<8x256xf32>, i32 -> vector<8x256xf32>
    %310 = vector.extract_strided_slice %0 {offsets = [8, 0], sizes = [1, 256], strides = [1, 1]} : vector<9x256xf32> to vector<1x256xf32>
    %311 = vector.broadcast %310 : vector<1x256xf32> to vector<8x256xf32>
    %312 = arith.mulf %309, %311 : vector<8x256xf32>
    %313 = arith.truncf %312 : vector<8x256xf32> to vector<8x256xbf16>
    %314 = vector.extract_strided_slice %7 {offsets = [8, 0, 0], sizes = [1, 8, 8], strides = [1, 1, 1]} : vector<9x8x8xbf16> to vector<1x8x8xbf16>
    %315 = vector.shape_cast %314 : vector<1x8x8xbf16> to vector<8x8xbf16>
    %cst_98 = arith.constant dense<0.000000e+00> : vector<8x256xf32>
    %316 = tpu.matmul %315, %313, %cst_98 {dimension_numbers = #tpu.dot_dimension_numbers<[1], [0], [0], [1], [0, 0, 1, 1], [], []>} : vector<8x8xbf16>, vector<8x256xbf16>, vector<8x256xf32> -> vector<8x256xf32>
    %317 = arith.addf %308, %316 : vector<8x256xf32>
    %cst_99 = arith.constant 0.000000e+00 : f32
    %318 = vector.broadcast %cst_99 : f32 to vector<8x256xf32>
    %319 = arith.maximumf %317, %318 : vector<8x256xf32>
    %c68_i32_100 = arith.constant 68 : i32
    %320 = tpu.dynamic_rotate %319 by %c68_i32_100 dim 1 : vector<8x256xf32>, i32 -> vector<8x256xf32>
    %321 = vector.extract_strided_slice %0 {offsets = [0, 0], sizes = [1, 256], strides = [1, 1]} : vector<9x256xf32> to vector<1x256xf32>
    %322 = vector.broadcast %321 : vector<1x256xf32> to vector<8x256xf32>
    %323 = arith.mulf %320, %322 : vector<8x256xf32>
    %324 = arith.truncf %323 : vector<8x256xf32> to vector<8x256xbf16>
    %325 = vector.extract_strided_slice %9 {offsets = [0, 0, 0], sizes = [1, 8, 8], strides = [1, 1, 1]} : vector<9x8x8xbf16> to vector<1x8x8xbf16>
    %326 = vector.shape_cast %325 : vector<1x8x8xbf16> to vector<8x8xbf16>
    %cst_101 = arith.constant dense<0.000000e+00> : vector<8x256xf32>
    %327 = tpu.matmul %326, %324, %cst_101 {dimension_numbers = #tpu.dot_dimension_numbers<[1], [0], [0], [1], [0, 0, 1, 1], [], []>} : vector<8x8xbf16>, vector<8x256xbf16>, vector<8x256xf32> -> vector<8x256xf32>
    %328 = vector.broadcast %10 : vector<8x1xf32> to vector<8x256xf32>
    %329 = arith.addf %328, %327 : vector<8x256xf32>
    %c64_i32_102 = arith.constant 64 : i32
    %330 = tpu.dynamic_rotate %319 by %c64_i32_102 dim 1 : vector<8x256xf32>, i32 -> vector<8x256xf32>
    %331 = vector.extract_strided_slice %0 {offsets = [1, 0], sizes = [1, 256], strides = [1, 1]} : vector<9x256xf32> to vector<1x256xf32>
    %332 = vector.broadcast %331 : vector<1x256xf32> to vector<8x256xf32>
    %333 = arith.mulf %330, %332 : vector<8x256xf32>
    %334 = arith.truncf %333 : vector<8x256xf32> to vector<8x256xbf16>
    %335 = vector.extract_strided_slice %9 {offsets = [1, 0, 0], sizes = [1, 8, 8], strides = [1, 1, 1]} : vector<9x8x8xbf16> to vector<1x8x8xbf16>
    %336 = vector.shape_cast %335 : vector<1x8x8xbf16> to vector<8x8xbf16>
    %cst_103 = arith.constant dense<0.000000e+00> : vector<8x256xf32>
    %337 = tpu.matmul %336, %334, %cst_103 {dimension_numbers = #tpu.dot_dimension_numbers<[1], [0], [0], [1], [0, 0, 1, 1], [], []>} : vector<8x8xbf16>, vector<8x256xbf16>, vector<8x256xf32> -> vector<8x256xf32>
    %338 = arith.addf %329, %337 : vector<8x256xf32>
    %c60_i32_104 = arith.constant 60 : i32
    %339 = tpu.dynamic_rotate %319 by %c60_i32_104 dim 1 : vector<8x256xf32>, i32 -> vector<8x256xf32>
    %340 = vector.extract_strided_slice %0 {offsets = [2, 0], sizes = [1, 256], strides = [1, 1]} : vector<9x256xf32> to vector<1x256xf32>
    %341 = vector.broadcast %340 : vector<1x256xf32> to vector<8x256xf32>
    %342 = arith.mulf %339, %341 : vector<8x256xf32>
    %343 = arith.truncf %342 : vector<8x256xf32> to vector<8x256xbf16>
    %344 = vector.extract_strided_slice %9 {offsets = [2, 0, 0], sizes = [1, 8, 8], strides = [1, 1, 1]} : vector<9x8x8xbf16> to vector<1x8x8xbf16>
    %345 = vector.shape_cast %344 : vector<1x8x8xbf16> to vector<8x8xbf16>
    %cst_105 = arith.constant dense<0.000000e+00> : vector<8x256xf32>
    %346 = tpu.matmul %345, %343, %cst_105 {dimension_numbers = #tpu.dot_dimension_numbers<[1], [0], [0], [1], [0, 0, 1, 1], [], []>} : vector<8x8xbf16>, vector<8x256xbf16>, vector<8x256xf32> -> vector<8x256xf32>
    %347 = arith.addf %338, %346 : vector<8x256xf32>
    %c4_i32_106 = arith.constant 4 : i32
    %348 = tpu.dynamic_rotate %319 by %c4_i32_106 dim 1 : vector<8x256xf32>, i32 -> vector<8x256xf32>
    %349 = vector.extract_strided_slice %0 {offsets = [3, 0], sizes = [1, 256], strides = [1, 1]} : vector<9x256xf32> to vector<1x256xf32>
    %350 = vector.broadcast %349 : vector<1x256xf32> to vector<8x256xf32>
    %351 = arith.mulf %348, %350 : vector<8x256xf32>
    %352 = arith.truncf %351 : vector<8x256xf32> to vector<8x256xbf16>
    %353 = vector.extract_strided_slice %9 {offsets = [3, 0, 0], sizes = [1, 8, 8], strides = [1, 1, 1]} : vector<9x8x8xbf16> to vector<1x8x8xbf16>
    %354 = vector.shape_cast %353 : vector<1x8x8xbf16> to vector<8x8xbf16>
    %cst_107 = arith.constant dense<0.000000e+00> : vector<8x256xf32>
    %355 = tpu.matmul %354, %352, %cst_107 {dimension_numbers = #tpu.dot_dimension_numbers<[1], [0], [0], [1], [0, 0, 1, 1], [], []>} : vector<8x8xbf16>, vector<8x256xbf16>, vector<8x256xf32> -> vector<8x256xf32>
    %356 = arith.addf %347, %355 : vector<8x256xf32>
    %357 = vector.extract_strided_slice %0 {offsets = [4, 0], sizes = [1, 256], strides = [1, 1]} : vector<9x256xf32> to vector<1x256xf32>
    %358 = vector.broadcast %357 : vector<1x256xf32> to vector<8x256xf32>
    %359 = arith.mulf %319, %358 : vector<8x256xf32>
    %360 = arith.truncf %359 : vector<8x256xf32> to vector<8x256xbf16>
    %361 = vector.extract_strided_slice %9 {offsets = [4, 0, 0], sizes = [1, 8, 8], strides = [1, 1, 1]} : vector<9x8x8xbf16> to vector<1x8x8xbf16>
    %362 = vector.shape_cast %361 : vector<1x8x8xbf16> to vector<8x8xbf16>
    %cst_108 = arith.constant dense<0.000000e+00> : vector<8x256xf32>
    %363 = tpu.matmul %362, %360, %cst_108 {dimension_numbers = #tpu.dot_dimension_numbers<[1], [0], [0], [1], [0, 0, 1, 1], [], []>} : vector<8x8xbf16>, vector<8x256xbf16>, vector<8x256xf32> -> vector<8x256xf32>
    %364 = arith.addf %356, %363 : vector<8x256xf32>
    %c252_i32_109 = arith.constant 252 : i32
    %365 = tpu.dynamic_rotate %319 by %c252_i32_109 dim 1 : vector<8x256xf32>, i32 -> vector<8x256xf32>
    %366 = vector.extract_strided_slice %0 {offsets = [5, 0], sizes = [1, 256], strides = [1, 1]} : vector<9x256xf32> to vector<1x256xf32>
    %367 = vector.broadcast %366 : vector<1x256xf32> to vector<8x256xf32>
    %368 = arith.mulf %365, %367 : vector<8x256xf32>
    %369 = arith.truncf %368 : vector<8x256xf32> to vector<8x256xbf16>
    %370 = vector.extract_strided_slice %9 {offsets = [5, 0, 0], sizes = [1, 8, 8], strides = [1, 1, 1]} : vector<9x8x8xbf16> to vector<1x8x8xbf16>
    %371 = vector.shape_cast %370 : vector<1x8x8xbf16> to vector<8x8xbf16>
    %cst_110 = arith.constant dense<0.000000e+00> : vector<8x256xf32>
    %372 = tpu.matmul %371, %369, %cst_110 {dimension_numbers = #tpu.dot_dimension_numbers<[1], [0], [0], [1], [0, 0, 1, 1], [], []>} : vector<8x8xbf16>, vector<8x256xbf16>, vector<8x256xf32> -> vector<8x256xf32>
    %373 = arith.addf %364, %372 : vector<8x256xf32>
    %c196_i32_111 = arith.constant 196 : i32
    %374 = tpu.dynamic_rotate %319 by %c196_i32_111 dim 1 : vector<8x256xf32>, i32 -> vector<8x256xf32>
    %375 = vector.extract_strided_slice %0 {offsets = [6, 0], sizes = [1, 256], strides = [1, 1]} : vector<9x256xf32> to vector<1x256xf32>
    %376 = vector.broadcast %375 : vector<1x256xf32> to vector<8x256xf32>
    %377 = arith.mulf %374, %376 : vector<8x256xf32>
    %378 = arith.truncf %377 : vector<8x256xf32> to vector<8x256xbf16>
    %379 = vector.extract_strided_slice %9 {offsets = [6, 0, 0], sizes = [1, 8, 8], strides = [1, 1, 1]} : vector<9x8x8xbf16> to vector<1x8x8xbf16>
    %380 = vector.shape_cast %379 : vector<1x8x8xbf16> to vector<8x8xbf16>
    %cst_112 = arith.constant dense<0.000000e+00> : vector<8x256xf32>
    %381 = tpu.matmul %380, %378, %cst_112 {dimension_numbers = #tpu.dot_dimension_numbers<[1], [0], [0], [1], [0, 0, 1, 1], [], []>} : vector<8x8xbf16>, vector<8x256xbf16>, vector<8x256xf32> -> vector<8x256xf32>
    %382 = arith.addf %373, %381 : vector<8x256xf32>
    %c192_i32_113 = arith.constant 192 : i32
    %383 = tpu.dynamic_rotate %319 by %c192_i32_113 dim 1 : vector<8x256xf32>, i32 -> vector<8x256xf32>
    %384 = vector.extract_strided_slice %0 {offsets = [7, 0], sizes = [1, 256], strides = [1, 1]} : vector<9x256xf32> to vector<1x256xf32>
    %385 = vector.broadcast %384 : vector<1x256xf32> to vector<8x256xf32>
    %386 = arith.mulf %383, %385 : vector<8x256xf32>
    %387 = arith.truncf %386 : vector<8x256xf32> to vector<8x256xbf16>
    %388 = vector.extract_strided_slice %9 {offsets = [7, 0, 0], sizes = [1, 8, 8], strides = [1, 1, 1]} : vector<9x8x8xbf16> to vector<1x8x8xbf16>
    %389 = vector.shape_cast %388 : vector<1x8x8xbf16> to vector<8x8xbf16>
    %cst_114 = arith.constant dense<0.000000e+00> : vector<8x256xf32>
    %390 = tpu.matmul %389, %387, %cst_114 {dimension_numbers = #tpu.dot_dimension_numbers<[1], [0], [0], [1], [0, 0, 1, 1], [], []>} : vector<8x8xbf16>, vector<8x256xbf16>, vector<8x256xf32> -> vector<8x256xf32>
    %391 = arith.addf %382, %390 : vector<8x256xf32>
    %c188_i32_115 = arith.constant 188 : i32
    %392 = tpu.dynamic_rotate %319 by %c188_i32_115 dim 1 : vector<8x256xf32>, i32 -> vector<8x256xf32>
    %393 = vector.extract_strided_slice %0 {offsets = [8, 0], sizes = [1, 256], strides = [1, 1]} : vector<9x256xf32> to vector<1x256xf32>
    %394 = vector.broadcast %393 : vector<1x256xf32> to vector<8x256xf32>
    %395 = arith.mulf %392, %394 : vector<8x256xf32>
    %396 = arith.truncf %395 : vector<8x256xf32> to vector<8x256xbf16>
    %397 = vector.extract_strided_slice %9 {offsets = [8, 0, 0], sizes = [1, 8, 8], strides = [1, 1, 1]} : vector<9x8x8xbf16> to vector<1x8x8xbf16>
    %398 = vector.shape_cast %397 : vector<1x8x8xbf16> to vector<8x8xbf16>
    %cst_116 = arith.constant dense<0.000000e+00> : vector<8x256xf32>
    %399 = tpu.matmul %398, %396, %cst_116 {dimension_numbers = #tpu.dot_dimension_numbers<[1], [0], [0], [1], [0, 0, 1, 1], [], []>} : vector<8x8xbf16>, vector<8x256xbf16>, vector<8x256xf32> -> vector<8x256xf32>
    %400 = arith.addf %391, %399 : vector<8x256xf32>
    %cst_117 = arith.constant 0.000000e+00 : f32
    %401 = vector.broadcast %cst_117 : f32 to vector<8x256xf32>
    %402 = arith.maximumf %400, %401 : vector<8x256xf32>
    %403 = arith.truncf %402 : vector<8x256xf32> to vector<8x256xbf16>
    %cst_118 = arith.constant dense<0.000000e+00> : vector<1x256xf32>
    %404 = tpu.matmul %11, %403, %cst_118 {dimension_numbers = #tpu.dot_dimension_numbers<[1], [0], [0], [1], [0, 0, 1, 1], [], []>} : vector<1x8xbf16>, vector<8x256xbf16>, vector<1x256xf32> -> vector<1x256xf32>
    %405 = vector.broadcast %12 : vector<1x1xf32> to vector<1x256xf32>
    %406 = arith.addf %404, %405 : vector<1x256xf32>
    %407 = vector.broadcast %231 : vector<32x1xf32> to vector<32x256xf32>
    %408 = vector.broadcast %406 : vector<1x256xf32> to vector<32x256xf32>
    %409 = arith.mulf %407, %408 : vector<32x256xf32>
    %410 = arith.negf %409 : vector<32x256xf32>
    %411 = math.exp %410 : vector<32x256xf32>
    %cst_119 = arith.constant 1.000000e+00 : f32
    %412 = vector.broadcast %cst_119 : f32 to vector<32x256xf32>
    %413 = arith.addf %412, %411 : vector<32x256xf32>
    %414 = arith.divf %412, %413 : vector<32x256xf32>
    %cst_120 = arith.constant 1.000000e+00 : f32
    %415 = vector.broadcast %cst_120 : f32 to vector<32x256xf32>
    %416 = arith.addf %415, %414 : vector<32x256xf32>
    %c1_121 = arith.constant 1 : index
    %c0_122 = arith.constant 0 : index
    %c0_123 = arith.constant 0 : index
    %417 = vector.load %arg1[%c1_121, %c0_122, %c0_123] : memref<2x32x256xbf16, #tpu.memory_space<vmem>>, vector<1x32x256xbf16>
    %418 = vector.shape_cast %417 : vector<1x32x256xbf16> to vector<32x256xbf16>
    %419 = arith.extf %418 : vector<32x256xbf16> to vector<32x256xf32>
    %420 = arith.mulf %416, %419 : vector<32x256xf32>
    %421 = arith.truncf %420 : vector<32x256xf32> to vector<32x256xbf16>
    %c1_124 = arith.constant 1 : index
    %c0_125 = arith.constant 0 : index
    %c0_126 = arith.constant 0 : index
    %422 = vector.load %arg15[%c1_124, %c0_125, %c0_126] : memref<2x32x256xbf16, #tpu.memory_space<vmem>>, vector<1x32x256xbf16>
    %423 = vector.shape_cast %422 : vector<1x32x256xbf16> to vector<32x256xbf16>
    %424 = vector.shape_cast %421 : vector<32x256xbf16> to vector<1x32x256xbf16>
    tpu.vector_store %arg15[%c1_124, %c0_125, %c0_126], %424 {strides = array<i32>} : memref<2x32x256xbf16, #tpu.memory_space<vmem>>, vector<1x32x256xbf16>,
    return
  }
  func.func @transform_0(%arg0: i32) -> (i32, i32, i32) {
    %c0_i32 = arith.constant 0 : i32
    %c0_i32_0 = arith.constant 0 : i32
    %c0_i32_1 = arith.constant 0 : i32
    return %arg0, %c0_i32, %c0_i32_0 : i32, i32, i32
  }
  func.func @transform_1(%arg0: i32) -> (i32, i32) {
    %c0_i32 = arith.constant 0 : i32
    %c0_i32_0 = arith.constant 0 : i32
    %c0_i32_1 = arith.constant 0 : i32
    return %c0_i32, %c0_i32_0 : i32, i32
  }
  func.func @transform_2(%arg0: i32) -> (i32, i32) {
    %c0_i32 = arith.constant 0 : i32
    %c0_i32_0 = arith.constant 0 : i32
    %c0_i32_1 = arith.constant 0 : i32
    return %c0_i32, %c0_i32_0 : i32, i32
  }
  func.func @transform_3(%arg0: i32) -> (i32, i32) {
    %c0_i32 = arith.constant 0 : i32
    %c0_i32_0 = arith.constant 0 : i32
    %c0_i32_1 = arith.constant 0 : i32
    return %c0_i32, %c0_i32_0 : i32, i32
  }
  func.func @transform_4(%arg0: i32) -> (i32, i32) {
    %c0_i32 = arith.constant 0 : i32
    %c0_i32_0 = arith.constant 0 : i32
    %c0_i32_1 = arith.constant 0 : i32
    return %c0_i32, %c0_i32_0 : i32, i32
  }
  func.func @transform_5(%arg0: i32) -> (i32, i32) {
    %c0_i32 = arith.constant 0 : i32
    %c0_i32_0 = arith.constant 0 : i32
    %c0_i32_1 = arith.constant 0 : i32
    return %c0_i32, %c0_i32_0 : i32, i32
  }
  func.func @transform_6(%arg0: i32) -> (i32, i32) {
    %c0_i32 = arith.constant 0 : i32
    %c0_i32_0 = arith.constant 0 : i32
    %c0_i32_1 = arith.constant 0 : i32
    return %c0_i32, %c0_i32_0 : i32, i32
  }
  func.func @transform_7(%arg0: i32) -> (i32, i32) {
    %c0_i32 = arith.constant 0 : i32
    %c0_i32_0 = arith.constant 0 : i32
    %c0_i32_1 = arith.constant 0 : i32
    return %c0_i32, %c0_i32_0 : i32, i32
  }
  func.func @transform_8(%arg0: i32) -> (i32, i32, i32) {
    %c0_i32 = arith.constant 0 : i32
    %c0_i32_0 = arith.constant 0 : i32
    %c0_i32_1 = arith.constant 0 : i32
    %c0_i32_2 = arith.constant 0 : i32
    return %c0_i32, %c0_i32_0, %c0_i32_1 : i32, i32, i32
  }
  func.func @transform_9(%arg0: i32) -> (i32, i32) {
    %c0_i32 = arith.constant 0 : i32
    %c0_i32_0 = arith.constant 0 : i32
    %c0_i32_1 = arith.constant 0 : i32
    return %c0_i32, %c0_i32_0 : i32, i32
  }
  func.func @transform_10(%arg0: i32) -> (i32, i32, i32) {
    %c0_i32 = arith.constant 0 : i32
    %c0_i32_0 = arith.constant 0 : i32
    %c0_i32_1 = arith.constant 0 : i32
    %c0_i32_2 = arith.constant 0 : i32
    return %c0_i32, %c0_i32_0, %c0_i32_1 : i32, i32, i32
  }
  func.func @transform_11(%arg0: i32) -> (i32, i32) {
    %c0_i32 = arith.constant 0 : i32
    %c0_i32_0 = arith.constant 0 : i32
    %c0_i32_1 = arith.constant 0 : i32
    return %c0_i32, %c0_i32_0 : i32, i32
  }
  func.func @transform_12(%arg0: i32) -> (i32, i32) {
    %c0_i32 = arith.constant 0 : i32
    %c0_i32_0 = arith.constant 0 : i32
    %c0_i32_1 = arith.constant 0 : i32
    return %c0_i32, %c0_i32_0 : i32, i32
  }
  func.func @transform_13(%arg0: i32) -> (i32, i32) {
    %c0_i32 = arith.constant 0 : i32
    %c0_i32_0 = arith.constant 0 : i32
    %c0_i32_1 = arith.constant 0 : i32
    return %c0_i32, %c0_i32_0 : i32, i32
  }
  func.func @transform_14(%arg0: i32) -> (i32, i32, i32) {
    %c0_i32 = arith.constant 0 : i32
    %c0_i32_0 = arith.constant 0 : i32
    %c0_i32_1 = arith.constant 0 : i32
    return %arg0, %c0_i32, %c0_i32_0 : i32, i32, i32
  }
}

</mosaic_0001>

<bundles_post_ra>
// kernel: bam_pallas.1
= control target key start
LH: loop header
LB: loop body
LE: loop exit
PB: predicated region body
PF: predicated region fallthrough
CT: control target
= control target key end

     0   :  { %s6511_s0 = inlined_call_operand.hbm [shape: bf16[4,32,256], index: 0, kind: input, shape index: {}]   ;;  %s6512_s1 = inlined_call_operand.hbm [shape: f32[9,256], index: 1, kind: input, shape index: {}]   ;;  %s6513_s2 = inlined_call_operand.hbm [shape: f32[8,32], index: 2, kind: input, shape index: {}]   ;;  %s6514_s3 = inlined_call_operand.hbm [shape: f32[8,1], index: 3, kind: input, shape index: {}]   ;;  %s6515_s4 = inlined_call_operand.hbm [shape: f32[32,8], index: 4, kind: input, shape index: {}]   ;;  %s6516_s5 = inlined_call_operand.hbm [shape: f32[32,1], index: 5, kind: input, shape index: {}]   ;;  %s6517_s6 = inlined_call_operand.hbm [shape: bf16[8,32], index: 6, kind: input, shape index: {}]   ;;  %s6518_s7 = inlined_call_operand.hbm [shape: f32[8,1], index: 7, kind: input, shape index: {}]   ;;  %s6519_s8 = inlined_call_operand.hbm [shape: bf16[9,8,8], index: 8, kind: input, shape index: {}]   ;;  %s6520_s9 = inlined_call_operand.hbm [shape: f32[8,1], index: 9, kind: input, shape index: {}]   ;;  %s6521_s10 = inlined_call_operand.hbm [shape: bf16[9,8,8], index: 10, kind: input, shape index: {}]   ;;  %s6522_s11 = inlined_call_operand.hbm [shape: f32[8,1], index: 11, kind: input, shape index: {}]   ;;  %s6523_s12 = inlined_call_operand.hbm [shape: bf16[1,8], index: 12, kind: input, shape index: {}]   ;;  %s6524_s13 = inlined_call_operand.<no memory space> [shape: f32[1,1], index: 13, kind: input, shape index: {}]   ;;  %s6525_s14 = inlined_call_operand.hbm [shape: bf16[4,32,256], index: 14, kind: output, shape index: {}]  }
   0x1   :  { %6572 = sst [smem:[#allocation46_spill]] %s6511_s0  ;;  %v19_v0 = vstv %s6524_s13 }
   0x2   :  { %6573 = sst [smem:[#allocation47_spill]] %s6512_s1  ;;  %20 = vst [vmem:[#allocation2] sm:$0x1] %v19_v0 }
   0x3   :  { %6574 = sst [smem:[#allocation48_spill]] %s6514_s3 }
   0x4   :  { %6575 = sst [smem:[#allocation49_spill]] %s6525_s14 }
   0x5   :  { %21 = vsyncpa [#allocation4], 0 }
   0x6   :  { %23 = vsyncpa [#allocation4 + $0x1], 0 }
   0x7   :  { %24 = vsyncpa [#allocation7], 0 }
   0x8   :  { %25 = vsyncpa [#allocation10], 0 }
   0x9   :  { %26 = vsyncpa [#allocation13], 0 }
   0xa   :  { %27 = vsyncpa [#allocation16], 0 }
   0xb   :  { %28 = vsyncpa [#allocation19], 0 }
   0xc   :  { %29 = vsyncpa [#allocation22], 0 }
   0xd   :  { %30 = vsyncpa [#allocation5], 0 }
   0xe   :  { %32 = vsyncpa [#allocation5 + $0x1], 0  ;;  %s5174_s15 = smov 0   ;;  %s5176_s16 = smov 0  }
   0xf   :  { %s5178_s17 = smov 0   ;;  %s5180_s18 = smov 0  }
  0x10 LB: > { %6576 = sst [smem:[#allocation33_spill]] %s5051_s15  ;;  %s5065_s13 = smov [#allocation6]   ;;  %s5063_s18 = sphi %s5180_s18, %s6657_s18   ;;  %s5059_s17 = sphi %s5178_s17, %s6656_s17   ;;  %s5055_s16 = sphi %s5176_s16, %s6655_s16   ;;  %s5051_s15 = sphi %s5174_s15, %s6654_s15  }
  0x11   : > { %s380_s19 = sshll.u32 %s5065_s13, 4  ;;  %s5195_s20 = sadd.s32 4294967295, %s5063_s18   ;;  %s5200_s19 = int_to_ptr.vmem [resolvable:$true] %s380_s19 }
  0x12   : > { %6577 = sst [smem:[#allocation34_spill]] %s5195_s20  ;;  %p3960_p0 = scmp.ge.s32.totalorder %s5063_s18, 1 }
  0x13   : > { %p6532_p1 = scmp.eq.s32.totalorder %s5195_s20, 0  ;;  %p368_p2 = scmp.lt.s32.totalorder %s5063_s18, 3 }
  0x14   : > { %s5066_s22 = smov [#allocation9]   ;;  %s5067_s25 = smov [#allocation12]  }
  0x15   : > { %p5202_p3 = pnand %p3960_p0, %p368_p2  ;;  %s405_s23 = sshll.u32 %s5066_s22, 4  ;;  %s5215_s23 = int_to_ptr.vmem [resolvable:$true] %s405_s23 }
  0x16   : > { %s5217_s26 = sshll.u32 %s5067_s25, 4  ;;  %s6581_s1 = sld [smem:[#allocation47_spill]]  ;;  %s429_s26 = int_to_ptr.vmem [resolvable:$true] %s5217_s26 }
  0x17   : > { %s6578_s21 = scalar_select %p5202_p3, 1, 0 }
  0x18   : > { %p4399_p5 = pneg %p5202_p3 }
  0x19   : > { %6579 = sst [smem:[#allocation35_spill]] %s6578_s21 }
  0x1a   : > { %p5211_p6 = pnand %p4399_p5, %p6532_p1 }
  0x1c   : > { %s4607_s29 = scalar_lea.hbm %s6581_s1, 512  ;;  %p5227_p8 = pneg %p5211_p6 }
  0x1d   : > { %p4608_p7 = scmp.ne.s32.totalorder %s6581_s1, %s4607_s29  ;;  %p4614_p11 = scmp.lt.u32.totalorder %s4607_s29, %s6581_s1 }
  0x1f   : > { %p4610_p9 = pnand %p5227_p8, %p4608_p7 }
  0x21   : > { %p4611_p10 = pneg %p4610_p9 }
  0x23   : > { %p4616_p12 = pnand %p4614_p11, %p4611_p10 }
  0x25   : > { %4619 = shalt.err (!%p4616_p12)
}
  0x26   : > { %s4620_s27 = scalar_lea.vmem %s5200_s19, 512  ;;  %p4628_p5 = scmp.lt.s32.totalorder %s5200_s19, %s5200_s19 }
  0x27   : > { %p4621_p13 = scmp.ne.s32.totalorder %s5200_s19, %s4620_s27  ;;  %p4629_p4 = scmp.lt.s32.totalorder %s4620_s27, %s4620_s27 }
  0x29   : > { %p4623_p0 = pnand %p4621_p13, %p5227_p8  ;;  %p4630_p7 = por %p4629_p4, %p4628_p5 }
  0x2b   : > { %p4624_p2 = pneg %p4623_p0 }
  0x2d   : > { %p4631_p9 = pnand %p4630_p7, %p4624_p2 }
  0x2f   : > { %4634 = shalt.err (!%p4631_p9)
}
  0x30   : > { %s5068_s28 = smov 256   ;;  %s5069_s14 = smov 16  }
  0x31   : > { %4402 = dma.hbm_to_vmem [thread:$0]  (!%p5211_p6), %s6581_s1, 512, %s5200_s19, [#allocation7], %s5068_s28, %s5068_s28, %s5069_s14  }
  0x32   : > { %s6583_s3 = sld [smem:[#allocation48_spill]] }
  0x38   : > { %s4635_s21 = scalar_lea.hbm %s6583_s3, 128 }
  0x39   : > { %p4636_p4 = scmp.ne.s32.totalorder %s6583_s3, %s4635_s21  ;;  %p4642_p12 = scmp.lt.u32.totalorder %s4635_s21, %s6583_s3 }
  0x3b   : > { %p4638_p10 = pnand %p4636_p4, %p5227_p8 }
  0x3d   : > { %p4639_p11 = pneg %p4638_p10 }
  0x3f   : > { %p4644_p13 = pnand %p4642_p12, %p4639_p11 }
  0x41   : > { %4647 = shalt.err (!%p4644_p13)
}
  0x42   : > { %s4648_s19 = scalar_lea.vmem %s5215_s23, 128  ;;  %p4656_p7 = scmp.lt.s32.totalorder %s5215_s23, %s5215_s23 }
  0x43   : > { %p4649_p0 = scmp.ne.s32.totalorder %s5215_s23, %s4648_s19  ;;  %p4657_p9 = scmp.lt.s32.totalorder %s4648_s19, %s4648_s19 }
  0x45   : > { %p4651_p2 = pnand %p4649_p0, %p5227_p8  ;;  %p4658_p4 = por %p4657_p9, %p4656_p7 }
  0x47   : > { %p4652_p5 = pneg %p4651_p2 }
  0x49   : > { %p4659_p10 = pnand %p4658_p4, %p4652_p5 }
  0x4b   : > { %4662 = shalt.err (!%p4659_p10)
}
  0x4c   : > { %4408 = dma.hbm_to_vmem [thread:$0]  (!%p5211_p6), %s6583_s3, 128, %s5215_s23, [#allocation10]  }
  0x4d   : > { %s4663_s28 = scalar_lea.hbm %s6516_s5, 512 }
  0x4e   : > { %p4664_p11 = scmp.ne.s32.totalorder %s6516_s5, %s4663_s28  ;;  %p4670_p0 = scmp.lt.u32.totalorder %s4663_s28, %s6516_s5 }
  0x50   : > { %p4666_p12 = pnand %p4664_p11, %p5227_p8 }
  0x52   : > { %p4667_p13 = pneg %p4666_p12 }
  0x54   : > { %p4672_p2 = pnand %p4670_p0, %p4667_p13 }
  0x56   : > { %4675 = shalt.err (!%p4672_p2)
}
  0x57   : > { %s4676_s25 = scalar_lea.vmem %s429_s26, 512  ;;  %p4684_p4 = scmp.lt.s32.totalorder %s429_s26, %s429_s26 }
  0x58   : > { %p4677_p5 = scmp.ne.s32.totalorder %s429_s26, %s4676_s25  ;;  %p4685_p10 = scmp.lt.s32.totalorder %s4676_s25, %s4676_s25 }
  0x5a   : > { %p4679_p7 = pnand %p4677_p5, %p5227_p8  ;;  %p4686_p1 = por %p4685_p10, %p4684_p4 }
  0x5c   : > { %p4680_p9 = pneg %p4679_p7 }
  0x5e   : > { %p4687_p3 = pnand %p4686_p1, %p4680_p9 }
  0x60   : > { %4690 = shalt.err (!%p4687_p3)
}
  0x61   : > { %s6534_s23 = smov 128   ;;  %s5071_s27 = smov 8  }
  0x62   : > { %4414 = dma.hbm_to_vmem [thread:$0]  (!%p5211_p6), %s6516_s5, 512, %s429_s26, [#allocation13], %s6534_s23, %s6534_s23, %s5071_s27  }
  0x63   : > { %s5072_s15 = smov [#allocation15]   ;;  %s5073_s21 = smov [#allocation18]  }
  0x64   : > { %s453_s20 = sshll.u32 %s5072_s15, 4  ;;  %s477_s28 = sshll.u32 %s5073_s21, 4  ;;  %s454_s20 = int_to_ptr.vmem [resolvable:$true] %s453_s20  ;;  %s478_s28 = int_to_ptr.vmem [resolvable:$true] %s477_s28 }
  0x65   : > { %s4691_s30 = scalar_lea.hbm %s6518_s7, 128 }
  0x66   : > { %p4692_p1 = scmp.ne.s32.totalorder %s6518_s7, %s4691_s30  ;;  %p4698_p12 = scmp.lt.u32.totalorder %s4691_s30, %s6518_s7 }
  0x68   : > { %p4694_p3 = pnand %p4692_p1, %p5227_p8 }
  0x6a   : > { %p4695_p11 = pneg %p4694_p3 }
  0x6c   : > { %p4700_p13 = pnand %p4698_p12, %p4695_p11 }
  0x6e   : > { %4703 = shalt.err (!%p4700_p13)
}
  0x6f   : > { %s4704_s26 = scalar_lea.vmem %s454_s20, 128  ;;  %p4712_p7 = scmp.lt.s32.totalorder %s454_s20, %s454_s20 }
  0x70   : > { %p4705_p0 = scmp.ne.s32.totalorder %s454_s20, %s4704_s26  ;;  %p4713_p9 = scmp.lt.s32.totalorder %s4704_s26, %s4704_s26 }
  0x72   : > { %p4707_p2 = pnand %p4705_p0, %p5227_p8  ;;  %p4714_p4 = por %p4713_p9, %p4712_p7 }
  0x74   : > { %p4708_p5 = pneg %p4707_p2 }
  0x76   : > { %p4715_p10 = pnand %p4714_p4, %p4708_p5 }
  0x78   : > { %4718 = shalt.err (!%p4715_p10)
}
  0x79   : > { %4420 = dma.hbm_to_vmem [thread:$0]  (!%p5211_p6), %s6518_s7, 128, %s454_s20, [#allocation16]  }
  0x7a   : > { %s4719_s15 = scalar_lea.hbm %s6520_s9, 128 }
  0x7b   : > { %p4720_p1 = scmp.ne.s32.totalorder %s6520_s9, %s4719_s15  ;;  %p4726_p12 = scmp.lt.u32.totalorder %s4719_s15, %s6520_s9 }
  0x7d   : > { %p4722_p3 = pnand %p4720_p1, %p5227_p8 }
  0x7f   : > { %p4723_p11 = pneg %p4722_p3 }
  0x81   : > { %p4728_p13 = pnand %p4726_p12, %p4723_p11 }
  0x83   : > { %4731 = shalt.err (!%p4728_p13)
}
  0x84   : > { %s4732_s13 = scalar_lea.vmem %s478_s28, 128  ;;  %p4740_p7 = scmp.lt.s32.totalorder %s478_s28, %s478_s28 }
  0x85   : > { %p4733_p0 = scmp.ne.s32.totalorder %s478_s28, %s4732_s13  ;;  %p4741_p9 = scmp.lt.s32.totalorder %s4732_s13, %s4732_s13 }
  0x87   : > { %p4735_p2 = pnand %p4733_p0, %p5227_p8  ;;  %p4742_p4 = por %p4741_p9, %p4740_p7 }
  0x89   : > { %p4736_p5 = pneg %p4735_p2 }
  0x8b   : > { %p4743_p10 = pnand %p4742_p4, %p4736_p5 }
  0x8d   : > { %4746 = shalt.err (!%p4743_p10)
}
  0x8e   : > { %4426 = dma.hbm_to_vmem [thread:$0]  (!%p5211_p6), %s6520_s9, 128, %s478_s28, [#allocation19]  }
  0x8f   : > { %s5074_s26 = smov [#allocation21]   ;;  %s5075_s0 = smov [#allocation8]  }
  0x90   : > { %s501_s19 = sshll.u32 %s5074_s26, 4  ;;  %s394_s1 = sshll.u32 %s5075_s0, 4  ;;  %s502_s19 = int_to_ptr.vmem [resolvable:$true] %s501_s19  ;;  %s395_s1 = int_to_ptr.vmem [resolvable:$true] %s394_s1 }
  0x91   : > { %s4747_s21 = scalar_lea.hbm %s6522_s11, 128 }
  0x92   : > { %p4748_p1 = scmp.ne.s32.totalorder %s6522_s11, %s4747_s21  ;;  %p4754_p12 = scmp.lt.u32.totalorder %s4747_s21, %s6522_s11 }
  0x94   : > { %p4750_p3 = pnand %p4748_p1, %p5227_p8 }
  0x96   : > { %p4751_p11 = pneg %p4750_p3 }
  0x98   : > { %p4756_p13 = pnand %p4754_p12, %p4751_p11 }
  0x9a   : > { %4759 = shalt.err (!%p4756_p13)
}
  0x9b   : > { %s4760_s28 = scalar_lea.vmem %s502_s19, 128  ;;  %p4768_p7 = scmp.lt.s32.totalorder %s502_s19, %s502_s19 }
  0x9c   : > { %p4761_p0 = scmp.ne.s32.totalorder %s502_s19, %s4760_s28  ;;  %p4769_p9 = scmp.lt.s32.totalorder %s4760_s28, %s4760_s28 }
  0x9e   : > { %p4763_p2 = pnand %p4761_p0, %p5227_p8  ;;  %p4770_p4 = por %p4769_p9, %p4768_p7 }
  0xa0   : > { %p4764_p5 = pneg %p4763_p2 }
  0xa2   : > { %p4771_p10 = pnand %p4770_p4, %p4764_p5 }
  0xa4   : > { %4774 = shalt.err (!%p4771_p10)
}
  0xa5   : > { %4432 = dma.hbm_to_vmem [thread:$0]  (!%p5211_p6), %s6522_s11, 128, %s502_s19, [#allocation22]  }
  0xa6   : > { %s4775_s3 = scalar_lea.hbm %s6513_s2, 128 }
  0xa7   : > { %p4776_p1 = scmp.ne.s32.totalorder %s6513_s2, %s4775_s3  ;;  %p4782_p12 = scmp.lt.u32.totalorder %s4775_s3, %s6513_s2 }
  0xa9   : > { %p4778_p3 = pnand %p4776_p1, %p5227_p8 }
  0xab   : > { %p4779_p11 = pneg %p4778_p3 }
  0xad   : > { %p4784_p13 = pnand %p4782_p12, %p4779_p11 }
  0xaf   : > { %4787 = shalt.err (!%p4784_p13)
}
  0xb0   : > { %s4788_s30 = scalar_lea.vmem %s395_s1, 128  ;;  %p4796_p7 = scmp.lt.s32.totalorder %s395_s1, %s395_s1 }
  0xb1   : > { %p4789_p0 = scmp.ne.s32.totalorder %s395_s1, %s4788_s30  ;;  %p4797_p9 = scmp.lt.s32.totalorder %s4788_s30, %s4788_s30 }
  0xb3   : > { %p4791_p2 = pnand %p4789_p0, %p5227_p8  ;;  %p4798_p4 = por %p4797_p9, %p4796_p7 }
  0xb5   : > { %p4792_p5 = pneg %p4791_p2 }
  0xb7   : > { %p4799_p10 = pnand %p4798_p4, %p4792_p5 }
  0xb9   : > { %4802 = shalt.err (!%p4799_p10)
}
  0xba   : > { %4405 = dma.hbm_to_vmem [thread:$0]  (!%p5211_p6), %s6513_s2, 128, %s395_s1, [#allocation7]  }
  0xbb   : > { %s5076_s28 = smov [#allocation11]   ;;  %s5077_s25 = smov [#allocation14]  }
  0xbc   : > { %s415_s20 = sshll.u32 %s5076_s28, 4  ;;  %s442_s26 = sshll.u32 %s5077_s25, 4  ;;  %s416_s20 = int_to_ptr.vmem [resolvable:$true] %s415_s20  ;;  %s443_s26 = int_to_ptr.vmem [resolvable:$true] %s442_s26 }
  0xbd   : > { %s4803_s15 = scalar_lea.hbm %s6515_s4, 512 }
  0xbe   : > { %p4804_p1 = scmp.ne.s32.totalorder %s6515_s4, %s4803_s15  ;;  %p4810_p12 = scmp.lt.u32.totalorder %s4803_s15, %s6515_s4 }
  0xc0   : > { %p4806_p3 = pnand %p4804_p1, %p5227_p8 }
  0xc2   : > { %p4807_p11 = pneg %p4806_p3 }
  0xc4   : > { %p4812_p13 = pnand %p4810_p12, %p4807_p11 }
  0xc6   : > { %4815 = shalt.err (!%p4812_p13)
}
  0xc7   : > { %s4816_s1 = scalar_lea.vmem %s416_s20, 512  ;;  %p4824_p7 = scmp.lt.s32.totalorder %s416_s20, %s416_s20 }
  0xc8   : > { %p4817_p0 = scmp.ne.s32.totalorder %s416_s20, %s4816_s1  ;;  %p4825_p9 = scmp.lt.s32.totalorder %s4816_s1, %s4816_s1 }
  0xca   : > { %p4819_p2 = pnand %p4817_p0, %p5227_p8  ;;  %p4826_p4 = por %p4825_p9, %p4824_p7 }
  0xcc   : > { %p4820_p5 = pneg %p4819_p2 }
  0xce   : > { %p4827_p10 = pnand %p4826_p4, %p4820_p5 }
  0xd0   : > { %4830 = shalt.err (!%p4827_p10)
}
  0xd1   : > { %4411 = dma.hbm_to_vmem [thread:$0]  (!%p5211_p6), %s6515_s4, 512, %s416_s20, [#allocation10], %s6534_s23, %s6534_s23, %s5071_s27  }
  0xd2   : > { %s4831_s0 = scalar_lea.hbm %s6517_s6, 64 }
  0xd3   : > { %p4832_p1 = scmp.ne.s32.totalorder %s6517_s6, %s4831_s0  ;;  %p4838_p12 = scmp.lt.u32.totalorder %s4831_s0, %s6517_s6 }
  0xd5   : > { %p4834_p3 = pnand %p4832_p1, %p5227_p8 }
  0xd7   : > { %p4835_p11 = pneg %p4834_p3 }
  0xd9   : > { %p4840_p13 = pnand %p4838_p12, %p4835_p11 }
  0xdb   : > { %4843 = shalt.err (!%p4840_p13)
}
  0xdc   : > { %s4844_s29 = scalar_lea.vmem %s443_s26, 64  ;;  %p4852_p7 = scmp.lt.s32.totalorder %s443_s26, %s443_s26 }
  0xdd   : > { %p4845_p0 = scmp.ne.s32.totalorder %s443_s26, %s4844_s29  ;;  %p4853_p9 = scmp.lt.s32.totalorder %s4844_s29, %s4844_s29 }
  0xdf   : > { %p4847_p2 = pnand %p4845_p0, %p5227_p8  ;;  %p4854_p4 = por %p4853_p9, %p4852_p7 }
  0xe1   : > { %p4848_p5 = pneg %p4847_p2 }
  0xe3   : > { %p4855_p10 = pnand %p4854_p4, %p4848_p5 }
  0xe5   : > { %4858 = shalt.err (!%p4855_p10)
}
  0xe6   : > { %4417 = dma.hbm_to_vmem [thread:$0]  (!%p5211_p6), %s6517_s6, 64, %s443_s26, [#allocation13]  }
  0xe7   : > { %s5078_s1 = smov [#allocation17]   ;;  %s4859_s25 = scalar_lea.hbm %s6519_s8, 576 }
  0xe8   : > { %s463_s19 = sshll.u32 %s5078_s1, 4  ;;  %p4860_p1 = scmp.ne.s32.totalorder %s6519_s8, %s4859_s25  ;;  %s464_s19 = int_to_ptr.vmem [resolvable:$true] %s463_s19 }
  0xe9   : > { %p4866_p12 = scmp.lt.u32.totalorder %s4859_s25, %s6519_s8 }
  0xea   : > { %p4862_p3 = pnand %p4860_p1, %p5227_p8 }
  0xec   : > { %p4863_p11 = pneg %p4862_p3 }
  0xee   : > { %p4868_p13 = pnand %p4866_p12, %p4863_p11 }
  0xf0   : > { %4871 = shalt.err (!%p4868_p13)
}
  0xf1   : > { %s4872_s26 = scalar_lea.vmem %s464_s19, 576  ;;  %p4880_p7 = scmp.lt.s32.totalorder %s464_s19, %s464_s19 }
  0xf2   : > { %p4873_p0 = scmp.ne.s32.totalorder %s464_s19, %s4872_s26  ;;  %p4881_p9 = scmp.lt.s32.totalorder %s4872_s26, %s4872_s26 }
  0xf4   : > { %p4875_p2 = pnand %p4873_p0, %p5227_p8  ;;  %p4882_p4 = por %p4881_p9, %p4880_p7 }
  0xf6   : > { %p4876_p5 = pneg %p4875_p2 }
  0xf8   : > { %p4883_p10 = pnand %p4882_p4, %p4876_p5 }
  0xfa   : > { %4886 = shalt.err (!%p4883_p10)
}
  0xfb   : > { %s5079_s14 = smov 64   ;;  %s5080_s29 = smov 4  }
  0xfc   : > { %4423 = dma.hbm_to_vmem [thread:$0]  (!%p5211_p6), %s6519_s8, 576, %s464_s19, [#allocation16], %s5079_s14, %s5079_s14, %s5080_s29  }
  0xfd   : > { %s5081_s1 = smov [#allocation20]   ;;  %s5082_s28 = smov [#allocation23]  }
  0xfe   : > { %s487_s13 = sshll.u32 %s5081_s1, 4  ;;  %s512_s25 = sshll.u32 %s5082_s28, 4  ;;  %s488_s13 = int_to_ptr.vmem [resolvable:$true] %s487_s13  ;;  %s5422_s25 = int_to_ptr.vmem [resolvable:$true] %s512_s25 }
  0xff   : > { %s4887_s15 = scalar_lea.hbm %s6521_s10, 576 }
 0x100   : > { %p4888_p1 = scmp.ne.s32.totalorder %s6521_s10, %s4887_s15  ;;  %p4894_p12 = scmp.lt.u32.totalorder %s4887_s15, %s6521_s10 }
 0x102   : > { %p4890_p3 = pnand %p4888_p1, %p5227_p8 }
 0x104   : > { %p4891_p11 = pneg %p4890_p3 }
 0x106   : > { %p4896_p13 = pnand %p4894_p12, %p4891_p11 }
 0x108   : > { %4899 = shalt.err (!%p4896_p13)
}
 0x109   : > { %s4900_s30 = scalar_lea.vmem %s488_s13, 576  ;;  %p4908_p7 = scmp.lt.s32.totalorder %s488_s13, %s488_s13 }
 0x10a   : > { %p4901_p0 = scmp.ne.s32.totalorder %s488_s13, %s4900_s30  ;;  %p4909_p9 = scmp.lt.s32.totalorder %s4900_s30, %s4900_s30 }
 0x10c   : > { %p4903_p2 = pnand %p4901_p0, %p5227_p8  ;;  %p4910_p4 = por %p4909_p9, %p4908_p7 }
 0x10e   : > { %p4904_p5 = pneg %p4903_p2 }
 0x110   : > { %p4911_p10 = pnand %p4910_p4, %p4904_p5 }
 0x112   : > { %4914 = shalt.err (!%p4911_p10)
}
 0x113   : > { %4429 = dma.hbm_to_vmem [thread:$0]  (!%p5211_p6), %s6521_s10, 576, %s488_s13, [#allocation19], %s5079_s14, %s5079_s14, %s5080_s29  }
 0x114   : > { %s4915_s15 = scalar_lea.hbm %s6523_s12, 16 }
 0x115   : > { %p4916_p1 = scmp.ne.s32.totalorder %s6523_s12, %s4915_s15  ;;  %p4922_p12 = scmp.lt.u32.totalorder %s4915_s15, %s6523_s12 }
 0x117   : > { %p4918_p3 = pnand %p4916_p1, %p5227_p8 }
 0x119   : > { %p4919_p11 = pneg %p4918_p3 }
 0x11b   : > { %p4924_p13 = pnand %p4922_p12, %p4919_p11 }
 0x11d   : > { %4927 = shalt.err (!%p4924_p13)
}
 0x11e   : > { %s4928_s14 = scalar_lea.vmem %s5422_s25, 16  ;;  %s4935_s29 = scalar_lea.vmem %s5422_s25, 32 }
 0x11f   : > { %p4929_p0 = scmp.ne.s32.totalorder %s5422_s25, %s4928_s14  ;;  %p4936_p7 = scmp.lt.s32.totalorder %s5422_s25, %s5422_s25 }
 0x120   : > { %p4937_p9 = scmp.lt.s32.totalorder %s4935_s29, %s4928_s14 }
 0x121   : > { %p4931_p2 = pnand %p4929_p0, %p5227_p8 }
 0x122   : > { %p4938_p4 = por %p4937_p9, %p4936_p7 }
 0x123   : > { %p4932_p5 = pneg %p4931_p2 }
 0x125   : > { %p4939_p10 = pnand %p4938_p4, %p4932_p5 }
 0x127   : > { %4942 = shalt.err (!%p4939_p10)
}
 0x128   : > { %s6584_s22 = sld [smem:[#allocation33_spill]]  ;;  %s6585_s1 = sld [smem:[#allocation34_spill]] }
 0x129   : > { %4435 = dma.hbm_to_vmem [thread:$0]  (!%p5211_p6), %s6523_s12, 16, %s5422_s25, [#allocation22]  }
 0x12a   : > { %s3959_s24 = sadd.s32 4294967294, %s5063_s18   ;;  %s5468_s28 = sadd.s32 1, %s5063_s18  }
 0x12b   : > { %s42_s0 = ssub.s32 %s5063_s18, %s5468_s28  ;;  %s45_s3 = sadd.s32 1, %s5059_s17 }
 0x12c   : > { %p43_p8 = scmp.eq.s32.totalorder %s42_s0, 0  ;;  %p52_p1 = scmp.ne.s32.totalorder %s5059_s17, %s5055_s16 }
 0x12d   : > { %p53_p3 = scmp.eq.s32.totalorder %s5063_s18, 0  ;;  %p361_p2 = scmp.eq.s32.totalorder %s3959_s24, 1 }
 0x12e   : > { %p58_p11 = scmp.ne.s32.totalorder %s5055_s16, %s6584_s22  ;;  %p6587_p13 = scmp.eq.s32.totalorder %s6585_s1, 0 }
 0x12f   : > { %s5479_s15 = scalar_select %p43_p8, %s5059_s17, %s45_s3  }
 0x130   : > { %p5481_p12 = por %p53_p3, %p52_p1  ;;  %p5487_p6 = por %p6587_p13, %p58_p11 }
 0x131   : > { %p355_p0 = scmp.eq.s32.totalorder %s6585_s1, 1  ;;  %p4456_p5 = scmp.lt.s32.totalorder %s5063_s18, 2 }
 0x132   : > { %s526_s26 = sand.u32 1, %s5059_s17   ;;  %p5498_p9 = por %p361_p2, %p58_p11 }
 0x133   : > { %p5494_p7 = por %p355_p0, %p52_p1  ;;  %s3974_s14 = sshll.u32 %s526_s26, 6 }
 0x134   : > { %s6590_s19 = scalar_select %p5498_p9, 1, 0 }
 0x135   : > { %s6589_s20 = scalar_select %p5494_p7, 1, 0 }
 0x136   : > { %s4130_s29 = sshll.u32 %s5063_s18, 10  ;;  %s6591_s22 = sld [smem:[#allocation46_spill]] }
 0x137   : > { %s530_s1 = scalar_lea.vmem [#allocation3], %s3974_s14  ;;  %p5512_p4 = pnand %p4456_p5, %p5481_p12 }
 0x138   : > { %s538_s24 = sshll.u32 %s530_s1, 4  ;;  %s5516_s23 = scalar_lea.sflag [#allocation4], %s526_s26  ;;  %s5508_s24 = int_to_ptr.vmem [resolvable:$true] %s538_s24 }
 0x139   : > { %p4945_p8 = pneg %p5512_p4 }
 0x13c   : > { %s5506_s0 = scalar_lea.hbm %s6591_s22, %s4130_s29  ;;  %s4948_s21 = scalar_lea.hbm %s6591_s22, 2048 }
 0x13d   : > { %s4943_s13 = scalar_lea.hbm %s5506_s0, 1024  ;;  %p4949_p11 = scmp.lt.u32.totalorder %s5506_s0, %s6591_s22 }
 0x13e   : > { %p4944_p10 = scmp.ne.s32.totalorder %s5506_s0, %s4943_s13  ;;  %p4950_p12 = scmp.lt.u32.totalorder %s4948_s21, %s4943_s13 }
 0x13f   : > { %p4952_p0 = scmp.lt.u32.totalorder %s4943_s13, %s5506_s0 }
 0x140   : > { %p4946_p1 = pnand %p4945_p8, %p4944_p10  ;;  %p4951_p13 = por %p4950_p12, %p4949_p11 }
 0x142   : > { %p4947_p3 = pneg %p4946_p1  ;;  %p4953_p2 = por %p4952_p0, %p4951_p13 }
 0x144   : > { %p4954_p5 = pnand %p4953_p2, %p4947_p3 }
 0x146   : > { %4957 = shalt.err (!%p4954_p5)
}
 0x147   : > { %s4958_s26 = scalar_lea.vmem %s5508_s24, 1024  ;;  %s5083_s14 = smov [#allocation3]  }
 0x148   : > { %p4959_p10 = scmp.ne.s32.totalorder %s5508_s24, %s4958_s26  ;;  %s4963_s29 = sshll.u32 %s5083_s14, 4  ;;  %s4964_s29 = int_to_ptr.vmem [resolvable:$false] %s4963_s29 }
 0x149   : > { %s4965_s30 = scalar_lea.vmem %s4964_s29, 2048  ;;  %p4966_p7 = scmp.lt.s32.totalorder %s5508_s24, %s4964_s29 }
 0x14a   : > { %p4961_p1 = pnand %p4959_p10, %p4945_p8  ;;  %p4967_p11 = scmp.lt.s32.totalorder %s4965_s30, %s4958_s26 }
 0x14c   : > { %p4962_p9 = pneg %p4961_p1  ;;  %p4968_p12 = por %p4967_p11, %p4966_p7 }
 0x14e   : > { %p4969_p13 = pnand %p4968_p12, %p4962_p9 }
 0x150   : > { %4972 = shalt.err (!%p4969_p13)
}
 0x151   : > { %s6593_s13 = smov 128   ;;  %s6594_s21 = sld [smem:[#allocation35_spill]] }
 0x152   : > { %4439 = dma.hbm_to_vmem [thread:$0]  (!%p5512_p4), %s5506_s0, 1024, %s5508_s24, %s5516_s23, %s6593_s13, %s6593_s13, %s5071_s27  }
 0x157   : > { %p6595_p8 = scmp.ne.s32.totalorder %s6594_s21, 0 }
 0x159   : > { %550 = sbr.rel (%p6595_p8) target bundleno = 3034 (0xbda), region = 76 }
 0x160   : > { %s5550_s1 = sand.u32 1, %s5055_s16  }
 0x161   : > { %s3979_s26 = sshll.u32 %s5550_s1, 6  ;;  %s553_s14 = scalar_lea.sflag [#allocation4], %s5550_s1 }
 0x162   : > { %s5556_s3 = scalar_lea.vmem [#allocation3], %s3979_s26 }
 0x163   : > { %5018 = dma.done.wait (%p5487_p6), %s553_s14, 1024  }
 0x164   : > { %5020 = vsyncadd (%p5487_p6), %s553_s14, 4294966272  ;;  %s6596_s23 = sld [smem:[#allocation34_spill]] }
 0x16a   : > { %p6597_p7 = scmp.eq.s32.totalorder %s6596_s23, 0 }
 0x16c   : > { %5022 = dma.done.wait (%p6597_p7), [#allocation7], 640   ;;  %p6598_p9 = pmov %p6597_p7 }
 0x16d   : > { %p6599_p4 = pmov %p6597_p7 }
 0x16e   : > { %5024 = vsyncadd (%p6598_p9), [#allocation7], 4294966656 }
 0x16f   : > { %5026 = dma.done.wait (%p6599_p4), [#allocation10], 640   ;;  %p6600_p3 = pmov %p6599_p4 }
 0x171   : > { %5028 = vsyncadd (%p6600_p3), [#allocation10], 4294966656  ;;  %p6601_p0 = pmov %p6600_p3 }
 0x173   : > { %5030 = dma.done.wait (%p6601_p0), [#allocation13], 576   ;;  %p6602_p2 = pmov %p6601_p0 }
 0x174   : > { %p6603_p6 = pmov %p6601_p0 }
 0x175   : > { %5032 = vsyncadd (%p6602_p2), [#allocation13], 4294966720 }
 0x176   : > { %5034 = dma.done.wait (%p6603_p6), [#allocation16], 704   ;;  %p6604_p5 = pmov %p6601_p0 }
 0x177   : > { %p6605_p10 = pmov %p6601_p0 }
 0x178   : > { %5036 = vsyncadd (%p6604_p5), [#allocation16], 4294966592 }
 0x179   : > { %5038 = dma.done.wait (%p6605_p10), [#allocation19], 704   ;;  %p6606_p1 = pmov %p6601_p0 }
 0x17a   : > { %p6607_p11 = pmov %p6601_p0 }
 0x17b   : > { %5040 = vsyncadd (%p6606_p1), [#allocation19], 4294966592 }
 0x17c   : > { %5042 = dma.done.wait (%p6607_p11), [#allocation22], 144   ;;  %p6608_p12 = pmov %p6601_p0 }
 0x17d   : > { %v5587_v1 = vld [vmem:[%s5556_s3 + $0x10] sm:$0xff]  ;;  %v5590_v2 = vld [vmem:[%s5556_s3] sm:$0xff]  ;;  %v5593_v3 = vld [vmem:[%s5556_s3 + $0x18] sm:$0xff]  ;;  %v6549_v17 = vmov 0.0|0.0   ;;  %vm5085_vm0 = vmmov 0   ;;  %v6546_v18 = vmov 0.0   ;;  %v966_v60 = vlaneseq }
 0x17e   : > { %5044 = vsyncadd (%p6608_p12), [#allocation22], 4294967152  ;;  %6609 = vst [vmem:[#allocation36_spill] sm:$0xff] %v5587_v1  ;;  %v6539_v4 = vunpack.c.l.bf16 %v5587_v1  ;;  %v6538_v5 = vunpack.c.h.bf16 %v5587_v1  ;;  %v6545_v6 = vunpack.c.l.bf16 %v5590_v2  ;;  %v6542_v7 = vunpack.c.h.bf16 %v5590_v2  ;;  %v5600_v8 = vld [vmem:[%s5556_s3 + $0x8] sm:$0xff]  ;;  %4199 = vmatprep.subr.bf16.mxu0 %v6549_v17  ;;  %4169 = vmatprep.mubr.msk.f32.mxu0 %vm5085_vm0, %v6546_v18  ;;  %v5626_v29 = vld [vmem:[#allocation8] sm:$0xff]  ;;  %s5088_s27 = smov 124  }
 0x17f   : > { %6610 = vst [vmem:[#allocation37_spill] sm:$0xff] %v5590_v2  ;;  %6611 = vst [vmem:[#allocation38_spill] sm:$0xff] %v5593_v3  ;;  %v6537_v9 = vunpack.c.l.bf16 %v5593_v3  ;;  %v6536_v10 = vunpack.c.h.bf16 %v5593_v3  ;;  %v6541_v11 = vunpack.c.l.bf16 %v5600_v8  ;;  %v6540_v12 = vunpack.c.h.bf16 %v5600_v8  ;;  %v5630_v30 = vld [vmem:[#allocation11] sm:$0xff]  ;;  %v5637_v33 = vld [vmem:[#allocation9] sm:$0xff]  ;;  %s5089_s25 = smov 68   ;;  %s5090_s0 = smov 64  }
 0x180   : > { %6612 = vst [vmem:[#allocation39_spill] sm:$0xff] %v5600_v8  ;;  %v708_v13 = vadd.f32 %v6538_v5, %v6539_v4  ;;  %v702_v14 = vadd.f32 %v6542_v7, %v6545_v6  ;;  %vm718_vm1 = vcmask 261120   ;;  %vm793_vm2 = vcmask 64512   ;;  %v667_v32 = vld [vmem:[#allocation15] sm:$0xff]  ;;  %v5646_v41 = vld [vmem:[#allocation11 + $0x10] sm:$0xff]  ;;  %v5654_v43 = vld [vmem:[#allocation11 + $0x18] sm:$0xff] }
 0x181   : > { %v711_v15 = vadd.f32 %v6536_v10, %v6537_v9  ;;  %v705_v16 = vadd.f32 %v6540_v12, %v6541_v11  ;;  %4174 = vmatprep.mubr.msk.f32.mxu1 %vm793_vm2, %v5630_v30  ;;  %v6555_v31 = vmov 0   ;;  %v3999_v38 = vcombine.high %v5590_v2, %v5600_v8  ;;  %v5642_v39 = vld [vmem:[#allocation11 + $0x8] sm:$0xff]  ;;  %v5661_v45 = vld [vmem:[#allocation14] sm:$0xf]  ;;  %v677_v58 = vld [vmem:[#allocation18] sm:$0xff]  ;;  %s5091_s24 = smov 60  }
 0x182   : > { %709 = vadd.xlane.f32.xlu1 %v708_v13  ;;  %703 = vadd.xlane.f32.xlu0 %v702_v14  ;;  %v3998_v40 = vcombine.low %v5590_v2, %v5600_v8  ;;  %v4001_v42 = vcombine.high %v5587_v1, %v5593_v3  ;;  %v4000_v44 = vcombine.low %v5587_v1, %v5593_v3  ;;  %s5092_s29 = smov 4   ;;  %v5702_v61 = vshrl.u32 %v966_v60, 7  ;;  %v5709_v13 = vld [vmem:[#allocation6] sm:$0xff]  ;;  %v5711_v14 = vld [vmem:[#allocation6 + $0x8] sm:$0xff]  ;;  %v5954_v11 = vld [vmem:[%s5556_s3 + $0x38] sm:$0xff]  ;;  %s6403_s30 = scalar_lea.vmem [#allocation24], %s3979_s26 }
 0x183   : > { %4531 = vset.pattern.permute.xlu0 %v6555_v31  ;;  %4532 = vset.pattern.permute.xlu1 %v6555_v31  ;;  %v5704_v62 = vand.u32 127, %v966_v60  ;;  %vm986_vm4 = vcmask 1043456   ;;  %v5850_v9 = vld [vmem:[#allocation17 + $0x10] sm:$0xf]  ;;  %6617 = vst [vmem:[#allocation44_spill] sm:$0xff] %v5954_v11  ;;  %v6552_v6 = vunpack.c.h.bf16 %v5954_v11  ;;  %s4140_s13 = sshll.u32 %s6596_s23, 10 }
 0x184   : > { %v5707_v63 = vsub.s32 0, %v5702_v61  ;;  %v687_v18 = vld [vmem:[#allocation21] sm:$0xff]  ;;  %v5996_v2 = vld [vmem:[#allocation20] sm:$0xf]  ;;  %s3772_s21 = sshll.u32 %s6403_s30, 4  ;;  %s3758_s23 = scalar_lea.sflag [#allocation5], %s5550_s1  ;;  %s6464_s21 = int_to_ptr.vmem [resolvable:$true] %s3772_s21 }
 0x185   : > { %vm968_vm3 = vcmp.lt.s32.totalorder %v5704_v62, 68  ;;  %vm1045_vm5 = vcmp.lt.s32.totalorder %v5704_v62, 64  ;;  %vm1116_vm6 = vcmp.lt.s32.totalorder %v5704_v62, 60  ;;  %vm1187_vm7 = vcmp.lt.s32.totalorder %v5704_v62, 4  ;;  %6618 = vst [vmem:[#allocation45_spill] sm:$0xff] %v5996_v2  ;;  %p6649_p8 = scmp.ne.s32.totalorder %s6589_s20, 0 }
 0x186   : > { %712 = vadd.xlane.f32.xlu1 %v711_v15  ;;  %706 = vadd.xlane.f32.xlu0 %v705_v16  ;;  %6615 = vst [vmem:[#allocation42_spill] sm:$0xff] %v5707_v63  ;;  %v5716_v15 = vrot.slane %v5709_v13, %v5707_v63  ;;  %v5720_v16 = vrot.slane %v5711_v14, %v5707_v63  ;;  %vm1322_vm8 = vcmp.lt.s32.totalorder %v5704_v62, 124  ;;  %v6619_v63 = vmov 0  }
 0x19c   : > { %893 = vperm.xlu0 %4531, %v667_v32  }
 0x20f   : > { %v710_v19 = vpop.xlane.xlu1 %709  ;;  %v704_v20 = vpop.xlane.xlu0 %703 }
 0x210   : > { %v714_v23 = vmul.f32 0.00390625, %v704_v20  ;;  %v716_v25 = vmul.f32 0.00390625, %v710_v19 }
 0x213   : > { %v713_v21 = vpop.xlane.xlu1 %712  ;;  %v707_v22 = vpop.xlane.xlu0 %706 }
 0x214   : > { %v715_v24 = vmul.f32 0.00390625, %v707_v22  ;;  %v717_v26 = vmul.f32 0.00390625, %v713_v21 }
 0x216   : > { %v4200_v27 = vpack.c.bf16 %v715_v24, %v714_v23  ;;  %v4203_v28 = vpack.c.bf16 %v717_v26, %v716_v25  ;;  %v1050_v24 = vsub.s32 1, %v5702_v61 }
 0x218   : > { %4201 = vmatpush3.bf16.msra.mxu0 %v4200_v27  ;;  %v5739_v32 = vrot.slane %v5709_v13, %v1050_v24 }
 0x219   : > { %4202 = vmatprep.subr.bf16.mxu0 %v6549_v17 }
 0x21b   : > { %v5674_v50 = vpop.permute.xlu0 %893 }
 0x21c   : > { %4204 = vmatpush3.bf16.msra.mxu0 %v4203_v28 }
 0x21f   : > { %4170 = vmatmul.mubr.msk.f32.vlgmr.msra.gmra.mrb[0].mxu0 %vm718_vm1, %v5626_v29 }
 0x220   : > { %1025 = vmatprep.mubr.bf16.mxu0 %v6555_v31 }
 0x2f2   : > { %v788_v34 = vpop.f32.mrb[0].mxu0 }
 0x2f3   : > { %v789_v35 = vadd.f32 %v788_v34, %v5637_v33  ;;  %v4171_v36 = vpop.f32.mrb[1].mxu0  ;;  %v5742_v34 = vrot.slane %v5711_v14, %v1050_v24  ;;  %v5784_v24 = vld [vmem:[#allocation17 + $0x4] sm:$0xf] }
 0x2f5   : > { %v792_v37 = vmax.f32 %v789_v35, 0.0  ;;  %v5744_v35 = vld [vmem:[#allocation17] sm:$0xf] }
 0x2f7   : > { %4172 = vmatprep.subr.mxu1 %v792_v37 }
 0x2f8   : > { %4173 = vmatpush3.msra.mxu1 %v792_v37 }
 0x2f9   : > { %4175 = vmatmul.mubr.msk.f32.vlgmr.msra.gmra.mrb[0].mxu1 %vm793_vm2, %v5642_v39  ;;  %919 = vmatprep.subr.bf16.mxu1 %v3999_v38 }
 0x2fa   : > { %920 = vmatpush1.bf16.msra.mxu1 %v3998_v40  ;;  %4177 = vmatprep.mubr.msk.f32.mxu1 %vm793_vm2, %v5646_v41 }
 0x2fb   : > { %921 = vmatprep.subr.bf16.mxu1 %v4001_v42 }
 0x2fd   : > { %4178 = vmatmul.mubr.msk.f32.gmra.mrb[2].mxu1 %vm793_vm2, %v5654_v43 }
 0x2fe   : > { %922 = vmatpush1.bf16.msra.mxu1 %v4000_v44  ;;  %951 = vmatprep.mubr.bf16.mxu1 %v6555_v31  ;;  %v1121_v44 = vsub.s32 2, %v5702_v61 }
 0x301   : > { %4002 = vmatmul.mubr.msk.bf16.vlgmr.msra.gmra.mrb[4].mxu1 %vm718_vm1, %v5661_v45 }
 0x302   : > { %1634 = vmatprep.mubr.bf16.mxu1 %v6555_v31 }
 0x3cc   : > { %v5666_v46 = vpop.f32.mrb[0].mxu1 }
 0x3cd   : > { %v5668_v47 = vpop.f32.mrb[1].mxu1 }
 0x3d0   : > { %v5670_v48 = vpop.f32.mrb[2].mxu1 }
 0x3d1   : > { %6613 = vst [vmem:[#allocation40_spill] sm:$0xff] %v5670_v48  ;;  %v5672_v49 = vpop.f32.mrb[3].mxu1 }
 0x3d2   : > { %6614 = vst [vmem:[#allocation41_spill] sm:$0xff] %v5672_v49  ;;  %v6019_v49 = vld [vmem:[#allocation20 + $0x4] sm:$0xf] }
 0x3d4   : > { %v953_v51 = vpop.f32.mrb[4].mxu1 }
 0x3d5   : > { %v954_v52 = vadd.f32 %v953_v51, %v5674_v50  ;;  %v955_v53 = vpop.f32.mrb[5].mxu1 }
 0x3d6   : > { %v957_v54 = vpop.f32.mrb[6].mxu1  ;;  %v956_v56 = vadd.f32 %v955_v53, %v5674_v50 }
 0x3d7   : > { %v5677_v55 = vmax.f32 %v954_v52, 0.0  ;;  %v958_v57 = vpop.f32.mrb[7].mxu1 }
 0x3d8   : > { %v5684_v59 = vmax.f32 %v956_v56, 0.0  ;;  %v5766_v56 = vrot.slane %v5709_v13, %v1121_v44  ;;  %v5769_v57 = vrot.slane %v5711_v14, %v1121_v44 }
 0x3d9   : > { %1318 = vrot.lane.b32.xlu0 %v5677_v55, %s5088_s27  ;;  %962 = vrot.lane.b32.xlu1 %v5677_v55, %s5089_s25 }
 0x3dd   : > { %1036 = vperm.xlu0 %4531, %v677_v58   ;;  %964 = vrot.lane.b32.xlu1 %v5684_v59, %s5089_s25 }
 0x3e1   : > { %1041 = vrot.lane.b32.xlu1 %v5677_v55, %s5090_s0 }
 0x3e5   : > { %1043 = vrot.lane.b32.xlu1 %v5684_v59, %s5090_s0 }
 0x3e9   : > { %1112 = vrot.lane.b32.xlu1 %v5677_v55, %s5091_s24 }
 0x3ed   : > { %1114 = vrot.lane.b32.xlu1 %v5684_v59, %s5091_s24 }
 0x3f1   : > { %1183 = vrot.lane.b32.xlu1 %v5677_v55, %s5092_s29 }
 0x3f5   : > { %1185 = vrot.lane.b32.xlu1 %v5684_v59, %s5092_s29 }
 0x3f9   : > { %1320 = vrot.lane.b32.xlu1 %v5684_v59, %s5088_s27 }
 0x44b   : > { %v963_v0 = vpop.permute.xlu1 %962 }
 0x44f   : > { %v965_v19 = vpop.permute.xlu1 %964 }
 0x450   : > { %v5724_v20 = vsel %vm968_vm3, %v963_v0, %v965_v19  ;;  %v5728_v21 = vsel %vm968_vm3, %v965_v19, %v963_v0 }
 0x451   : > { %v979_v22 = vmul.f32 %v5716_v15, %v5728_v21  ;;  %v980_v23 = vmul.f32 %v5720_v16, %v5724_v20 }
 0x453   : > { %v981_v25 = vpack.c.bf16 %v979_v22, %v979_v22  ;;  %v982_v26 = vpack.c.bf16 %v980_v23, %v980_v23  ;;  %v1042_v27 = vpop.permute.xlu1 %1041  ;;  %v1192_v23 = vsub.s32 3, %v5702_v61 }
 0x455   : > { %4003 = vmatprep.subr.msk.bf16.mxu0 %vm986_vm4, %v982_v26  ;;  %v988_v28 = vsel %vm986_vm4, %v981_v25, 0 }
 0x456   : > { %994 = vmatpush1.bf16.msra.mxu0 %v988_v28  ;;  %v1256_v28 = vsub.s32 4, %v5702_v61 }
 0x457   : > { %v1044_v36 = vpop.permute.xlu1 %1043 }
 0x458   : > { %v5748_v37 = vsel %vm1045_vm5, %v1042_v27, %v1044_v36  ;;  %v5752_v38 = vsel %vm1045_vm5, %v1044_v36, %v1042_v27 }
 0x459   : > { %v1056_v40 = vmul.f32 %v5739_v32, %v5752_v38  ;;  %v1057_v42 = vmul.f32 %v5742_v34, %v5748_v37  ;;  %4004 = vmatmul.mubr.msk.bf16.vlgmr.msra.gmra.mrb[4].mxu0 %vm793_vm2, %v5744_v35 }
 0x45a   : > { %1101 = vmatprep.mubr.bf16.mxu0 %v6555_v31 }
 0x45b   : > { %v1058_v51 = vpack.c.bf16 %v1056_v40, %v1056_v40  ;;  %v1059_v52 = vpack.c.bf16 %v1057_v42, %v1057_v42  ;;  %v1113_v53 = vpop.permute.xlu1 %1112  ;;  %v5793_v40 = vrot.slane %v5709_v13, %v1192_v23  ;;  %v5796_v42 = vrot.slane %v5711_v14, %v1192_v23 }
 0x45d   : > { %4005 = vmatprep.subr.msk.bf16.mxu0 %vm986_vm4, %v1059_v52  ;;  %v1064_v54 = vsel %vm986_vm4, %v1058_v51, 0 }
 0x45e   : > { %1070 = vmatpush1.bf16.msra.mxu0 %v1064_v54 }
 0x45f   : > { %v1115_v58 = vpop.permute.xlu1 %1114 }
 0x460   : > { %v5773_v60 = vsel %vm1116_vm6, %v1113_v53, %v1115_v58  ;;  %v5777_v0 = vsel %vm1116_vm6, %v1115_v58, %v1113_v53  ;;  %v5806_v58 = vrot.slane %v5711_v14, %v1256_v28 }
 0x461   : > { %v1127_v19 = vmul.f32 %v5766_v56, %v5777_v0  ;;  %v1128_v22 = vmul.f32 %v5769_v57, %v5773_v60 }
 0x462   : > { %v1263_v23 = vmul.f32 %v5806_v58, %v5684_v59  ;;  %v1319_v59 = vpop.permute.xlu0 %1318 }
 0x463   : > { %v1129_v25 = vpack.c.bf16 %v1127_v19, %v1127_v19  ;;  %v1130_v26 = vpack.c.bf16 %v1128_v22, %v1128_v22  ;;  %v1184_v27 = vpop.permute.xlu1 %1183 }
 0x465   : > { %4006 = vmatmul.mubr.msk.bf16.vlgmr.msra.gmra.mrb[4].mxu0 %vm793_vm2, %v5784_v24  ;;  %4007 = vmatprep.subr.msk.bf16.mxu0 %vm986_vm4, %v1130_v26  ;;  %v1135_v36 = vsel %vm986_vm4, %v1129_v25, 0  ;;  %v5811_v25 = vld [vmem:[#allocation17 + $0x8] sm:$0xf]  ;;  %v1327_v26 = vsub.s32 5, %v5702_v61 }
 0x466   : > { %1141 = vmatpush1.bf16.msra.mxu0 %v1135_v36  ;;  %1172 = vmatprep.mubr.bf16.mxu0 %v6555_v31  ;;  %v1265_v36 = vpack.c.bf16 %v1263_v23, %v1263_v23  ;;  %v1391_v23 = vsub.s32 6, %v5702_v61 }
 0x467   : > { %v1186_v44 = vpop.permute.xlu1 %1185 }
 0x468   : > { %v1188_v51 = vsel %vm1187_vm7, %v1184_v27, %v1186_v44  ;;  %v1189_v52 = vsel %vm1187_vm7, %v1186_v44, %v1184_v27  ;;  %v5818_v44 = vrot.slane %v5709_v13, %v1256_v28 }
 0x469   : > { %v1198_v53 = vmul.f32 %v5793_v40, %v1189_v52  ;;  %v1199_v54 = vmul.f32 %v5796_v42, %v1188_v51  ;;  %v5824_v52 = vrot.slane %v5711_v14, %v1327_v26 }
 0x46b   : > { %v1201_v19 = vpack.c.bf16 %v1199_v54, %v1199_v54  ;;  %v1200_v22 = vpack.c.bf16 %v1198_v53, %v1198_v53  ;;  %v1321_v51 = vpop.permute.xlu1 %1320  ;;  %v1262_v53 = vmul.f32 %v5818_v44, %v5677_v55 }
 0x46c   : > { %v1324_v54 = vsel %vm1322_vm8, %v1321_v51, %v1319_v59  ;;  %v1323_v55 = vsel %vm1322_vm8, %v1319_v59, %v1321_v51 }
 0x46d   : > { %4009 = vmatprep.subr.msk.bf16.mxu0 %vm986_vm4, %v1201_v19  ;;  %v1206_v27 = vsel %vm986_vm4, %v1200_v22, 0  ;;  %v1334_v28 = vmul.f32 %v5824_v52, %v1324_v54  ;;  %v1264_v19 = vpack.c.bf16 %v1262_v53, %v1262_v53  ;;  %v5831_v22 = vld [vmem:[#allocation17 + $0xc] sm:$0xf]  ;;  %v5845_v53 = vrot.slane %v5711_v14, %v1391_v23 }
 0x46f   : > { %v1270_v10 = vsel %vm986_vm4, %v1264_v19, 0  ;;  %v1398_v54 = vmul.f32 %v5845_v53, %v5728_v21  ;;  %v5853_v19 = vrot.slane %v5709_v13, %v1391_v23 }
 0x471   : > { %4008 = vmatmul.mubr.msk.bf16.vlgmr.msra.gmra.mrb[4].mxu0 %vm793_vm2, %v5811_v25  ;;  %v1400_v51 = vpack.c.bf16 %v1398_v54, %v1398_v54  ;;  %v1397_v21 = vmul.f32 %v5853_v19, %v5724_v20  ;;  %v5880_v20 = vld [vmem:[#allocation6 + $0x18] ss:$0 sm:$0xff] }
 0x472   : > { %1212 = vmatpush1.bf16.msra.mxu0 %v1206_v27  ;;  %1243 = vmatprep.mubr.bf16.mxu0 %v6555_v31  ;;  %v5835_v27 = vrot.slane %v5709_v13, %v1327_v26 }
 0x473   : > { %4011 = vmatprep.subr.msk.bf16.mxu0 %vm986_vm4, %v1265_v36  ;;  %v1336_v36 = vpack.c.bf16 %v1334_v28, %v1334_v28  ;;  %v1399_v23 = vpack.c.bf16 %v1397_v21, %v1397_v21  ;;  %v5889_v21 = vld [vmem:[#allocation6 + $0x10] ss:$0 sm:$0xff] }
 0x474   : > { %v1333_v26 = vmul.f32 %v5835_v27, %v1323_v55  ;;  %v5868_v55 = vld [vmem:[#allocation17 + $0x14] sm:$0xf] }
 0x476   : > { %v1335_v28 = vpack.c.bf16 %v1333_v26, %v1333_v26 }
 0x478   : > { %v1341_v59 = vsel %vm986_vm4, %v1335_v28, 0  ;;  %v1405_v28 = vsel %vm986_vm4, %v1399_v23, 0 }
 0x47d   : > { %4010 = vmatmul.mubr.msk.bf16.vlgmr.msra.gmra.mrb[4].mxu0 %vm793_vm2, %v5831_v22 }
 0x47e   : > { %1276 = vmatpush1.bf16.msra.mxu0 %v1270_v10  ;;  %1307 = vmatprep.mubr.bf16.mxu0 %v6555_v31  ;;  %v1455_v10 = vsub.s32 7, %v5702_v61 }
 0x47f   : > { %4013 = vmatprep.subr.msk.bf16.mxu0 %vm986_vm4, %v1336_v36 }
 0x480   : > { %v5864_v36 = vrot.slane %v5711_v14, %v1455_v10  ;;  %v5871_v26 = vrot.slane %v5709_v13, %v1455_v10  ;;  %v1526_v13 = vmul.f32 %v5880_v20, %v5777_v0  ;;  %v5895_v0 = vld [vmem:[#allocation17 + $0x1c] sm:$0xf] }
 0x482   : > { %v1462_v61 = vmul.f32 %v5864_v36, %v5752_v38  ;;  %v1461_v14 = vmul.f32 %v5871_v26, %v5748_v37  ;;  %v1528_v10 = vpack.c.bf16 %v1526_v13, %v1526_v13  ;;  %v1525_v37 = vmul.f32 %v5889_v21, %v5773_v60 }
 0x484   : > { %v1464_v54 = vpack.c.bf16 %v1462_v61, %v1462_v61  ;;  %v1463_v38 = vpack.c.bf16 %v1461_v14, %v1461_v14  ;;  %v1527_v23 = vpack.c.bf16 %v1525_v37, %v1525_v37 }
 0x486   : > { %v1533_v61 = vsel %vm986_vm4, %v1527_v23, 0 }
 0x489   : > { %4012 = vmatmul.mubr.msk.bf16.vlgmr.msra.gmra.mrb[4].mxu0 %vm793_vm2, %v5850_v9 }
 0x48a   : > { %1347 = vmatpush1.bf16.msra.mxu0 %v1341_v59  ;;  %1378 = vmatprep.mubr.bf16.mxu0 %v6555_v31  ;;  %v1469_v59 = vsel %vm986_vm4, %v1463_v38, 0 }
 0x48b   : > { %4015 = vmatprep.subr.msk.bf16.mxu0 %vm986_vm4, %v1400_v51  ;;  %v5884_v51 = vld [vmem:[#allocation17 + $0x18] sm:$0xf] }
 0x495   : > { %4014 = vmatmul.mubr.msk.bf16.vlgmr.msra.gmra.mrb[4].mxu0 %vm793_vm2, %v5868_v55 }
 0x496   : > { %1411 = vmatpush1.bf16.msra.mxu0 %v1405_v28  ;;  %1442 = vmatprep.mubr.bf16.mxu0 %v6555_v31  ;;  %v5906_v28 = vpop.permute.xlu0 %1036 }
 0x497   : > { %4017 = vmatprep.subr.msk.bf16.mxu0 %vm986_vm4, %v1464_v54  ;;  %v5901_v54 = vld [vmem:[#allocation17 + $0x20] sm:$0xf] }
 0x4a1   : > { %4016 = vmatmul.mubr.msk.bf16.vlgmr.msra.gmra.mrb[4].mxu0 %vm793_vm2, %v5884_v51 }
 0x4a2   : > { %1475 = vmatpush1.bf16.msra.mxu0 %v1469_v59  ;;  %1506 = vmatprep.mubr.bf16.mxu0 %v6555_v31 }
 0x4a3   : > { %4021 = vmatprep.subr.msk.bf16.mxu0 %vm986_vm4, %v1528_v10 }
 0x4ad   : > { %4018 = vmatmul.mubr.msk.bf16.vlgmr.msra.gmra.mrb[4].mxu0 %vm793_vm2, %v5895_v0 }
 0x4ae   : > { %1539 = vmatpush1.bf16.msra.mxu0 %v1533_v61  ;;  %1570 = vmatprep.mubr.bf16.mxu0 %v6555_v31  ;;  %v5935_v61 = vld [vmem:[%s5556_s3 + $0x28] sm:$0xff] }
 0x4b9   : > { %4022 = vmatmul.mubr.msk.bf16.vlgmr.msra.gmra.mrb[4].mxu0 %vm793_vm2, %v5901_v54 }
 0x4ba   : > { %2176 = vmatprep.mubr.bf16.mxu0 %v6555_v31 }
 0x58c   : > { %v1572_v60 = vpop.f32.mrb[4].mxu0 }
 0x58d   : > { %v4211_v14 = vadd.f32 %v1572_v60, %v5906_v28  ;;  %v1574_v38 = vpop.f32.mrb[5].mxu0  ;;  %v6544_v60 = vunpack.c.l.bf16 %v5935_v61 }
 0x58e   : > { %v4212_v13 = vadd.f32 %v1574_v38, %v5906_v28  ;;  %v1576_v10 = vpop.f32.mrb[6].mxu0  ;;  %v5940_v38 = vld [vmem:[%s5556_s3 + $0x30] sm:$0xff] }
 0x58f   : > { %v5910_v59 = vmax.f32 %v4211_v14, 0.0  ;;  %v1577_v37 = vpop.f32.mrb[7].mxu0  ;;  %v6543_v14 = vunpack.c.h.bf16 %v5935_v61  ;;  %6616 = vst [vmem:[#allocation43_spill] sm:$0xff] %v5940_v38  ;;  %v6547_v5 = vunpack.c.h.bf16 %v5940_v38 }
 0x590   : > { %v5912_v23 = vmax.f32 %v4212_v13, 0.0  ;;  %v5943_v13 = vld [vmem:[%s5556_s3 + $0x20] sm:$0xff]  ;;  %v6548_v37 = vunpack.c.l.bf16 %v5940_v38  ;;  %s6648_s3 = sld [smem:[#allocation49_spill]] }
 0x591   : > { %1583 = vrot.lane.b32.xlu1 %v5910_v59, %s5089_s25  ;;  %v2329_v10 = vadd.f32 %v6543_v14, %v6544_v60  ;;  %v6554_v4 = vunpack.c.l.bf16 %v5943_v13  ;;  %v6551_v12 = vunpack.c.h.bf16 %v5943_v13  ;;  %v6553_v60 = vunpack.c.l.bf16 %v5954_v11 }
 0x592   : > { %1585 = vrot.lane.b32.xlu0 %v5912_v23, %s5089_s25  ;;  %v2332_v7 = vadd.f32 %v6547_v5, %v6548_v37 }
 0x593   : > { %v2326_v14 = vadd.f32 %v6551_v12, %v6554_v4 }
 0x595   : > { %1650 = vrot.lane.b32.xlu1 %v5910_v59, %s5090_s0 }
 0x596   : > { %1652 = vrot.lane.b32.xlu0 %v5912_v23, %s5090_s0 }
 0x599   : > { %1712 = vrot.lane.b32.xlu1 %v5910_v59, %s5091_s24 }
 0x59a   : > { %1714 = vrot.lane.b32.xlu0 %v5912_v23, %s5091_s24 }
 0x59d   : > { %1774 = vrot.lane.b32.xlu1 %v5910_v59, %s5092_s29 }
 0x59e   : > { %1776 = vrot.lane.b32.xlu0 %v5912_v23, %s5092_s29 }
 0x5a1   : > { %1892 = vrot.lane.b32.xlu1 %v5910_v59, %s5088_s27 }
 0x5a2   : > { %1894 = vrot.lane.b32.xlu0 %v5912_v23, %s5088_s27 }
 0x5c1   : > { %2330 = vadd.xlane.f32.xlu0 %v2329_v10  ;;  %v2335_v10 = vadd.f32 %v6552_v6, %v6553_v60 }
 0x5c5   : > { %2333 = vadd.xlane.f32.xlu0 %v2332_v7  ;;  %2327 = vadd.xlane.f32.xlu1 %v2326_v14 }
 0x5c9   : > { %2336 = vadd.xlane.f32.xlu1 %v2335_v10 }
 0x5db   : > { %1645 = vperm.xlu0 %4531, %v687_v18  }
 0x603   : > { %v1584_v5 = vpop.permute.xlu1 %1583 }
 0x604   : > { %v1586_v37 = vpop.permute.xlu0 %1585 }
 0x605   : > { %v5972_v17 = vsel %vm968_vm3, %v1584_v5, %v1586_v37  ;;  %v5976_v12 = vsel %vm968_vm3, %v1586_v37, %v1584_v5 }
 0x606   : > { %v1589_v7 = vmul.f32 %v5976_v12, %v5716_v15  ;;  %v1590_v14 = vmul.f32 %v5972_v17, %v5720_v16 }
 0x607   : > { %v1651_v6 = vpop.permute.xlu1 %1650 }
 0x608   : > { %v1591_v10 = vpack.c.bf16 %v1589_v7, %v1589_v7  ;;  %v1592_v60 = vpack.c.bf16 %v1590_v14, %v1590_v14  ;;  %v1653_v18 = vpop.permute.xlu0 %1652 }
 0x609   : > { %v5984_v4 = vsel %vm1045_vm5, %v1651_v6, %v1653_v18  ;;  %v5988_v31 = vsel %vm1045_vm5, %v1653_v18, %v1651_v6 }
 0x60a   : > { %v1656_v5 = vmul.f32 %v5988_v31, %v5739_v32  ;;  %v1657_v37 = vmul.f32 %v5984_v4, %v5742_v34  ;;  %4023 = vmatprep.subr.msk.bf16.mxu1 %vm986_vm4, %v1592_v60  ;;  %v1597_v7 = vsel %vm986_vm4, %v1591_v10, 0 }
 0x60b   : > { %v1713_v3 = vpop.permute.xlu1 %1712  ;;  %1603 = vmatpush1.bf16.msra.mxu1 %v1597_v7 }
 0x60c   : > { %v1658_v14 = vpack.c.bf16 %v1656_v5, %v1656_v5  ;;  %v1659_v1 = vpack.c.bf16 %v1657_v37, %v1657_v37  ;;  %v1715_v8 = vpop.permute.xlu0 %1714 }
 0x60d   : > { %v6000_v6 = vsel %vm1116_vm6, %v1713_v3, %v1715_v8  ;;  %v6010_v10 = vsel %vm1116_vm6, %v1715_v8, %v1713_v3 }
 0x60e   : > { %v1719_v18 = vmul.f32 %v6000_v6, %v5769_v57  ;;  %4025 = vmatprep.subr.msk.bf16.mxu1 %vm986_vm4, %v1659_v1  ;;  %4024 = vmatmul.mubr.msk.bf16.vlgmr.msra.gmra.mrb[8].mxu1 %vm793_vm2, %v5996_v2  ;;  %v1664_v60 = vsel %vm986_vm4, %v1658_v14, 0  ;;  %v1718_v1 = vmul.f32 %v6010_v10, %v5766_v56 }
 0x60f   : > { %1670 = vmatpush1.bf16.msra.mxu1 %v1664_v60  ;;  %v1775_v37 = vpop.permute.xlu1 %1774  ;;  %1701 = vmatprep.mubr.bf16.mxu1 %v6619_v63 }
 0x610   : > { %v1721_v5 = vpack.c.bf16 %v1719_v18, %v1719_v18  ;;  %v1777_v7 = vpop.permute.xlu0 %1776  ;;  %v1720_v48 = vpack.c.bf16 %v1718_v1, %v1718_v1  ;;  %v6031_v1 = vld [vmem:[#allocation20 + $0x8] sm:$0xf] }
 0x611   : > { %v1778_v2 = vsel %vm1187_vm7, %v1775_v37, %v1777_v7  ;;  %v1779_v18 = vsel %vm1187_vm7, %v1777_v7, %v1775_v37 }
 0x612   : > { %4027 = vmatprep.subr.msk.bf16.mxu1 %vm986_vm4, %v1721_v5  ;;  %v1781_v14 = vmul.f32 %v1778_v2, %v5796_v42  ;;  %v1726_v8 = vsel %vm986_vm4, %v1720_v48, 0  ;;  %v1780_v60 = vmul.f32 %v1779_v18, %v5793_v40  ;;  %v1837_v2 = vmul.f32 %v5912_v23, %v5806_v58 }
 0x613   : > { %v1893_v37 = vpop.permute.xlu1 %1892 }
 0x614   : > { %v1783_v3 = vpack.c.bf16 %v1781_v14, %v1781_v14  ;;  %v1782_v5 = vpack.c.bf16 %v1780_v60, %v1780_v60  ;;  %v1839_v14 = vpack.c.bf16 %v1837_v2, %v1837_v2  ;;  %v1895_v7 = vpop.permute.xlu0 %1894  ;;  %v6043_v60 = vld [vmem:[#allocation20 + $0xc] sm:$0xf] }
 0x615   : > { %v1897_v23 = vsel %vm1322_vm8, %v1895_v7, %v1893_v37 }
 0x616   : > { %v1788_v48 = vsel %vm986_vm4, %v1782_v5, 0 }
 0x61a   : > { %4026 = vmatmul.mubr.msk.bf16.vlgmr.msra.gmra.mrb[8].mxu1 %vm793_vm2, %v6019_v49 }
 0x61b   : > { %1732 = vmatpush1.bf16.msra.mxu1 %v1726_v8  ;;  %1763 = vmatprep.mubr.bf16.mxu1 %v6619_v63  ;;  %v1899_v8 = vmul.f32 %v1897_v23, %v5824_v52  ;;  %v6055_v23 = vld [vmem:[#allocation20 + $0x10] sm:$0xf] }
 0x61c   : > { %4029 = vmatprep.subr.msk.bf16.mxu1 %vm986_vm4, %v1783_v3  ;;  %v1836_v3 = vmul.f32 %v5910_v59, %v5818_v44 }
 0x61d   : > { %v1901_v5 = vpack.c.bf16 %v1899_v8, %v1899_v8 }
 0x61e   : > { %v1838_v18 = vpack.c.bf16 %v1836_v3, %v1836_v3 }
 0x620   : > { %v1844_v2 = vsel %vm986_vm4, %v1838_v18, 0 }
 0x626   : > { %4028 = vmatmul.mubr.msk.bf16.vlgmr.msra.gmra.mrb[8].mxu1 %vm793_vm2, %v6031_v1 }
 0x627   : > { %1794 = vmatpush1.bf16.msra.mxu1 %v1788_v48  ;;  %1825 = vmatprep.mubr.bf16.mxu1 %v6619_v63  ;;  %v1896_v48 = vsel %vm1322_vm8, %v1893_v37, %v1895_v7  ;;  %v1954_v37 = vmul.f32 %v5972_v17, %v5853_v19  ;;  %v2010_v17 = vmul.f32 %v5984_v4, %v5871_v26 }
 0x628   : > { %4031 = vmatprep.subr.msk.bf16.mxu1 %vm986_vm4, %v1839_v14  ;;  %v1898_v59 = vmul.f32 %v1896_v48, %v5835_v27  ;;  %v1955_v14 = vmul.f32 %v5976_v12, %v5845_v53  ;;  %v2011_v12 = vmul.f32 %v5988_v31, %v5864_v36  ;;  %v2067_v31 = vmul.f32 %v5880_v20, %v6010_v10 }
 0x629   : > { %v1956_v7 = vpack.c.bf16 %v1954_v37, %v1954_v37  ;;  %v2066_v4 = vmul.f32 %v5889_v21, %v6000_v6  ;;  %v6086_v37 = vld [vmem:[#allocation20 + $0x1c] sm:$0xf] }
 0x62a   : > { %v1900_v3 = vpack.c.bf16 %v1898_v59, %v1898_v59  ;;  %v1957_v8 = vpack.c.bf16 %v1955_v14, %v1955_v14  ;;  %v2012_v59 = vpack.c.bf16 %v2010_v17, %v2010_v17  ;;  %v6077_v14 = vld [vmem:[#allocation20 + $0x18] sm:$0xf] }
 0x62b   : > { %v1962_v48 = vsel %vm986_vm4, %v1956_v7, 0 }
 0x62c   : > { %v1906_v18 = vsel %vm986_vm4, %v1900_v3, 0  ;;  %v2069_v3 = vpack.c.bf16 %v2067_v31, %v2067_v31 }
 0x632   : > { %4030 = vmatmul.mubr.msk.bf16.vlgmr.msra.gmra.mrb[8].mxu1 %vm793_vm2, %v6043_v60 }
 0x633   : > { %1850 = vmatpush1.bf16.msra.mxu1 %v1844_v2  ;;  %1881 = vmatprep.mubr.bf16.mxu1 %v6619_v63  ;;  %v2013_v2 = vpack.c.bf16 %v2011_v12, %v2011_v12 }
 0x634   : > { %4033 = vmatprep.subr.msk.bf16.mxu1 %vm986_vm4, %v1901_v5  ;;  %v6066_v5 = vld [vmem:[#allocation20 + $0x14] sm:$0xf] }
 0x63e   : > { %4032 = vmatmul.mubr.msk.bf16.vlgmr.msra.gmra.mrb[8].mxu1 %vm793_vm2, %v6055_v23 }
 0x63f   : > { %1912 = vmatpush1.bf16.msra.mxu1 %v1906_v18  ;;  %1943 = vmatprep.mubr.bf16.mxu1 %v6619_v63  ;;  %v2068_v18 = vpack.c.bf16 %v2066_v4, %v2066_v4  ;;  %v6093_v4 = vld [vmem:[#allocation20 + $0x20] sm:$0xf] }
 0x640   : > { %4035 = vmatprep.subr.msk.bf16.mxu1 %vm986_vm4, %v1957_v8  ;;  %v2018_v8 = vsel %vm986_vm4, %v2012_v59, 0 }
 0x641   : > { %v2074_v10 = vsel %vm986_vm4, %v2068_v18, 0 }
 0x64a   : > { %4034 = vmatmul.mubr.msk.bf16.vlgmr.msra.gmra.mrb[8].mxu1 %vm793_vm2, %v6066_v5 }
 0x64b   : > { %1968 = vmatpush1.bf16.msra.mxu1 %v1962_v48  ;;  %1999 = vmatprep.mubr.bf16.mxu1 %v6619_v63 }
 0x64c   : > { %4037 = vmatprep.subr.msk.bf16.mxu1 %vm986_vm4, %v2013_v2  ;;  %v6620_v2 = vmov 0.0|0.0  }
 0x64e   : > { %v2331_v12 = vpop.xlane.xlu0 %2330 }
 0x64f   : > { %v2339_v48 = vmul.f32 0.00390625, %v2331_v12  ;;  %v4064_v12 = vcombine.low %v5943_v13, %v5935_v61 }
 0x652   : > { %v2328_v7 = vpop.xlane.xlu1 %2327  ;;  %v2334_v31 = vpop.xlane.xlu0 %2333 }
 0x653   : > { %v2338_v17 = vmul.f32 0.00390625, %v2328_v7  ;;  %v2340_v6 = vmul.f32 0.00390625, %v2334_v31  ;;  %v4065_v7 = vcombine.high %v5943_v13, %v5935_v61 }
 0x656   : > { %4036 = vmatmul.mubr.msk.bf16.vlgmr.msra.gmra.mrb[8].mxu1 %vm793_vm2, %v6077_v14  ;;  %v2337_v59 = vpop.xlane.xlu1 %2336 }
 0x657   : > { %2024 = vmatpush1.bf16.msra.mxu1 %v2018_v8  ;;  %2055 = vmatprep.mubr.bf16.mxu1 %v6619_v63  ;;  %v2341_v8 = vmul.f32 0.00390625, %v2337_v59 }
 0x658   : > { %4039 = vmatprep.subr.msk.bf16.mxu1 %vm986_vm4, %v2069_v3  ;;  %v4206_v3 = vpack.c.bf16 %v2339_v48, %v2338_v17  ;;  %v4067_v48 = vcombine.high %v5940_v38, %v5954_v11  ;;  %v4066_v17 = vcombine.low %v5940_v38, %v5954_v11  ;;  %v6121_v38 = vld [vmem:[#allocation23] sm:$0x1] }
 0x659   : > { %v4209_v18 = vpack.c.bf16 %v2341_v8, %v2340_v6 }
 0x662   : > { %4038 = vmatmul.mubr.msk.bf16.vlgmr.msra.gmra.mrb[8].mxu1 %vm793_vm2, %v6086_v37 }
 0x663   : > { %2080 = vmatpush1.bf16.msra.mxu1 %v2074_v10  ;;  %2111 = vmatprep.mubr.bf16.mxu1 %v6619_v63  ;;  %v6621_v10 = vmov 0.0  }
 0x664   : > { %4205 = vmatprep.subr.bf16.mxu1 %v6620_v2 }
 0x66e   : > { %4040 = vmatmul.mubr.msk.bf16.vlgmr.msra.gmra.mrb[8].mxu1 %vm793_vm2, %v6093_v4 }
 0x66f   : > { %4207 = vmatpush3.bf16.msra.mxu1 %v4206_v3  ;;  %4188 = vmatprep.mubr.msk.f32.mxu1 %vm5085_vm0, %v6621_v10 }
 0x670   : > { %4208 = vmatprep.subr.bf16.mxu1 %v6620_v2  ;;  %v6114_v2 = vpop.permute.xlu0 %1645 }
 0x673   : > { %4210 = vmatpush3.bf16.msra.mxu1 %v4209_v18 }
 0x674   : > { %2518 = vmatprep.subr.bf16.mxu1 %v4065_v7 }
 0x676   : > { %4189 = vmatmul.mubr.msk.f32.vlgmr.msra.gmra.mrb[12].mxu1 %vm718_vm1, %v5626_v29 }
 0x677   : > { %2519 = vmatpush1.bf16.msra.mxu1 %v4064_v12  ;;  %2550 = vmatprep.mubr.bf16.mxu1 %v6619_v63 }
 0x678   : > { %2520 = vmatprep.subr.bf16.mxu1 %v4067_v48 }
 0x67b   : > { %2521 = vmatpush1.bf16.msra.mxu1 %v4066_v17 }
 0x67e   : > { %4068 = vmatmul.mubr.msk.bf16.vlgmr.msra.gmra.mrb[16].mxu1 %vm718_vm1, %v5661_v45 }
 0x67f   : > { %3118 = vmatprep.mubr.bf16.mxu1 %v6619_v63 }
 0x741   : > { %v2113_v59 = vpop.f32.mrb[8].mxu1 }
 0x742   : > { %v4213_v31 = vadd.f32 %v2113_v59, %v6114_v2  ;;  %v2115_v6 = vpop.f32.mrb[9].mxu1 }
 0x743   : > { %v4214_v29 = vadd.f32 %v2115_v6, %v6114_v2  ;;  %v2117_v3 = vpop.f32.mrb[10].mxu1 }
 0x744   : > { %v2122_v8 = vmax.f32 %v4213_v31, 0.0  ;;  %v2118_v18 = vpop.f32.mrb[11].mxu1 }
 0x745   : > { %v2123_v10 = vmax.f32 %v4214_v29, 0.0 }
 0x746   : > { %v2124_v7 = vpack.c.bf16 %v2122_v8, %v2122_v8 }
 0x747   : > { %v2125_v12 = vpack.c.bf16 %v2123_v10, %v2123_v10 }
 0x748   : > { %v2139_v48 = vsel %vm986_vm4, %v2124_v7, 0 }
 0x749   : > { %4041 = vmatprep.subr.msk.bf16.mxu0 %vm986_vm4, %v2125_v12  ;;  %v2408_v45 = vpop.f32.mrb[12].mxu1 }
 0x74a   : > { %v2409_v17 = vadd.f32 %v2408_v45, %v5637_v33  ;;  %2145 = vmatpush1.bf16.msra.mxu0 %v2139_v48  ;;  %v4190_v11 = vpop.f32.mrb[13].mxu1 }
 0x74c   : > { %v2412_v59 = vmax.f32 %v2409_v17, 0.0 }
 0x74d   : > { %4042 = vmatmul.mubr.msk.bf16.vlgmr.msra.gmra.mrb[8].mxu0 %vm793_vm2, %v6121_v38 }
 0x74e   : > { %4191 = vmatprep.subr.mxu0 %v2412_v59  ;;  %4193 = vmatprep.mubr.msk.f32.mxu0 %vm793_vm2, %v5630_v30 }
 0x74f   : > { %4192 = vmatpush3.msra.mxu0 %v2412_v59 }
 0x751   : > { %v2552_v31 = vpop.f32.mrb[16].mxu1 }
 0x752   : > { %v2553_v6 = vadd.f32 %v2552_v31, %v5674_v50  ;;  %v2554_v29 = vpop.f32.mrb[17].mxu1 }
 0x753   : > { %v2556_v3 = vpop.f32.mrb[18].mxu1  ;;  %v2555_v11 = vadd.f32 %v2554_v29, %v5674_v50 }
 0x754   : > { %v6128_v8 = vmax.f32 %v2553_v6, 0.0  ;;  %v2557_v33 = vpop.f32.mrb[19].mxu1 }
 0x755   : > { %4194 = vmatmul.mubr.msk.f32.vlgmr.msra.gmra.mrb[2].mxu0 %vm793_vm2, %v5642_v39  ;;  %v2560_v30 = vmax.f32 %v2555_v11, 0.0 }
 0x756   : > { %2620 = vrot.lane.b32.xlu0 %v6128_v8, %s5090_s0  ;;  %2561 = vrot.lane.b32.xlu1 %v6128_v8, %s5089_s25 }
 0x757   : > { %4196 = vmatprep.mubr.msk.f32.mxu0 %vm793_vm2, %v5646_v41 }
 0x759   : > { %4197 = vmatmul.mubr.msk.f32.gmra.mrb[12].mxu0 %vm793_vm2, %v5654_v43 }
 0x75a   : > { %2679 = vrot.lane.b32.xlu0 %v6128_v8, %s5091_s24  ;;  %2563 = vrot.lane.b32.xlu1 %v2560_v30, %s5089_s25 }
 0x75b   : > { %2609 = vmatprep.mubr.bf16.mxu0 %v6619_v63 }
 0x75e   : > { %2738 = vrot.lane.b32.xlu0 %v6128_v8, %s5092_s29  ;;  %2622 = vrot.lane.b32.xlu1 %v2560_v30, %s5090_s0 }
 0x762   : > { %2850 = vrot.lane.b32.xlu0 %v6128_v8, %s5088_s27  ;;  %2681 = vrot.lane.b32.xlu1 %v2560_v30, %s5091_s24 }
 0x766   : > { %2740 = vrot.lane.b32.xlu1 %v2560_v30, %s5092_s29 }
 0x76a   : > { %2852 = vrot.lane.b32.xlu1 %v2560_v30, %s5088_s27 }
 0x7c8   : > { %v2562_v39 = vpop.permute.xlu1 %2561  ;;  %v2621_v18 = vpop.permute.xlu0 %2620 }
 0x7cc   : > { %v2564_v41 = vpop.permute.xlu1 %2563  ;;  %v2680_v3 = vpop.permute.xlu0 %2679 }
 0x7cd   : > { %v6155_v43 = vsel %vm968_vm3, %v2562_v39, %v2564_v41  ;;  %v6159_v50 = vsel %vm968_vm3, %v2564_v41, %v2562_v39 }
 0x7ce   : > { %v2567_v10 = vmul.f32 %v6159_v50, %v5716_v15  ;;  %v2568_v7 = vmul.f32 %v6155_v43, %v5720_v16 }
 0x7d0   : > { %v2569_v12 = vpack.c.bf16 %v2567_v10, %v2567_v10  ;;  %v2570_v48 = vpack.c.bf16 %v2568_v7, %v2568_v7  ;;  %v2623_v45 = vpop.permute.xlu1 %2622 }
 0x7d1   : > { %v6167_v17 = vsel %vm1045_vm5, %v2621_v18, %v2623_v45  ;;  %v6171_v59 = vsel %vm1045_vm5, %v2623_v45, %v2621_v18  ;;  %v2739_v45 = vpop.permute.xlu0 %2738 }
 0x7d2   : > { %v2626_v31 = vmul.f32 %v6171_v59, %v5739_v32  ;;  %v2627_v6 = vmul.f32 %v6167_v17, %v5742_v34  ;;  %4069 = vmatprep.subr.msk.bf16.mxu0 %vm986_vm4, %v2570_v48  ;;  %v2572_v29 = vsel %vm986_vm4, %v2569_v12, 0 }
 0x7d3   : > { %2578 = vmatpush1.bf16.msra.mxu0 %v2572_v29 }
 0x7d4   : > { %v2628_v11 = vpack.c.bf16 %v2626_v31, %v2626_v31  ;;  %v2629_v33 = vpack.c.bf16 %v2627_v6, %v2627_v6  ;;  %v2682_v39 = vpop.permute.xlu1 %2681 }
 0x7d5   : > { %v6181_v41 = vsel %vm1116_vm6, %v2680_v3, %v2682_v39  ;;  %v2684_v7 = vsel %vm1116_vm6, %v2682_v39, %v2680_v3 }
 0x7d6   : > { %v2686_v18 = vmul.f32 %v6181_v41, %v5769_v57  ;;  %4071 = vmatprep.subr.msk.bf16.mxu0 %vm986_vm4, %v2629_v33  ;;  %4070 = vmatmul.mubr.msk.bf16.vlgmr.msra.gmra.mrb[16].mxu0 %vm793_vm2, %v5744_v35  ;;  %v2631_v10 = vsel %vm986_vm4, %v2628_v11, 0  ;;  %v2685_v31 = vmul.f32 %v2684_v7, %v5766_v56 }
 0x7d7   : > { %2637 = vmatpush1.bf16.msra.mxu0 %v2631_v10  ;;  %2668 = vmatprep.mubr.bf16.mxu0 %v6619_v63  ;;  %v2798_v10 = vmul.f32 %v2560_v30, %v5806_v58 }
 0x7d8   : > { %v2688_v12 = vpack.c.bf16 %v2686_v18, %v2686_v18  ;;  %v2741_v48 = vpop.permute.xlu1 %2740  ;;  %v2687_v29 = vpack.c.bf16 %v2685_v31, %v2685_v31  ;;  %v2797_v31 = vmul.f32 %v6128_v8, %v5818_v44 }
 0x7d9   : > { %v2742_v6 = vsel %vm1187_vm7, %v2739_v45, %v2741_v48  ;;  %v2743_v33 = vsel %vm1187_vm7, %v2741_v48, %v2739_v45  ;;  %v2851_v45 = vpop.permute.xlu0 %2850 }
 0x7da   : > { %4073 = vmatprep.subr.msk.bf16.mxu0 %vm986_vm4, %v2688_v12  ;;  %v2745_v35 = vmul.f32 %v2742_v6, %v5796_v42  ;;  %v2690_v3 = vsel %vm986_vm4, %v2687_v29, 0  ;;  %v2744_v39 = vmul.f32 %v2743_v33, %v5793_v40  ;;  %v2800_v12 = vpack.c.bf16 %v2798_v10, %v2798_v10 }
 0x7db   : > { %v2799_v29 = vpack.c.bf16 %v2797_v31, %v2797_v31 }
 0x7dc   : > { %v2747_v11 = vpack.c.bf16 %v2745_v35, %v2745_v35  ;;  %v2746_v18 = vpack.c.bf16 %v2744_v39, %v2744_v39  ;;  %v2853_v48 = vpop.permute.xlu1 %2852 }
 0x7dd   : > { %v2855_v6 = vsel %vm1322_vm8, %v2853_v48, %v2851_v45  ;;  %v2802_v35 = vsel %vm986_vm4, %v2799_v29, 0 }
 0x7de   : > { %v2857_v30 = vmul.f32 %v2855_v6, %v5824_v52 }
 0x7e2   : > { %4072 = vmatmul.mubr.msk.bf16.vlgmr.msra.gmra.mrb[16].mxu0 %vm793_vm2, %v5784_v24  ;;  %v2749_v24 = vsel %vm986_vm4, %v2746_v18, 0  ;;  %v2909_v18 = vmul.f32 %v6155_v43, %v5853_v19  ;;  %v3016_v43 = vmul.f32 %v5880_v20, %v2684_v7 }
 0x7e3   : > { %2696 = vmatpush1.bf16.msra.mxu0 %v2690_v3  ;;  %2727 = vmatprep.mubr.bf16.mxu0 %v6619_v63  ;;  %v2910_v3 = vmul.f32 %v6159_v50, %v5845_v53 }
 0x7e4   : > { %4075 = vmatprep.subr.msk.bf16.mxu0 %vm986_vm4, %v2747_v11  ;;  %v2854_v11 = vsel %vm1322_vm8, %v2851_v45, %v2853_v48  ;;  %v2911_v10 = vpack.c.bf16 %v2909_v18, %v2909_v18  ;;  %v3018_v45 = vpack.c.bf16 %v3016_v43, %v3016_v43 }
 0x7e5   : > { %v2856_v8 = vmul.f32 %v2854_v11, %v5835_v27  ;;  %v2912_v39 = vpack.c.bf16 %v2910_v3, %v2910_v3 }
 0x7e7   : > { %v2858_v33 = vpack.c.bf16 %v2856_v8, %v2856_v8 }
 0x7ee   : > { %4074 = vmatmul.mubr.msk.bf16.vlgmr.msra.gmra.mrb[16].mxu0 %vm793_vm2, %v5811_v25  ;;  %v2859_v25 = vpack.c.bf16 %v2857_v30, %v2857_v30 }
 0x7ef   : > { %2755 = vmatpush1.bf16.msra.mxu0 %v2749_v24  ;;  %2786 = vmatprep.mubr.bf16.mxu0 %v6619_v63  ;;  %v2963_v24 = vmul.f32 %v6171_v59, %v5864_v36 }
 0x7f0   : > { %4077 = vmatprep.subr.msk.bf16.mxu0 %vm986_vm4, %v2800_v12  ;;  %v2962_v12 = vmul.f32 %v6167_v17, %v5871_v26  ;;  %v3015_v17 = vmul.f32 %v5889_v21, %v6181_v41 }
 0x7f1   : > { %v2965_v50 = vpack.c.bf16 %v2963_v24, %v2963_v24 }
 0x7f2   : > { %v2964_v48 = vpack.c.bf16 %v2962_v12, %v2962_v12  ;;  %v3017_v7 = vpack.c.bf16 %v3015_v17, %v3015_v17 }
 0x7f4   : > { %v2967_v59 = vsel %vm986_vm4, %v2964_v48, 0  ;;  %v6623_v48 = vld [vmem:[#allocation40_spill] sm:$0xff] }
 0x7fa   : > { %4076 = vmatmul.mubr.msk.bf16.vlgmr.msra.gmra.mrb[16].mxu0 %vm793_vm2, %v5831_v22  ;;  %v2861_v22 = vsel %vm986_vm4, %v2858_v33, 0 }
 0x7fb   : > { %2808 = vmatpush1.bf16.msra.mxu0 %v2802_v35  ;;  %2839 = vmatprep.mubr.bf16.mxu0 %v6619_v63 }
 0x7fc   : > { %4079 = vmatprep.subr.msk.bf16.mxu0 %vm986_vm4, %v2859_v25 }
 0x806   : > { %4078 = vmatmul.mubr.msk.bf16.vlgmr.msra.gmra.mrb[16].mxu0 %vm793_vm2, %v5850_v9  ;;  %v2914_v9 = vsel %vm986_vm4, %v2911_v10, 0  ;;  %v664_v10 = vld [vmem:[#allocation12 + $0x10] sm:$0xff] }
 0x807   : > { %2867 = vmatpush1.bf16.msra.mxu0 %v2861_v22  ;;  %2898 = vmatprep.mubr.bf16.mxu0 %v6619_v63  ;;  %v663_v22 = vld [vmem:[#allocation12 + $0x8] sm:$0xff] }
 0x808   : > { %4081 = vmatprep.subr.msk.bf16.mxu0 %vm986_vm4, %v2912_v39  ;;  %v878_v24 = vadd.f32 %v5666_v46, %v663_v22 }
 0x812   : > { %4080 = vmatmul.mubr.msk.bf16.vlgmr.msra.gmra.mrb[16].mxu0 %vm793_vm2, %v5868_v55 }
 0x813   : > { %2920 = vmatpush1.bf16.msra.mxu0 %v2914_v9  ;;  %2951 = vmatprep.mubr.bf16.mxu0 %v6619_v63  ;;  %v6622_v9 = vld [vmem:[#allocation41_spill] sm:$0xff] }
 0x814   : > { %4083 = vmatprep.subr.msk.bf16.mxu0 %vm986_vm4, %v2965_v50  ;;  %v665_v50 = vld [vmem:[#allocation12 + $0x18] sm:$0xff]  ;;  %v883_v12 = vadd.f32 %v6622_v9, %v664_v10 }
 0x815   : > { %v888_v43 = vadd.f32 %v6623_v48, %v665_v50 }
 0x81e   : > { %4082 = vmatmul.mubr.msk.bf16.vlgmr.msra.gmra.mrb[16].mxu0 %vm793_vm2, %v5884_v51  ;;  %v3020_v51 = vsel %vm986_vm4, %v3017_v7, 0 }
 0x81f   : > { %2973 = vmatpush1.bf16.msra.mxu0 %v2967_v59  ;;  %3004 = vmatprep.mubr.bf16.mxu0 %v6619_v63 }
 0x820   : > { %v6247_v55 = vpop.f32.mrb[8].mxu0  ;;  %4085 = vmatprep.subr.msk.bf16.mxu0 %vm986_vm4, %v3018_v45 }
 0x821   : > { %v6250_v31 = vpop.f32.mrb[9].mxu0 }
 0x822   : > { %v2182_v6 = vpop.f32.mrb[10].mxu0 }
 0x823   : > { %v2183_v20 = vpop.f32.mrb[11].mxu0 }
 0x828   : > { %v4195_v30 = vpop.f32.mrb[2].mxu0 }
 0x829   : > { %v2479_v29 = vpop.f32.mrb[3].mxu0  ;;  %v2485_v59 = vadd.f32 %v4195_v30, %v663_v22 }
 0x82a   : > { %4084 = vmatmul.mubr.msk.bf16.vlgmr.msra.gmra.mrb[16].mxu0 %vm793_vm2, %v5895_v0 }
 0x82b   : > { %3026 = vmatpush1.bf16.msra.mxu0 %v3020_v51  ;;  %3057 = vmatprep.mubr.bf16.mxu0 %v6619_v63 }
 0x82c   : > { %v4198_v25 = vpop.f32.mrb[12].mxu0 }
 0x82d   : > { %v2489_v35 = vpop.f32.mrb[13].mxu0 }
 0x82e   : > { %v2490_v6 = vadd.f32 %v2489_v35, %v664_v10 }
 0x836   : > { %4086 = vmatmul.mubr.msk.bf16.vlgmr.msra.gmra.mrb[16].mxu0 %vm793_vm2, %v5901_v54  ;;  %v662_v54 = vld [vmem:[#allocation12] sm:$0xff] }
 0x837   : > { %3619 = vmatprep.mubr.bf16.mxu0 %v6619_v63  ;;  %v873_v18 = vadd.f32 %v5668_v47, %v662_v54  ;;  %v2480_v45 = vadd.f32 %v2479_v29, %v662_v54  ;;  %v2495_v47 = vadd.f32 %v4198_v25, %v665_v50 }
 0x909   : > { %v3059_v21 = vpop.f32.mrb[16].mxu0 }
 0x90a   : > { %v4215_v41 = vadd.f32 %v3059_v21, %v5906_v28  ;;  %v3061_v11 = vpop.f32.mrb[17].mxu0 }
 0x90b   : > { %v4216_v8 = vadd.f32 %v3061_v11, %v5906_v28  ;;  %v3063_v3 = vpop.f32.mrb[18].mxu0  ;;  %v689_v28 = vld [vmem:[#allocation2] sm:$0x1] }
 0x90c   : > { %v6263_v0 = vmax.f32 %v4215_v41, 0.0  ;;  %v3064_v33 = vpop.f32.mrb[19].mxu0 }
 0x90d   : > { %v6265_v39 = vmax.f32 %v4216_v8, 0.0 }
 0x90e   : > { %3070 = vrot.lane.b32.xlu0 %v6263_v0, %s5089_s25 }
 0x90f   : > { %3072 = vrot.lane.b32.xlu1 %v6265_v39, %s5089_s25  ;;  %s4973_s25 = scalar_lea.vmem %s6464_s21, 1024 }
 0x910   : > { %p4974_p13 = scmp.ne.s32.totalorder %s6464_s21, %s4973_s25 }
 0x912   : > { %3129 = vrot.lane.b32.xlu0 %v6263_v0, %s5090_s0  ;;  %p4975_p7 = pnand %p4974_p13, %p6649_p8 }
 0x913   : > { %3131 = vrot.lane.b32.xlu1 %v6265_v39, %s5090_s0  ;;  %s5093_s0 = smov [#allocation24]  }
 0x914   : > { %p4976_p9 = pneg %p4975_p7 }
 0x916   : > { %3188 = vrot.lane.b32.xlu0 %v6263_v0, %s5091_s24 }
 0x917   : > { %3190 = vrot.lane.b32.xlu1 %v6265_v39, %s5091_s24  ;;  %s4977_s24 = sshll.u32 %s5093_s0, 4  ;;  %s4978_s24 = int_to_ptr.vmem [resolvable:$false] %s4977_s24 }
 0x918   : > { %p4980_p4 = scmp.lt.s32.totalorder %s6464_s21, %s4978_s24 }
 0x91a   : > { %3247 = vrot.lane.b32.xlu0 %v6263_v0, %s5092_s29 }
 0x91b   : > { %3249 = vrot.lane.b32.xlu1 %v6265_v39, %s5092_s29  ;;  %s4979_s29 = scalar_lea.vmem %s4978_s24, 2048 }
 0x91c   : > { %p4981_p3 = scmp.lt.s32.totalorder %s4979_s29, %s4973_s25 }
 0x91e   : > { %3359 = vrot.lane.b32.xlu0 %v6263_v0, %s5088_s27  ;;  %p4982_p0 = por %p4981_p3, %p4980_p4 }
 0x91f   : > { %3361 = vrot.lane.b32.xlu1 %v6265_v39, %s5088_s27  ;;  %s6462_s27 = scalar_lea.hbm %s6648_s3, %s4140_s13 }
 0x920   : > { %p4983_p2 = pnand %p4982_p0, %p4976_p9 }
 0x922   : > { %2128 = vperm.xlu0 %4531, %v689_v28  }
 0x923   : > { %2187 = vperm.xlu1 %4532, %v873_v18  }
 0x926   : > { %2192 = vperm.xlu0 %4531, %v878_v24  }
 0x927   : > { %2197 = vperm.xlu1 %4532, %v883_v12  }
 0x92a   : > { %2202 = vperm.xlu0 %4531, %v888_v43  }
 0x92b   : > { %3630 = vperm.xlu1 %4532, %v2480_v45  }
 0x92e   : > { %3635 = vperm.xlu0 %4531, %v2485_v59  }
 0x92f   : > { %3640 = vperm.xlu1 %4532, %v2490_v6  }
 0x932   : > { %3645 = vperm.xlu0 %4531, %v2495_v47  }
 0x980   : > { %v3071_v17 = vpop.permute.xlu0 %3070 }
 0x981   : > { %v3073_v20 = vpop.permute.xlu1 %3072 }
 0x982   : > { %v6293_v46 = vsel %vm968_vm3, %v3071_v17, %v3073_v20  ;;  %v6297_v7 = vsel %vm968_vm3, %v3073_v20, %v3071_v17 }
 0x983   : > { %v3076_v29 = vmul.f32 %v6297_v7, %v5716_v15  ;;  %v3077_v30 = vmul.f32 %v6293_v46, %v5720_v16 }
 0x984   : > { %v3130_v51 = vpop.permute.xlu0 %3129 }
 0x985   : > { %v3078_v35 = vpack.c.bf16 %v3076_v29, %v3076_v29  ;;  %v3079_v25 = vpack.c.bf16 %v3077_v30, %v3077_v30  ;;  %v3132_v21 = vpop.permute.xlu1 %3131 }
 0x986   : > { %v6305_v41 = vsel %vm1045_vm5, %v3130_v51, %v3132_v21  ;;  %v6309_v11 = vsel %vm1045_vm5, %v3132_v21, %v3130_v51 }
 0x987   : > { %v3135_v8 = vmul.f32 %v6309_v11, %v5739_v32  ;;  %v3136_v15 = vmul.f32 %v6305_v41, %v5742_v34  ;;  %4087 = vmatprep.subr.msk.bf16.mxu1 %vm986_vm4, %v3079_v25  ;;  %v3081_v3 = vsel %vm986_vm4, %v3078_v35, 0  ;;  %v6624_v32 = vld [vmem:[#allocation45_spill] sm:$0xff] }
 0x988   : > { %v3189_v16 = vpop.permute.xlu0 %3188  ;;  %3087 = vmatpush1.bf16.msra.mxu1 %v3081_v3 }
 0x989   : > { %v3137_v33 = vpack.c.bf16 %v3135_v8, %v3135_v8  ;;  %v3138_v54 = vpack.c.bf16 %v3136_v15, %v3136_v15  ;;  %v3191_v28 = vpop.permute.xlu1 %3190 }
 0x98a   : > { %v6319_v22 = vsel %vm1116_vm6, %v3189_v16, %v3191_v28  ;;  %v6329_v10 = vsel %vm1116_vm6, %v3191_v28, %v3189_v16 }
 0x98b   : > { %v3195_v18 = vmul.f32 %v6319_v22, %v5769_v57  ;;  %4089 = vmatprep.subr.msk.bf16.mxu1 %vm986_vm4, %v3138_v54  ;;  %4088 = vmatmul.mubr.msk.bf16.vlgmr.msra.gmra.mrb[20].mxu1 %vm793_vm2, %v6624_v32  ;;  %v3140_v34 = vsel %vm986_vm4, %v3137_v33, 0  ;;  %v3194_v57 = vmul.f32 %v6329_v10, %v5766_v56 }
 0x98c   : > { %3146 = vmatpush1.bf16.msra.mxu1 %v3140_v34  ;;  %v3248_v50 = vpop.permute.xlu0 %3247  ;;  %3177 = vmatprep.mubr.bf16.mxu1 %v6619_v63 }
 0x98d   : > { %v3197_v24 = vpack.c.bf16 %v3195_v18, %v3195_v18  ;;  %v3250_v9 = vpop.permute.xlu1 %3249  ;;  %v3196_v48 = vpack.c.bf16 %v3194_v57, %v3194_v57 }
 0x98e   : > { %v3251_v12 = vsel %vm1187_vm7, %v3248_v50, %v3250_v9  ;;  %v3252_v6 = vsel %vm1187_vm7, %v3250_v9, %v3248_v50 }
 0x98f   : > { %4091 = vmatprep.subr.msk.bf16.mxu1 %vm986_vm4, %v3197_v24  ;;  %v3254_v43 = vmul.f32 %v3251_v12, %v5796_v42  ;;  %v3199_v59 = vsel %vm986_vm4, %v3196_v48, 0  ;;  %v3253_v56 = vmul.f32 %v3252_v6, %v5793_v40  ;;  %v3307_v42 = vmul.f32 %v6265_v39, %v5806_v58 }
 0x990   : > { %v3360_v47 = vpop.permute.xlu0 %3359 }
 0x991   : > { %v3256_v45 = vpack.c.bf16 %v3254_v43, %v3254_v43  ;;  %v3362_v17 = vpop.permute.xlu1 %3361  ;;  %v3255_v20 = vpack.c.bf16 %v3253_v56, %v3253_v56  ;;  %v3309_v21 = vpack.c.bf16 %v3307_v42, %v3307_v42 }
 0x992   : > { %v3364_v33 = vsel %vm1322_vm8, %v3362_v17, %v3360_v47  ;;  %v3363_v56 = vsel %vm1322_vm8, %v3360_v47, %v3362_v17 }
 0x993   : > { %v3258_v40 = vsel %vm986_vm4, %v3255_v20, 0  ;;  %v3366_v12 = vmul.f32 %v3364_v33, %v5824_v52  ;;  %v3365_v52 = vmul.f32 %v3363_v56, %v5835_v27 }
 0x997   : > { %4090 = vmatmul.mubr.msk.bf16.vlgmr.msra.gmra.mrb[20].mxu1 %vm793_vm2, %v6019_v49  ;;  %v6625_v49 = vld [vmem:[#allocation42_spill] sm:$0xff] }
 0x998   : > { %3205 = vmatpush1.bf16.msra.mxu1 %v3199_v59  ;;  %3236 = vmatprep.mubr.bf16.mxu1 %v6619_v63  ;;  %v3368_v59 = vpack.c.bf16 %v3366_v12, %v3366_v12 }
 0x999   : > { %4093 = vmatprep.subr.msk.bf16.mxu1 %vm986_vm4, %v3256_v45 }
 0x9a1   : > { %v2129_v29 = vpop.permute.xlu0 %2128 }
 0x9a2   : > { %v6349_v30 = vrot.slane %v2129_v29, %v6625_v49  ;;  %v2188_v51 = vpop.permute.xlu1 %2187 }
 0x9a3   : > { %4092 = vmatmul.mubr.msk.bf16.vlgmr.msra.gmra.mrb[20].mxu1 %vm793_vm2, %v6031_v1 }
 0x9a4   : > { %v2179_v35 = vadd.f32 %v6247_v55, %v6349_v30  ;;  %v2181_v25 = vadd.f32 %v6250_v31, %v6349_v30  ;;  %3264 = vmatpush1.bf16.msra.mxu1 %v3258_v40  ;;  %3295 = vmatprep.mubr.bf16.mxu1 %v6619_v63  ;;  %v3306_v31 = vmul.f32 %v6263_v0, %v5818_v44 }
 0x9a5   : > { %v2193_v8 = vpop.permute.xlu0 %2192  ;;  %4095 = vmatprep.subr.msk.bf16.mxu1 %vm986_vm4, %v3309_v21 }
 0x9a6   : > { %v2208_v58 = vrot.slane %v2179_v35, %v6625_v49  ;;  %v2212_v39 = vrot.slane %v2181_v25, %v6625_v49  ;;  %v2198_v55 = vpop.permute.xlu1 %2197  ;;  %v3308_v0 = vpack.c.bf16 %v3306_v31, %v3306_v31  ;;  %v3367_v35 = vpack.c.bf16 %v3365_v52, %v3365_v52 }
 0x9a8   : > { %v2213_v15 = vmul.f32 %v2208_v58, %v2188_v51  ;;  %v2214_v16 = vmul.f32 %v2212_v39, %v2188_v51  ;;  %v2215_v1 = vmul.f32 %v2208_v58, %v2193_v8  ;;  %v2216_v3 = vmul.f32 %v2212_v39, %v2193_v8 }
 0x9a9   : > { %v2217_v54 = vmul.f32 %v2208_v58, %v2198_v55  ;;  %v2218_v28 = vmul.f32 %v2212_v39, %v2198_v55  ;;  %v2203_v18 = vpop.permute.xlu0 %2202  ;;  %v3311_v6 = vsel %vm986_vm4, %v3308_v0, 0  ;;  %v6629_v0 = vld [vmem:[#allocation39_spill] sm:$0xff] }
 0x9aa   : > { %v4043_v32 = vmul.f32 -1.442695, %v2213_v15  ;;  %v4044_v34 = vmul.f32 -1.442695, %v2214_v16  ;;  %v4045_v24 = vmul.f32 -1.442695, %v2215_v1  ;;  %v2219_v50 = vmul.f32 %v2208_v58, %v2203_v18 }
 0x9ab   : > { %v4046_v9 = vmul.f32 -1.442695, %v2216_v3  ;;  %v2220_v57 = vmul.f32 %v2212_v39, %v2203_v18  ;;  %v4047_v44 = vmul.f32 -1.442695, %v2217_v54  ;;  %v4048_v48 = vmul.f32 -1.442695, %v2218_v28 }
 0x9ac   : > { %4541 = vpow2.f32 %v4043_v32  ;;  %v4049_v43 = vmul.f32 -1.442695, %v2219_v50  ;;  %v3418_v15 = vmul.f32 %v6293_v46, %v5853_v19  ;;  %v3472_v3 = vmul.f32 %v6309_v11, %v5864_v36  ;;  %v6626_v32 = vld [vmem:[#allocation37_spill] sm:$0xff] }
 0x9ad   : > { %4543 = vpow2.f32 %v4044_v34  ;;  %v4050_v45 = vmul.f32 -1.442695, %v2220_v57  ;;  %v6627_v34 = vunpack.c.l.bf16 %v6626_v32  ;;  %v6628_v57 = vunpack.c.h.bf16 %v6626_v32 }
 0x9ae   : > { %4545 = vpow2.f32 %v4045_v24 }
 0x9af   : > { %4547 = vpow2.f32 %v4046_v9  ;;  %4094 = vmatmul.mubr.msk.bf16.vlgmr.msra.gmra.mrb[20].mxu1 %vm793_vm2, %v6043_v60  ;;  %v3419_v60 = vmul.f32 %v6297_v7, %v5845_v53  ;;  %v3370_v53 = vsel %vm986_vm4, %v3367_v35, 0 }
 0x9b0   : > { %4549 = vpow2.f32 %v4047_v44  ;;  %3317 = vmatpush1.bf16.msra.mxu1 %v3311_v6  ;;  %3348 = vmatprep.mubr.bf16.mxu1 %v6619_v63  ;;  %v3474_v44 = vpack.c.bf16 %v3472_v3, %v3472_v3  ;;  %v6631_v6 = vunpack.c.h.bf16 %v6629_v0 }
 0x9b1   : > { %4551 = vpow2.f32 %v4048_v48  ;;  %4097 = vmatprep.subr.msk.bf16.mxu1 %vm986_vm4, %v3368_v59  ;;  %v3421_v27 = vpack.c.bf16 %v3419_v60, %v3419_v60  ;;  %v6630_v48 = vunpack.c.l.bf16 %v6629_v0 }
 0x9b2   : > { %4553 = vpow2.f32 %v4049_v43 }
 0x9b3   : > { %4555 = vpow2.f32 %v4050_v45 }
 0x9b6   : > { %v4542_v20 = vpop.eup %4541 }
 0x9b7   : > { %v4544_v42 = vpop.eup %4543  ;;  %v2245_v29 = vadd.f32 1.0, %v4542_v20 }
 0x9b8   : > { %v4546_v51 = vpop.eup %4545  ;;  %v2246_v62 = vadd.f32 1.0, %v4544_v42  ;;  %v6632_v42 = vld [vmem:[#allocation36_spill] sm:$0xff] }
 0x9b9   : > { %v4548_v47 = vpop.eup %4547  ;;  %4557 = vrcp.f32 %v2245_v29  ;;  %v2247_v17 = vadd.f32 1.0, %v4546_v51  ;;  %v6633_v29 = vunpack.c.l.bf16 %v6632_v42  ;;  %v6634_v35 = vunpack.c.h.bf16 %v6632_v42 }
 0x9ba   : > { %v4550_v25 = vpop.eup %4549  ;;  %4559 = vrcp.f32 %v2246_v62  ;;  %v2248_v40 = vadd.f32 1.0, %v4548_v47 }
 0x9bb   : > { %v4552_v21 = vpop.eup %4551  ;;  %4561 = vrcp.f32 %v2247_v17  ;;  %v2249_v8 = vadd.f32 1.0, %v4550_v25  ;;  %4096 = vmatmul.mubr.msk.bf16.vlgmr.msra.gmra.mrb[20].mxu1 %vm793_vm2, %v6055_v23  ;;  %v3420_v23 = vpack.c.bf16 %v3418_v15, %v3418_v15  ;;  %v3471_v17 = vmul.f32 %v6305_v41, %v5871_v26  ;;  %v6635_v25 = vld [vmem:[#allocation38_spill] sm:$0xff]  ;;  %v4606_v41 = vld [vmem:[#allocation6 + $0x10] ss:$0 sm:$0xff] }
 0x9bc   : > { %v4554_v58 = vpop.eup %4553  ;;  %4563 = vrcp.f32 %v2248_v40  ;;  %v2250_v39 = vadd.f32 1.0, %v4552_v21  ;;  %3376 = vmatpush1.bf16.msra.mxu1 %v3370_v53  ;;  %3407 = vmatprep.mubr.bf16.mxu1 %v6619_v63  ;;  %v6636_v40 = vunpack.c.l.bf16 %v6635_v25  ;;  %v3524_v15 = vmul.f32 %v4606_v41, %v6319_v22 }
 0x9bd   : > { %v4556_v7 = vpop.eup %4555  ;;  %4565 = vrcp.f32 %v2249_v8  ;;  %v2251_v55 = vadd.f32 1.0, %v4554_v58  ;;  %4099 = vmatprep.subr.msk.bf16.mxu1 %vm986_vm4, %v3421_v27  ;;  %v3423_v11 = vsel %vm986_vm4, %v3420_v23, 0  ;;  %v6637_v58 = vunpack.c.h.bf16 %v6635_v25 }
 0x9be   : > { %4567 = vrcp.f32 %v2250_v39  ;;  %v2252_v31 = vadd.f32 1.0, %v4556_v7  ;;  %v3473_v53 = vpack.c.bf16 %v3471_v17, %v3471_v17  ;;  %v4605_v7 = vld [vmem:[#allocation6 + $0x18] ss:$0 sm:$0xff] }
 0x9bf   : > { %4569 = vrcp.f32 %v2251_v55  ;;  %v3525_v55 = vmul.f32 %v4605_v7, %v6329_v10 }
 0x9c0   : > { %4571 = vrcp.f32 %v2252_v31  ;;  %v3476_v26 = vsel %vm986_vm4, %v3473_v53, 0 }
 0x9c1   : > { %v3527_v31 = vpack.c.bf16 %v3525_v55, %v3525_v55 }
 0x9c3   : > { %v4558_v16 = vpop.eup %4557 }
 0x9c4   : > { %v4560_v1 = vpop.eup %4559  ;;  %v2269_v33 = vadd.f32 1.0, %v4558_v16  ;;  %v3526_v16 = vpack.c.bf16 %v3524_v15, %v3524_v15 }
 0x9c5   : > { %v4562_v54 = vpop.eup %4561  ;;  %v2270_v28 = vadd.f32 1.0, %v4560_v1 }
 0x9c6   : > { %v4564_v18 = vpop.eup %4563  ;;  %v2277_v24 = vmul.f32 %v2269_v33, %v6627_v34  ;;  %v2271_v50 = vadd.f32 1.0, %v4562_v54  ;;  %v3529_v10 = vsel %vm986_vm4, %v3526_v16, 0 }
 0x9c7   : > { %v4566_v9 = vpop.eup %4565  ;;  %v2278_v12 = vmul.f32 %v2270_v28, %v6628_v57  ;;  %v2272_v19 = vadd.f32 1.0, %v4564_v18  ;;  %4098 = vmatmul.mubr.msk.bf16.vlgmr.msra.gmra.mrb[20].mxu1 %vm793_vm2, %v6066_v5 }
 0x9c8   : > { %v4568_v46 = vpop.eup %4567  ;;  %v2279_v43 = vmul.f32 %v2271_v50, %v6630_v48  ;;  %v2273_v36 = vadd.f32 1.0, %v4566_v9  ;;  %3429 = vmatpush1.bf16.msra.mxu1 %v3423_v11  ;;  %3460 = vmatprep.mubr.bf16.mxu1 %v6619_v63 }
 0x9c9   : > { %v4570_v45 = vpop.eup %4569  ;;  %v4131_v59 = vpack.c.bf16 %v2278_v12, %v2277_v24  ;;  %v2280_v56 = vmul.f32 %v2272_v19, %v6631_v6  ;;  %v2274_v52 = vadd.f32 1.0, %v4568_v46  ;;  %4101 = vmatprep.subr.msk.bf16.mxu1 %vm986_vm4, %v3474_v44 }
 0x9ca   : > { %v4572_v20 = vpop.eup %4571  ;;  %v2281_v51 = vmul.f32 %v2273_v36, %v6633_v29  ;;  %v2275_v60 = vadd.f32 1.0, %v4570_v45 }
 0x9cb   : > { %2309 = vst [vmem:[%s6403_s30] sm:$0xff] %v4131_v59  ;;  %v4132_v5 = vpack.c.bf16 %v2280_v56, %v2279_v43  ;;  %v2282_v62 = vmul.f32 %v2274_v52, %v6634_v35  ;;  %v2276_v47 = vadd.f32 1.0, %v4572_v20 }
 0x9cc   : > { %v2283_v21 = vmul.f32 %v2275_v60, %v6636_v40 }
 0x9cd   : > { %2310 = vst [vmem:[%s6403_s30 + $0x8] sm:$0xff] %v4132_v5  ;;  %v4133_v8 = vpack.c.bf16 %v2282_v62, %v2281_v51  ;;  %v2284_v27 = vmul.f32 %v2276_v47, %v6637_v58 }
 0x9cf   : > { %2311 = vst [vmem:[%s6403_s30 + $0x10] sm:$0xff] %v4133_v8  ;;  %v4134_v39 = vpack.c.bf16 %v2284_v27, %v2283_v21 }
 0x9d1   : > { %2312 = vst [vmem:[%s6403_s30 + $0x18] sm:$0xff] %v4134_v39 }
 0x9d3   : > { %4100 = vmatmul.mubr.msk.bf16.vlgmr.msra.gmra.mrb[20].mxu1 %vm793_vm2, %v6077_v14 }
 0x9d4   : > { %3482 = vmatpush1.bf16.msra.mxu1 %v3476_v26  ;;  %3513 = vmatprep.mubr.bf16.mxu1 %v6619_v63 }
 0x9d5   : > { %4103 = vmatprep.subr.msk.bf16.mxu1 %vm986_vm4, %v3527_v31 }
 0x9df   : > { %4102 = vmatmul.mubr.msk.bf16.vlgmr.msra.gmra.mrb[20].mxu1 %vm793_vm2, %v6086_v37 }
 0x9e0   : > { %3535 = vmatpush1.bf16.msra.mxu1 %v3529_v10  ;;  %3566 = vmatprep.mubr.bf16.mxu1 %v6619_v63  ;;  %v3631_v63 = vpop.permute.xlu1 %3630 }
 0x9e4   : > { %v3641_v19 = vpop.permute.xlu1 %3640 }
 0x9eb   : > { %4104 = vmatmul.mubr.msk.bf16.vlgmr.msra.gmra.mrb[20].mxu1 %vm793_vm2, %v6093_v4  ;;  %v3636_v4 = vpop.permute.xlu0 %3635 }
 0x9ef   : > { %v3646_v46 = vpop.permute.xlu0 %3645 }
 0xabe   : > { %v3568_v14 = vpop.f32.mrb[20].mxu1 }
 0xabf   : > { %v4217_v1 = vadd.f32 %v3568_v14, %v6114_v2  ;;  %v3570_v23 = vpop.f32.mrb[21].mxu1 }
 0xac0   : > { %v4218_v3 = vadd.f32 %v3570_v23, %v6114_v2  ;;  %v3572_v33 = vpop.f32.mrb[22].mxu1 }
 0xac1   : > { %v3577_v22 = vmax.f32 %v4217_v1, 0.0  ;;  %v3573_v54 = vpop.f32.mrb[23].mxu1 }
 0xac2   : > { %v3578_v28 = vmax.f32 %v4218_v3, 0.0  ;;  %v6638_v3 = vunpack.c.l.bf16 %v5943_v13 }
 0xac3   : > { %v3579_v18 = vpack.c.bf16 %v3577_v22, %v3577_v22 }
 0xac4   : > { %v3580_v37 = vpack.c.bf16 %v3578_v28, %v3578_v28  ;;  %v6639_v28 = vunpack.c.l.bf16 %v5935_v61 }
 0xac5   : > { %v3582_v32 = vsel %vm986_vm4, %v3579_v18, 0 }
 0xac6   : > { %4105 = vmatprep.subr.msk.bf16.mxu0 %vm986_vm4, %v3580_v37 }
 0xac7   : > { %3588 = vmatpush1.bf16.msra.mxu0 %v3582_v32 }
 0xaca   : > { %4106 = vmatmul.mubr.msk.bf16.vlgmr.msra.gmra.mrb[20].mxu0 %vm793_vm2, %v6121_v38 }
 0xb9d   : > { %v3621_v34 = vpop.f32.mrb[20].mxu0 }
 0xb9e   : > { %v3622_v24 = vadd.f32 %v3621_v34, %v6349_v30  ;;  %v3623_v2 = vpop.f32.mrb[21].mxu0 }
 0xb9f   : > { %v3624_v50 = vadd.f32 %v3623_v2, %v6349_v30  ;;  %v3625_v9 = vpop.f32.mrb[22].mxu0  ;;  %v6642_v2 = vunpack.c.h.bf16 %v5943_v13 }
 0xba0   : > { %v3651_v57 = vrot.slane %v3622_v24, %v6625_v49  ;;  %v3626_v12 = vpop.f32.mrb[23].mxu0  ;;  %v6643_v9 = vld [vmem:[#allocation44_spill] sm:$0xff] }
 0xba1   : > { %v3655_v44 = vrot.slane %v3624_v50, %v6625_v49  ;;  %v6647_v13 = vunpack.c.h.bf16 %v6643_v9 }
 0xba2   : > { %v3656_v0 = vmul.f32 %v3651_v57, %v3631_v63  ;;  %v3658_v48 = vmul.f32 %v3651_v57, %v3636_v4  ;;  %v3660_v43 = vmul.f32 %v3651_v57, %v3641_v19  ;;  %v3662_v38 = vmul.f32 %v3651_v57, %v3646_v46 }
 0xba3   : > { %v3657_v36 = vmul.f32 %v3655_v44, %v3631_v63  ;;  %v3659_v11 = vmul.f32 %v3655_v44, %v3636_v4  ;;  %v3661_v56 = vmul.f32 %v3655_v44, %v3641_v19  ;;  %v3663_v30 = vmul.f32 %v3655_v44, %v3646_v46  ;;  %v6640_v63 = vld [vmem:[#allocation43_spill] sm:$0xff] }
 0xba4   : > { %v4107_v45 = vmul.f32 -1.442695, %v3656_v0  ;;  %v4109_v59 = vmul.f32 -1.442695, %v3658_v48  ;;  %v4111_v6 = vmul.f32 -1.442695, %v3660_v43  ;;  %v6641_v4 = vunpack.c.l.bf16 %v6640_v63 }
 0xba5   : > { %v4113_v52 = vmul.f32 -1.442695, %v3662_v38  ;;  %v4108_v20 = vmul.f32 -1.442695, %v3657_v36  ;;  %v4110_v42 = vmul.f32 -1.442695, %v3659_v11  ;;  %v6644_v57 = vunpack.c.l.bf16 %v6643_v9 }
 0xba6   : > { %4573 = vpow2.f32 %v4107_v45  ;;  %v4112_v29 = vmul.f32 -1.442695, %v3661_v56  ;;  %v4114_v49 = vmul.f32 -1.442695, %v3663_v30  ;;  %v6645_v46 = vunpack.c.h.bf16 %v5935_v61 }
 0xba7   : > { %4575 = vpow2.f32 %v4109_v59  ;;  %v6646_v0 = vunpack.c.h.bf16 %v6640_v63 }
 0xba8   : > { %4577 = vpow2.f32 %v4111_v6 }
 0xba9   : > { %4579 = vpow2.f32 %v4113_v52 }
 0xbaa   : > { %4581 = vpow2.f32 %v4108_v20 }
 0xbab   : > { %4583 = vpow2.f32 %v4110_v42 }
 0xbac   : > { %4585 = vpow2.f32 %v4112_v29 }
 0xbad   : > { %4587 = vpow2.f32 %v4114_v49 }
 0xbb0   : > { %v4574_v51 = vpop.eup %4573 }
 0xbb1   : > { %v4576_v60 = vpop.eup %4575  ;;  %v3688_v5 = vadd.f32 1.0, %v4574_v51 }
 0xbb2   : > { %v4578_v35 = vpop.eup %4577  ;;  %v3690_v62 = vadd.f32 1.0, %v4576_v60 }
 0xbb3   : > { %v4580_v47 = vpop.eup %4579  ;;  %v3692_v17 = vadd.f32 1.0, %v4578_v35  ;;  %4589 = vrcp.f32 %v3688_v5 }
 0xbb4   : > { %v4582_v25 = vpop.eup %4581  ;;  %v3694_v40 = vadd.f32 1.0, %v4580_v47  ;;  %4591 = vrcp.f32 %v3690_v62 }
 0xbb5   : > { %v4584_v21 = vpop.eup %4583  ;;  %4593 = vrcp.f32 %v3692_v17  ;;  %v3689_v8 = vadd.f32 1.0, %v4582_v25 }
 0xbb6   : > { %v4586_v58 = vpop.eup %4585  ;;  %4595 = vrcp.f32 %v3694_v40  ;;  %v3691_v27 = vadd.f32 1.0, %v4584_v21 }
 0xbb7   : > { %v4588_v39 = vpop.eup %4587  ;;  %v3693_v53 = vadd.f32 1.0, %v4586_v58  ;;  %4597 = vrcp.f32 %v3689_v8 }
 0xbb8   : > { %v3695_v7 = vadd.f32 1.0, %v4588_v39  ;;  %4599 = vrcp.f32 %v3691_v27 }
 0xbb9   : > { %4601 = vrcp.f32 %v3693_v53 }
 0xbba   : > { %4603 = vrcp.f32 %v3695_v7 }
 0xbbd   : > { %v4590_v55 = vpop.eup %4589 }
 0xbbe   : > { %v4592_v31 = vpop.eup %4591  ;;  %v3712_v26 = vadd.f32 1.0, %v4590_v55 }
 0xbbf   : > { %v4594_v41 = vpop.eup %4593  ;;  %v3714_v15 = vadd.f32 1.0, %v4592_v31 }
 0xbc0   : > { %v4596_v16 = vpop.eup %4595  ;;  %v3716_v10 = vadd.f32 1.0, %v4594_v41  ;;  %v3720_v33 = vmul.f32 %v3712_v26, %v6638_v3 }
 0xbc1   : > { %v4598_v14 = vpop.eup %4597  ;;  %v3718_v1 = vadd.f32 1.0, %v4596_v16  ;;  %v3722_v18 = vmul.f32 %v3714_v15, %v6639_v28 }
 0xbc2   : > { %v4600_v23 = vpop.eup %4599  ;;  %v3713_v22 = vadd.f32 1.0, %v4598_v14  ;;  %v3724_v34 = vmul.f32 %v3716_v10, %v6641_v4 }
 0xbc3   : > { %v4602_v54 = vpop.eup %4601  ;;  %v3715_v37 = vadd.f32 1.0, %v4600_v23  ;;  %v3726_v12 = vmul.f32 %v3718_v1, %v6644_v57 }
 0xbc4   : > { %v4604_v32 = vpop.eup %4603  ;;  %v3717_v24 = vadd.f32 1.0, %v4602_v54  ;;  %v3721_v50 = vmul.f32 %v3713_v22, %v6642_v2 }
 0xbc5   : > { %v3719_v19 = vadd.f32 1.0, %v4604_v32  ;;  %v3723_v44 = vmul.f32 %v3715_v37, %v6645_v46 }
 0xbc6   : > { %v3725_v48 = vmul.f32 %v3717_v24, %v6646_v0  ;;  %v4135_v43 = vpack.c.bf16 %v3721_v50, %v3720_v33 }
 0xbc7   : > { %v3727_v38 = vmul.f32 %v3719_v19, %v6647_v13  ;;  %v4136_v36 = vpack.c.bf16 %v3723_v44, %v3722_v18 }
 0xbc8   : > { %v4137_v11 = vpack.c.bf16 %v3725_v48, %v3724_v34  ;;  %4119 = vst [vmem:[%s6403_s30 + $0x20] sm:$0xff] %v4135_v43 }
 0xbc9   : > { %v4138_v61 = vpack.c.bf16 %v3727_v38, %v3726_v12  ;;  %4120 = vst [vmem:[%s6403_s30 + $0x28] sm:$0xff] %v4136_v36 }
 0xbca   : > { %4121 = vst [vmem:[%s6403_s30 + $0x30] sm:$0xff] %v4137_v11 }
 0xbcb   : > { %4122 = vst [vmem:[%s6403_s30 + $0x38] sm:$0xff] %v4138_v61 }
 0xbcc   : > { %4986 = shalt.err (!%p4983_p2)
}
 0xbcd   : > { %s4987_s30 = scalar_lea.hbm %s6462_s27, 1024  ;;  %s4991_s14 = scalar_lea.hbm %s6648_s3, 2048 }
 0xbce   : > { %p4988_p6 = scmp.ne.s32.totalorder %s6462_s27, %s4987_s30  ;;  %p4992_p1 = scmp.lt.u32.totalorder %s6462_s27, %s6648_s3 }
 0xbcf   : > { %p4993_p11 = scmp.lt.u32.totalorder %s4991_s14, %s4987_s30  ;;  %p4995_p13 = scmp.lt.u32.totalorder %s4987_s30, %s6462_s27 }
 0xbd0   : > { %p4989_p5 = pnand %p4988_p6, %p6649_p8 }
 0xbd1   : > { %p4994_p12 = por %p4993_p11, %p4992_p1 }
 0xbd2   : > { %p4990_p10 = pneg %p4989_p5 }
 0xbd3   : > { %p4996_p7 = por %p4995_p13, %p4994_p12 }
 0xbd5   : > { %p4997_p9 = pnand %p4996_p7, %p4990_p10 }
 0xbd7   : > { %5000 = shalt.err (!%p4997_p9)
}
 0xbd8   : > { %s5094_s25 = smov 128   ;;  %s5095_s29 = smov 8  }
 0xbd9   : > { %4397 = dma.vmem_to_hbm [thread:$0]  (%p6649_p8), %s6464_s21, 1024, %s6462_s27, %s3758_s23, %s5094_s25, %s5094_s25, %s5095_s29  }
 0xbda PF: > { %s6650_s13 = sld [smem:[#allocation33_spill]]  ;;  %p6651_p4 = scmp.ne.s32.totalorder %s6590_s19, 0 }
 0xbdb   : > { %p6652_p3 = scmp.ge.s32.totalorder %s5063_s18, 2 }
 0xbdd   : > { %p4441_p0 = pnand %p6652_p3, %p6651_p4 }
 0xbe0   : > { %s3787_s26 = sand.u32 1, %s6650_s13  }
 0xbe1   : > { %s3788_s30 = scalar_lea.sflag [#allocation5], %s3787_s26 }
 0xbe2   : > { %5046 = dma.done.wait (!%p4441_p0), %s3788_s30, 1024  }
 0xbe3   : > { %5048 = vsyncadd (!%p4441_p0), %s3788_s30, 4294966272  ;;  %s6653_s14 = smov %s5479_s15  ;;  %p35_p2 = scmp.ge.s32.totalorder %s5468_s28, 4  }
 0xbe4   : > { %s6654_s15 = smov %s5055_s16  ;;  %s6655_s16 = smov %s5059_s17 }
 0xbe5   : > { %s6656_s17 = smov %s6653_s14  ;;  %s6657_s18 = smov %s5468_s28 }
 0xbe6   :  { %37 = sbr.rel (!%p35_p2) target bundleno = 16 (0x10), region = 171 }
 0xbed   :  { %3793 = vsyncpa [#allocation4], 1 }
 0xbee   :  { %3795 = vsyncpa [#allocation4 + $0x1], 1 }
 0xbef   :  { %3796 = vsyncpa [#allocation7], 1 }
 0xbf0   :  { %3797 = vsyncpa [#allocation10], 1 }
 0xbf1   :  { %3798 = vsyncpa [#allocation13], 1 }
 0xbf2   :  { %3799 = vsyncpa [#allocation16], 1 }
 0xbf3   :  { %3800 = vsyncpa [#allocation19], 1 }
 0xbf4   :  { %3801 = vsyncpa [#allocation22], 1 }
 0xbf5   :  { %3802 = vsyncpa [#allocation5], 1 }
 0xbf6   :  { %3804 = vsyncpa [#allocation5 + $0x1], 1 }

</bundles_post_ra>
